<compile_context>
chip_gen: v5e
topology: v5e:2x2
jax: 0.10.0
libtpu: 0.0.40
codegen_flags: <defaults>
</compile_context>

<pallas_src>
import jax
import jax.numpy as jnp
from jax.experimental import pallas as pl
from jax.experimental.pallas import tpu as pltpu

# ----------------------------------------------------------------------------
# Synthetic "config" (mirrors config.get(...) in the PyTorch module).
# ----------------------------------------------------------------------------
CONFIG = dict(
    cluster_num=4,
    token_dist_sample=3,
    l1_in=32,
    actor_l2_in=32, actor_l3_in=32, actor_l4_in=32,
    critic_l2_in=32, critic_l3_in=32, critic_l4_in=32,
    threshold_num=8,
)

F_STATE = 1 + CONFIG["cluster_num"] + CONFIG["token_dist_sample"]   # 8
D_IN = 2 * F_STATE                                                  # 16 (cat(state, state^2))
L1 = CONFIG["l1_in"]
A2, A3, A4 = CONFIG["actor_l2_in"], CONFIG["actor_l3_in"], CONFIG["actor_l4_in"]
C2, C3, C4 = CONFIG["critic_l2_in"], CONFIG["critic_l3_in"], CONFIG["critic_l4_in"]
N_THRESH = CONFIG["threshold_num"]

LANES = 128
N_BLOCKS = 5                       # fc1, L2-fused, L3-fused, L4-fused, head-fused
BIAS_ROWS = 8
SLAB_ROWS = N_BLOCKS * LANES + BIAS_ROWS   # 648
OUT_LANES = 16                     # pi in lanes [0,8), v at lane 8, zeros beyond
B_TILE = 512                       # sweep 512-2048; 512 is VMEM-safe on v7x


# ----------------------------------------------------------------------------
# Pallas kernel: whole forward pass for one batch tile.
# ----------------------------------------------------------------------------
def _ac_kernel(x_ref, w_ref, o_ref):
    f32, bf16 = jnp.float32, jnp.bfloat16

    s = x_ref[...]                               # (bt, 8) raw states, f32
    s_bf = s.astype(bf16)
    s2_bf = (s * s).astype(bf16)                 # square in f32, then cast

    bias = w_ref[N_BLOCKS * LANES:SLAB_ROWS, :]  # (8, 128) bf16 bias block

    def mm(a, w):                                # bf16 x bf16 -> f32 accumulate (MXU)
        return jnp.dot(a, w, preferred_element_type=f32)

    def b_row(idx):
        return bias[idx:idx + 1, :].astype(f32)  # (1, 128)

    relu = lambda z: jnp.maximum(z, 0.0)

    # fc1: weight rows [0,8) multiply `state`, rows [8,16) multiply `state**2`
    # -> realizes cat(state, state**2) without building a padded input.
    h = mm(s_bf, w_ref[0:F_STATE, :]) + mm(s2_bf, w_ref[F_STATE:D_IN, :]) + b_row(0)
    h = relu(h)                                  # shared fc1 output, lanes [0,32)

    def layer(h, idx, act):
        w = w_ref[idx * LANES:(idx + 1) * LANES, :]          # (128, 128) bf16
        return act(mm(h.astype(bf16), w) + b_row(idx))

    h = layer(h, 1, jnp.tanh)        # actor_fc2 | critic_fc2   (lanes [0,32) | [32,64))
    h = layer(h, 2, jnp.tanh)        # actor_fc3 | critic_fc3   (block-diagonal)
    h = layer(h, 3, relu)            # actor_fc4 | critic_fc4   (block-diagonal)
    out = layer(h, 4, lambda z: z)   # fc_pi | fc_v : logits lanes [0,8), v at lane 8

    head = out[:, :OUT_LANES]                                   # (bt, 16)
    col = jax.lax.broadcasted_iota(jnp.int32, head.shape, 1)
    is_logit = col < N_THRESH

    # Lane-masked softmax over the logit lanes only (f32, exact divide).
    masked = jnp.where(is_logit, head, -jnp.inf)
    m = jnp.max(masked, axis=-1, keepdims=True)
    e = jnp.exp(masked - m)                   # exp(-inf)=0 on non-logit lanes: no inf/NaN
    denom = jnp.sum(e, axis=-1, keepdims=True)
    pi = e / denom                            # exact: each row of pi sums to 1
    o_ref[...] = jnp.where(is_logit, pi, head)   # pi lanes [0,8), v lane 8, zeros beyond


# ----------------------------------------------------------------------------
# Wrapper
# ----------------------------------------------------------------------------
def four_layer_ac_forward(states, packed_params):
    """states: (B, F_STATE) f32.  Returns (pi (B, N_THRESH), v (B, 1))."""
    B = states.shape[0]
    n_tiles = pl.cdiv(B, B_TILE)
    B_pad = n_tiles * B_TILE
    x = states.astype(jnp.float32)
    if B_pad != B:
        x = jnp.pad(x, ((0, B_pad - B), (0, 0)))     # remainder rows masked off below

    out = pl.pallas_call(
        _ac_kernel,
        out_shape=jax.ShapeDtypeStruct((B_pad, OUT_LANES), jnp.float32),
        grid_spec=pltpu.PrefetchScalarGridSpec(
            num_scalar_prefetch=0,
            grid=(n_tiles,),
            in_specs=[
                # Raw 8-lane states: full last dim => legal block, ~16x less input DMA.
                pl.BlockSpec((B_TILE, F_STATE), lambda i: (i, 0)),
                # Constant index_map: slab DMA'd once per core, stays resident.
                pl.BlockSpec((SLAB_ROWS, LANES), lambda i: (0, 0)),
            ],
            out_specs=pl.BlockSpec((B_TILE, OUT_LANES), lambda i: (i, 0)),
        ),
        compiler_params=pltpu.CompilerParams(
            dimension_semantics=("parallel",)),
    )(x, packed_params)

    pi = out[:B, :N_THRESH]
    v = out[:B, N_THRESH:N_THRESH + 1]
    return pi, v


# ----------------------------------------------------------------------------
# Parameter init (nn.Linear-style uniform bounds, weights stored (in, out)).
# ----------------------------------------------------------------------------
def init_params(key):
    def linear(k, fan_in, fan_out):
        kw, kb = jax.random.split(k)
        bound = float(1.0 / (fan_in ** 0.5))
        w = jax.random.uniform(kw, (fan_in, fan_out), jnp.float32, -bound, bound)
        b = jax.random.uniform(kb, (fan_out,), jnp.float32, -bound, bound)
        return w, b

    ks = jax.random.split(key, 9)
    w1, b1 = linear(ks[0], D_IN, L1)
    wa2, ba2 = linear(ks[1], L1, A2)
    wa3, ba3 = linear(ks[2], A2, A3)
    wa4, ba4 = linear(ks[3], A3, A4)
    wc2, bc2 = linear(ks[4], L1, C2)
    wc3, bc3 = linear(ks[5], C2, C3)
    wc4, bc4 = linear(ks[6], C3, C4)
    wpi, bpi = linear(ks[7], A4, N_THRESH)
    wv, bv = linear(ks[8], C4, 1)
    return dict(w1=w1, b1=b1, wa2=wa2, ba2=ba2, wa3=wa3, ba3=ba3, wa4=wa4, ba4=ba4,
                wc2=wc2, bc2=bc2, wc3=wc3, bc3=bc3, wc4=wc4, bc4=bc4,
                wpi=wpi, bpi=bpi, wv=wv, bv=bv)


def pack_params(p):
    """Pack all layers into one (SLAB_ROWS, 128) bf16 slab (done once, offline)."""
    def wblock(entries):
        blk = jnp.zeros((LANES, LANES), jnp.float32)
        brow = jnp.zeros((LANES,), jnp.float32)
        for w, b, r, c in entries:
            k, n = w.shape
            blk = blk.at[r:r + k, c:c + n].set(w)
            brow = brow.at[c:c + n].set(b)
        return blk, brow

    blk1, bias1 = wblock([(p["w1"], p["b1"], 0, 0)])
    blk2, bias2 = wblock([(p["wa2"], p["ba2"], 0, 0),
                          (p["wc2"], p["bc2"], 0, A2)])
    blk3, bias3 = wblock([(p["wa3"], p["ba3"], 0, 0),
                          (p["wc3"], p["bc3"], A2, A3)])
    blk4, bias4 = wblock([(p["wa4"], p["ba4"], 0, 0),
                          (p["wc4"], p["bc4"], A3, A4)])
    blk5, bias5 = wblock([(p["wpi"], p["bpi"], 0, 0),
                          (p["wv"], p["bv"], A4, N_THRESH)])

    bias_blk = jnp.stack(
        [bias1, bias2, bias3, bias4, bias5]
        + [jnp.zeros((LANES,), jnp.float32)] * (BIAS_ROWS - N_BLOCKS),
        axis=0)                                                    # (8, 128)
    slab = jnp.concatenate([blk1, blk2, blk3, blk4, blk5, bias_blk], axis=0)
    return slab.astype(jnp.bfloat16)                               # bf16 MXU operands


# Pure-JAX reference (mirrors the PyTorch forward; fc1 result is shared).
# matmul_dtype=bf16 reproduces the kernel's mixed precision exactly.
def reference_forward(states, p, matmul_dtype=jnp.float32):
    def lin(h, w, b):
        return (jnp.dot(h.astype(matmul_dtype), w.astype(matmul_dtype),
                        preferred_element_type=jnp.float32)
                + b.astype(matmul_dtype).astype(jnp.float32))

    s = jnp.concatenate([states, jnp.square(states)], axis=-1)
    h1 = jax.nn.relu(lin(s, p["w1"], p["b1"]))
    a = jnp.tanh(lin(h1, p["wa2"], p["ba2"]))
    a = jnp.tanh(lin(a, p["wa3"], p["ba3"]))
    a = jax.nn.relu(lin(a, p["wa4"], p["ba4"]))
    pi = jax.nn.softmax(lin(a, p["wpi"], p["bpi"]), axis=-1)   # softmax(dim=0) of a 1-D state
    c = jnp.tanh(lin(h1, p["wc2"], p["bc2"]))
    c = jnp.tanh(lin(c, p["wc3"], p["bc3"]))
    c = jax.nn.relu(lin(c, p["wc4"], p["bc4"]))
    v = lin(c, p["wv"], p["bv"])
    return pi, v


if __name__ == "__main__":
    key = jax.random.PRNGKey(0)
    k_params, k_state = jax.random.split(key)
    params = init_params(k_params)
    packed = pack_params(params)

    # Non-multiple-of-tile batch (exercises the pad/remainder path) and >= 8
    # grid steps so each v7x TensorCore keeps its input/output pipeline busy.
    B = 8 * B_TILE + 4                               # 4100 states -> grid=(9,)
    states = jax.random.normal(k_state, (B, F_STATE), jnp.float32)

    pi, v = jax.jit(four_layer_ac_forward)(states, packed)
    jax.block_until_ready((pi, v))

    assert pi.shape == (B, N_THRESH) and v.shape == (B, 1)

    # (a) exact divide in the softmax => each row of pi sums to 1.
    assert jnp.allclose(jnp.sum(pi, axis=-1), 1.0, atol=1e-5)

    # (b) tight check against a reference using the kernel's exact mixed
    #     precision (bf16 matmul operands, f32 accumulation / activations).
    pi_bf, v_bf = reference_forward(states, params, matmul_dtype=jnp.bfloat16)
    assert jnp.allclose(pi, pi_bf, atol=2e-3), float(jnp.max(jnp.abs(pi - pi_bf)))
    assert jnp.allclose(v, v_bf, atol=2e-3), float(jnp.max(jnp.abs(v - v_bf)))

    # (c) sanity check against the pure-f32 reference (small bf16 weight drift).
    pi_f32, v_f32 = reference_forward(states, params, matmul_dtype=jnp.float32)
    assert float(jnp.mean(jnp.abs(pi - pi_f32))) < 2e-2
    assert float(jnp.mean(jnp.abs(v - v_f32))) < 5e-2

    print("KERNEL_OK")
</pallas_src>

<mosaic_0001>
module attributes {stable_mosaic.version = 11 : i64} {
  func.func @_ac_kernel(%arg0: i32, %arg1: memref<512x8xf32, #tpu.memory_space<vmem>>, %arg2: memref<648x128xbf16, #tpu.memory_space<vmem>>, %arg3: memref<512x16xf32, #tpu.memory_space<vmem>>) attributes {dimension_semantics = [#tpu.dimension_semantics<parallel>], iteration_bounds = array<i64: 9>, scalar_prefetch = 0 : i64, scratch_operands = 0 : i64, tpu.core_type = #tpu.core_type<tc>, window_params = [{transform_indices = @transform_0, window_bounds = array<i64: 512, 8>}, {pipeline_mode = #tpu.pipeline_mode<synchronous>, transform_indices = @transform_1, window_bounds = array<i64: 648, 128>}, {transform_indices = @transform_2, window_bounds = array<i64: 512, 16>}]} {
    %c0 = arith.constant 0 : index
    %c0_0 = arith.constant 0 : index
    %0 = vector.load %arg1[%c0, %c0_0] : memref<512x8xf32, #tpu.memory_space<vmem>>, vector<512x8xf32>
    %1 = arith.truncf %0 : vector<512x8xf32> to vector<512x8xbf16>
    %2 = arith.mulf %0, %0 : vector<512x8xf32>
    %3 = arith.truncf %2 : vector<512x8xf32> to vector<512x8xbf16>
    %c640 = arith.constant 640 : index
    %c0_1 = arith.constant 0 : index
    %4 = vector.load %arg2[%c640, %c0_1] : memref<648x128xbf16, #tpu.memory_space<vmem>>, vector<8x128xbf16>
    %c0_2 = arith.constant 0 : index
    %c0_3 = arith.constant 0 : index
    %5 = vector.load %arg2[%c0_2, %c0_3] : memref<648x128xbf16, #tpu.memory_space<vmem>>, vector<8x128xbf16>
    %cst = arith.constant dense<0.000000e+00> : vector<512x128xf32>
    %6 = tpu.matmul %1, %5, %cst {dimension_numbers = #tpu.dot_dimension_numbers<[1], [0], [0], [1], [0, 0, 1, 1], [], []>} : vector<512x8xbf16>, vector<8x128xbf16>, vector<512x128xf32> -> vector<512x128xf32>
    %c8 = arith.constant 8 : index
    %c0_4 = arith.constant 0 : index
    %7 = vector.load %arg2[%c8, %c0_4] : memref<648x128xbf16, #tpu.memory_space<vmem>>, vector<8x128xbf16>
    %cst_5 = arith.constant dense<0.000000e+00> : vector<512x128xf32>
    %8 = tpu.matmul %3, %7, %cst_5 {dimension_numbers = #tpu.dot_dimension_numbers<[1], [0], [0], [1], [0, 0, 1, 1], [], []>} : vector<512x8xbf16>, vector<8x128xbf16>, vector<512x128xf32> -> vector<512x128xf32>
    %9 = arith.addf %6, %8 : vector<512x128xf32>
    %10 = vector.extract_strided_slice %4 {offsets = [0, 0], sizes = [1, 128], strides = [1, 1]} : vector<8x128xbf16> to vector<1x128xbf16>
    %11 = arith.extf %10 : vector<1x128xbf16> to vector<1x128xf32>
    %12 = vector.broadcast %11 : vector<1x128xf32> to vector<512x128xf32>
    %13 = arith.addf %9, %12 : vector<512x128xf32>
    %cst_6 = arith.constant 0.000000e+00 : f32
    %14 = vector.broadcast %cst_6 : f32 to vector<512x128xf32>
    %15 = arith.maximumf %13, %14 : vector<512x128xf32>
    %c128 = arith.constant 128 : index
    %c0_7 = arith.constant 0 : index
    %16 = vector.load %arg2[%c128, %c0_7] : memref<648x128xbf16, #tpu.memory_space<vmem>>, vector<128x128xbf16>
    %17 = arith.truncf %15 : vector<512x128xf32> to vector<512x128xbf16>
    %cst_8 = arith.constant dense<0.000000e+00> : vector<512x128xf32>
    %18 = tpu.matmul %17, %16, %cst_8 {dimension_numbers = #tpu.dot_dimension_numbers<[1], [0], [0], [1], [0, 0, 1, 1], [], []>} : vector<512x128xbf16>, vector<128x128xbf16>, vector<512x128xf32> -> vector<512x128xf32>
    %19 = vector.extract_strided_slice %4 {offsets = [1, 0], sizes = [1, 128], strides = [1, 1]} : vector<8x128xbf16> to vector<1x128xbf16>
    %20 = arith.extf %19 : vector<1x128xbf16> to vector<1x128xf32>
    %21 = vector.broadcast %20 : vector<1x128xf32> to vector<512x128xf32>
    %22 = arith.addf %18, %21 : vector<512x128xf32>
    %23 = math.tanh %22 : vector<512x128xf32>
    %c256 = arith.constant 256 : index
    %c0_9 = arith.constant 0 : index
    %24 = vector.load %arg2[%c256, %c0_9] : memref<648x128xbf16, #tpu.memory_space<vmem>>, vector<128x128xbf16>
    %25 = arith.truncf %23 : vector<512x128xf32> to vector<512x128xbf16>
    %cst_10 = arith.constant dense<0.000000e+00> : vector<512x128xf32>
    %26 = tpu.matmul %25, %24, %cst_10 {dimension_numbers = #tpu.dot_dimension_numbers<[1], [0], [0], [1], [0, 0, 1, 1], [], []>} : vector<512x128xbf16>, vector<128x128xbf16>, vector<512x128xf32> -> vector<512x128xf32>
    %27 = vector.extract_strided_slice %4 {offsets = [2, 0], sizes = [1, 128], strides = [1, 1]} : vector<8x128xbf16> to vector<1x128xbf16>
    %28 = arith.extf %27 : vector<1x128xbf16> to vector<1x128xf32>
    %29 = vector.broadcast %28 : vector<1x128xf32> to vector<512x128xf32>
    %30 = arith.addf %26, %29 : vector<512x128xf32>
    %31 = math.tanh %30 : vector<512x128xf32>
    %c384 = arith.constant 384 : index
    %c0_11 = arith.constant 0 : index
    %32 = vector.load %arg2[%c384, %c0_11] : memref<648x128xbf16, #tpu.memory_space<vmem>>, vector<128x128xbf16>
    %33 = arith.truncf %31 : vector<512x128xf32> to vector<512x128xbf16>
    %cst_12 = arith.constant dense<0.000000e+00> : vector<512x128xf32>
    %34 = tpu.matmul %33, %32, %cst_12 {dimension_numbers = #tpu.dot_dimension_numbers<[1], [0], [0], [1], [0, 0, 1, 1], [], []>} : vector<512x128xbf16>, vector<128x128xbf16>, vector<512x128xf32> -> vector<512x128xf32>
    %35 = vector.extract_strided_slice %4 {offsets = [3, 0], sizes = [1, 128], strides = [1, 1]} : vector<8x128xbf16> to vector<1x128xbf16>
    %36 = arith.extf %35 : vector<1x128xbf16> to vector<1x128xf32>
    %37 = vector.broadcast %36 : vector<1x128xf32> to vector<512x128xf32>
    %38 = arith.addf %34, %37 : vector<512x128xf32>
    %cst_13 = arith.constant 0.000000e+00 : f32
    %39 = vector.broadcast %cst_13 : f32 to vector<512x128xf32>
    %40 = arith.maximumf %38, %39 : vector<512x128xf32>
    %c512 = arith.constant 512 : index
    %c0_14 = arith.constant 0 : index
    %41 = vector.load %arg2[%c512, %c0_14] : memref<648x128xbf16, #tpu.memory_space<vmem>>, vector<128x128xbf16>
    %42 = arith.truncf %40 : vector<512x128xf32> to vector<512x128xbf16>
    %cst_15 = arith.constant dense<0.000000e+00> : vector<512x128xf32>
    %43 = tpu.matmul %42, %41, %cst_15 {dimension_numbers = #tpu.dot_dimension_numbers<[1], [0], [0], [1], [0, 0, 1, 1], [], []>} : vector<512x128xbf16>, vector<128x128xbf16>, vector<512x128xf32> -> vector<512x128xf32>
    %44 = vector.extract_strided_slice %4 {offsets = [4, 0], sizes = [1, 128], strides = [1, 1]} : vector<8x128xbf16> to vector<1x128xbf16>
    %45 = arith.extf %44 : vector<1x128xbf16> to vector<1x128xf32>
    %46 = vector.broadcast %45 : vector<1x128xf32> to vector<512x128xf32>
    %47 = arith.addf %43, %46 : vector<512x128xf32>
    %48 = vector.extract_strided_slice %47 {offsets = [0, 0], sizes = [512, 16], strides = [1, 1]} : vector<512x128xf32> to vector<512x16xf32>
    %49 = tpu.iota {dimensions = array<i32: 1>} : vector<512x16xi32>
    %c8_i32 = arith.constant 8 : i32
    %50 = vector.broadcast %c8_i32 : i32 to vector<512x16xi32>
    %51 = arith.cmpi slt, %49, %50 : vector<512x16xi32>
    %cst_16 = arith.constant 0xFF800000 : f32
    %52 = vector.broadcast %cst_16 : f32 to vector<512x16xf32>
    %53 = arith.select %51, %48, %52 : vector<512x16xi1>, vector<512x16xf32>
    %cst_17 = arith.constant dense<0xFF800000> : vector<512xf32>
    %54 = vector.multi_reduction <maximumf>, %53, %cst_17 [1] : vector<512x16xf32> to vector<512xf32>
    %55 = vector.shape_cast %54 : vector<512xf32> to vector<512x1xf32>
    %56 = vector.broadcast %55 : vector<512x1xf32> to vector<512x16xf32>
    %57 = arith.subf %53, %56 : vector<512x16xf32>
    %58 = math.exp %57 : vector<512x16xf32>
    %cst_18 = arith.constant dense<0.000000e+00> : vector<512xf32>
    %59 = vector.multi_reduction <add>, %58, %cst_18 [1] : vector<512x16xf32> to vector<512xf32>
    %60 = vector.shape_cast %59 : vector<512xf32> to vector<512x1xf32>
    %61 = vector.broadcast %60 : vector<512x1xf32> to vector<512x16xf32>
    %62 = arith.divf %58, %61 : vector<512x16xf32>
    %63 = arith.select %51, %62, %48 : vector<512x16xi1>, vector<512x16xf32>
    %c0_19 = arith.constant 0 : index
    %c0_20 = arith.constant 0 : index
    %64 = vector.load %arg3[%c0_19, %c0_20] : memref<512x16xf32, #tpu.memory_space<vmem>>, vector<512x16xf32>
    tpu.vector_store %arg3[%c0_19, %c0_20], %63 {strides = array<i32>} : memref<512x16xf32, #tpu.memory_space<vmem>>, vector<512x16xf32>,
    return
  }
  func.func @transform_0(%arg0: i32) -> (i32, i32) {
    %c0_i32 = arith.constant 0 : i32
    %c0_i32_0 = arith.constant 0 : i32
    return %arg0, %c0_i32 : i32, i32
  }
  func.func @transform_1(%arg0: i32) -> (i32, i32) {
    %c0_i32 = arith.constant 0 : i32
    %c0_i32_0 = arith.constant 0 : i32
    %c0_i32_1 = arith.constant 0 : i32
    return %c0_i32, %c0_i32_0 : i32, i32
  }
  func.func @transform_2(%arg0: i32) -> (i32, i32) {
    %c0_i32 = arith.constant 0 : i32
    %c0_i32_0 = arith.constant 0 : i32
    return %arg0, %c0_i32 : i32, i32
  }
}

</mosaic_0001>

<bundles_post_ra>
// kernel: four_layer_ac_forward.1
= control target key start
LH: loop header
LB: loop body
LE: loop exit
PB: predicated region body
PF: predicated region fallthrough
CT: control target
= control target key end

     0   :  { %s4843_s9 = smov 0   ;;  %s7217_s0 = inlined_call_operand.vmem [shape: f32[4608,8], index: 0, kind: input, shape index: {}]   ;;  %s7218_s1 = inlined_call_operand.vmem [shape: bf16[648,128], index: 1, kind: input, shape index: {}]   ;;  %s7219_s2 = inlined_call_operand.vmem [shape: f32[4608,16], index: 2, kind: output, shape index: {}]  }
   0x1 LB: > { %s4055_s10 = sadd.s32 4294967295, %s4826_s9   ;;  %p4059_p0 = scmp.ge.s32.totalorder %s4826_s9, 1  ;;  %s4826_s9 = sphi %s4843_s9, %s12_s9  }
   0x2   : > { %p113_p1 = scmp.lt.s32.totalorder %s4826_s9, 10 }
   0x4   : > { %p114_p2 = pnand %p4059_p0, %p113_p1 }
   0x6   : > { %117 = sbr.rel (%p114_p2) target bundleno = 1611 (0x64b), region = 28 }
   0xb   : > { %v341_v0 = vld [vmem:[%s7218_s1] sm:$0xf]  ;;  %vm440_vm0 = vcmask 1043456   ;;  %v342_v1 = vld [vmem:[%s7218_s1 + $0x4] sm:$0xf]  ;;  %s4060_s15 = sshll.u32 %s4055_s10, 6 }
   0xc   : > { %v710_v2 = vsel %vm440_vm0, %v341_v0, 0  ;;  %v442_v3 = vsel %vm440_vm0, %v342_v1, 0  ;;  %p136_p3 = scmp.lt.s32.totalorder %s4060_s15, 575  ;;  %v4265_v4 = vld [vmem:[%s7218_s1 + $0x78] sm:$0xff]  ;;  %vm343_vm1 = vcmask 64512   ;;  %v4264_v16 = vld [vmem:[%s7218_s1 + $0x70] sm:$0xff] }
   0xd   : > { %4291 = vmatpush.bf16.msra.mxu3 %v710_v2  ;;  %451 = vmatpush.bf16.msra.mxu0 %v442_v3  ;;  %v4263_v30 = vld [vmem:[%s7218_s1 + $0x68] sm:$0xff]  ;;  %v4262_v54 = vld [vmem:[%s7218_s1 + $0x60] sm:$0xff]  ;;  %vm2334_vm3 = vcmask 130048  }
   0xe   : > { %4290 = vmatpush.bf16.msra.mxu2 %v442_v3  ;;  %s7370_s15 = smov (!%p136_p3, %s4060_s15), 575  ;;  %719 = vmatpush.bf16.msra.mxu1 %v710_v2 }
   0xf   : > { %s4061_s18 = sshll.u32 %s7370_s15, 3 }
  0x10   : > { %s4868_s21 = scalar_lea.vmem %s7217_s0, %s4061_s18  ;;  %s6114_s11 = scalar_lea.vmem %s7219_s2, %s4061_s18 }
  0x11   : > { %v4871_v5 = vld [vmem:[%s4868_s21 + $0x100] sm:$0xff]  ;;  %v4874_v6 = vld [vmem:[%s4868_s21 + $0x108] sm:$0xff]  ;;  %v182_v11 = vld [vmem:[%s4868_s21 + $0x110] sm:$0xff] }
  0x12   : > { %1108 = vmatpush.bf16.msrb.mxu2 %v4265_v4  ;;  %v4877_v7 = vld [vmem:[%s4868_s21] sm:$0xff]  ;;  %v228_v8 = vpack.c.bf16 %v4874_v6, %v4871_v5  ;;  %v149_v9 = vld [vmem:[%s4868_s21 + $0x8] sm:$0xff]  ;;  %v183_v12 = vld [vmem:[%s4868_s21 + $0x118] sm:$0xff]  ;;  %v278_v14 = vmul.f32 %v182_v11, %v182_v11 }
  0x13   : > { %v244_v10 = vmul.f32 %v4877_v7, %v4877_v7  ;;  %v245_v13 = vmul.f32 %v149_v9, %v149_v9  ;;  %v279_v15 = vmul.f32 %v183_v12, %v183_v12  ;;  %v4893_v19 = vld [vmem:[%s4868_s21 + $0x10] sm:$0xff]  ;;  %v4896_v20 = vld [vmem:[%s4868_s21 + $0x18] sm:$0xff]  ;;  %v184_v21 = vld [vmem:[%s4868_s21 + $0x120] sm:$0xff]  ;;  %v229_v27 = vpack.c.bf16 %v183_v12, %v182_v11 }
  0x14   : > { %4112 = vmatmul.msk.bf16.vlgmr.msra.gmra.mxu3 %vm343_vm1, %v228_v8  ;;  %v185_v22 = vld [vmem:[%s4868_s21 + $0x128] sm:$0xff]  ;;  %v246_v23 = vmul.f32 %v4893_v19, %v4893_v19  ;;  %v247_v24 = vmul.f32 %v4896_v20, %v4896_v20  ;;  %v280_v25 = vmul.f32 %v184_v21, %v184_v21  ;;  %v4911_v31 = vld [vmem:[%s4868_s21 + $0x20] sm:$0xff]  ;;  %v186_v33 = vld [vmem:[%s4868_s21 + $0x130] sm:$0xff]  ;;  %v212_v53 = vpack.c.bf16 %v149_v9, %v4877_v7 }
  0x15   : > { %v308_v17 = vpack.c.bf16 %v245_v13, %v244_v10  ;;  %v325_v18 = vpack.c.bf16 %v279_v15, %v278_v14  ;;  %v281_v26 = vmul.f32 %v185_v22, %v185_v22  ;;  %v4914_v32 = vld [vmem:[%s4868_s21 + $0x28] sm:$0xff]  ;;  %v187_v34 = vld [vmem:[%s4868_s21 + $0x138] sm:$0xff]  ;;  %v248_v35 = vmul.f32 %v4911_v31, %v4911_v31  ;;  %v4926_v42 = vld [vmem:[%s4868_s21 + $0x30] sm:$0xff] }
  0x16   : > { %1109 = vmatpush.bf16.msrb.mxu2 %v4264_v16  ;;  %v309_v28 = vpack.c.bf16 %v247_v24, %v246_v23  ;;  %v249_v36 = vmul.f32 %v4914_v32, %v4914_v32  ;;  %v282_v37 = vmul.f32 %v186_v33, %v186_v33  ;;  %v283_v38 = vmul.f32 %v187_v34, %v187_v34  ;;  %v4929_v43 = vld [vmem:[%s4868_s21 + $0x38] sm:$0xff]  ;;  %v188_v44 = vld [vmem:[%s4868_s21 + $0x140] sm:$0xff]  ;;  %v189_v45 = vld [vmem:[%s4868_s21 + $0x148] sm:$0xff] }
  0x17   : > { %4064 = vmatmul.msk.bf16.vlgmr.msra.gmra.mxu0 %vm343_vm1, %v308_v17  ;;  %4081 = vmatmul.msk.bf16.vlgmr.msra.gmra.mxu2 %vm343_vm1, %v325_v18  ;;  %v326_v29 = vpack.c.bf16 %v281_v26, %v280_v25  ;;  %v230_v39 = vpack.c.bf16 %v185_v22, %v184_v21  ;;  %v250_v46 = vmul.f32 %v4926_v42, %v4926_v42  ;;  %v4946_v55 = vld [vmem:[%s4868_s21 + $0x40] sm:$0xff]  ;;  %v4949_v56 = vld [vmem:[%s4868_s21 + $0x48] sm:$0xff]  ;;  %v190_v57 = vld [vmem:[%s4868_s21 + $0x150] sm:$0xff] }
  0x18   : > { %v310_v40 = vpack.c.bf16 %v249_v36, %v248_v35  ;;  %v327_v41 = vpack.c.bf16 %v283_v38, %v282_v37  ;;  %v251_v47 = vmul.f32 %v4929_v43, %v4929_v43  ;;  %v284_v48 = vmul.f32 %v188_v44, %v188_v44  ;;  %4096 = vmatmul.msk.bf16.vlgmr.msra.gmra.mxu1 %vm343_vm1, %v212_v53  ;;  %v191_v58 = vld [vmem:[%s4868_s21 + $0x158] sm:$0xff]  ;;  %v4964_v3 = vld [vmem:[%s4868_s21 + $0x50] sm:$0xff]  ;;  %v192_v7 = vld [vmem:[%s4868_s21 + $0x160] sm:$0xff] }
  0x19   : > { %v285_v49 = vmul.f32 %v189_v45, %v189_v45  ;;  %v231_v50 = vpack.c.bf16 %v187_v34, %v186_v33  ;;  %v252_v59 = vmul.f32 %v4946_v55, %v4946_v55  ;;  %v253_v60 = vmul.f32 %v4949_v56, %v4949_v56  ;;  %v4967_v4 = vld [vmem:[%s4868_s21 + $0x58] sm:$0xff]  ;;  %v193_v8 = vld [vmem:[%s4868_s21 + $0x168] sm:$0xff]  ;;  %v4985_v18 = vld [vmem:[%s4868_s21 + $0x60] sm:$0xff] }
  0x1a   : > { %1110 = vmatpush.bf16.msrb.mxu2 %v4263_v30  ;;  %v311_v51 = vpack.c.bf16 %v251_v47, %v250_v46  ;;  %v286_v61 = vmul.f32 %v190_v57, %v190_v57  ;;  %v287_v62 = vmul.f32 %v191_v58, %v191_v58  ;;  %v232_v63 = vpack.c.bf16 %v189_v45, %v188_v44  ;;  %v4261_v16 = vld [vmem:[%s7218_s1 + $0x58] sm:$0xff]  ;;  %v5021_v44 = vld [vmem:[%s4868_s21 + $0x80] sm:$0xff]  ;;  %v5024_v45 = vld [vmem:[%s4868_s21 + $0x88] sm:$0xff] }
  0x1b   : > { %v328_v52 = vpack.c.bf16 %v285_v49, %v284_v48  ;;  %v312_v0 = vpack.c.bf16 %v253_v60, %v252_v59  ;;  %v213_v2 = vpack.c.bf16 %v4896_v20, %v4893_v19  ;;  %v254_v9 = vmul.f32 %v4964_v3, %v4964_v3  ;;  %v4988_v19 = vld [vmem:[%s4868_s21 + $0x68] sm:$0xff]  ;;  %v194_v20 = vld [vmem:[%s4868_s21 + $0x170] sm:$0xff]  ;;  %v195_v21 = vld [vmem:[%s4868_s21 + $0x178] sm:$0xff] }
  0x1c   : > { %v329_v1 = vpack.c.bf16 %v287_v62, %v286_v61  ;;  %v255_v10 = vmul.f32 %v4967_v4, %v4967_v4  ;;  %v288_v11 = vmul.f32 %v192_v7, %v192_v7  ;;  %v289_v12 = vmul.f32 %v193_v8, %v193_v8  ;;  %v5003_v30 = vld [vmem:[%s4868_s21 + $0x78] sm:$0xff]  ;;  %v198_v46 = vld [vmem:[%s4868_s21 + $0x190] sm:$0xff]  ;;  %v200_v61 = vld [vmem:[%s4868_s21 + $0x1a0] sm:$0xff] }
  0x1d   : > { %v233_v13 = vpack.c.bf16 %v191_v58, %v190_v57  ;;  %v214_v17 = vpack.c.bf16 %v4914_v32, %v4911_v31  ;;  %v256_v22 = vmul.f32 %v4985_v18, %v4985_v18  ;;  %v257_v23 = vmul.f32 %v4988_v19, %v4988_v19  ;;  %v196_v31 = vld [vmem:[%s4868_s21 + $0x180] sm:$0xff]  ;;  %v197_v32 = vld [vmem:[%s4868_s21 + $0x188] sm:$0xff]  ;;  %v4273_v33 = vld [vmem:[%s7218_s1 + $0xb8] sm:$0xff] }
  0x1e   : > { %1111 = vmatpush.bf16.msrb.mxu2 %v4262_v54  ;;  %v313_v14 = vpack.c.bf16 %v255_v10, %v254_v9  ;;  %v330_v15 = vpack.c.bf16 %v289_v12, %v288_v11  ;;  %v290_v24 = vmul.f32 %v194_v20, %v194_v20  ;;  %v291_v25 = vmul.f32 %v195_v21, %v195_v21  ;;  %v199_v47 = vld [vmem:[%s4868_s21 + $0x198] sm:$0xff]  ;;  %v5044_v59 = vld [vmem:[%s4868_s21 + $0x90] sm:$0xff]  ;;  %v340_v12 = vld [vmem:[%s7218_s1 + $0x140] sm:$0xf] }
  0x1f   : > { %v234_v26 = vpack.c.bf16 %v193_v8, %v192_v7  ;;  %1438 = vmatpush.bf16.msrb.mxu3 %v4273_v33  ;;  %v259_v35 = vmul.f32 %v5003_v30, %v5003_v30  ;;  %v292_v36 = vmul.f32 %v196_v31, %v196_v31  ;;  %v293_v37 = vmul.f32 %v197_v32, %v197_v32  ;;  %v5047_v60 = vld [vmem:[%s4868_s21 + $0x98] sm:$0xff] }
  0x20   : > { %v215_v38 = vpack.c.bf16 %v4929_v43, %v4926_v42  ;;  %v4260_v42 = vld [vmem:[%s7218_s1 + $0x50] sm:$0xff]  ;;  %v260_v43 = vmul.f32 %v5021_v44, %v5021_v44  ;;  %v261_v48 = vmul.f32 %v5024_v45, %v5024_v45  ;;  %v294_v49 = vmul.f32 %v198_v46, %v198_v46 }
  0x21   : > { %v262_v62 = vmul.f32 %v5044_v59, %v5044_v59  ;;  %v217_v7 = vpack.c.bf16 %v4967_v4, %v4964_v3  ;;  %v237_v8 = vpack.c.bf16 %v199_v47, %v198_v46  ;;  %v5069_v4 = vunpack.c.l.bf16 %v340_v12 }
  0x22   : > { %1112 = vmatpush.bf16.msrb.mxu2 %v4261_v16  ;;  %v316_v53 = vpack.c.bf16 %v261_v48, %v260_v43  ;;  %v5075_v16 = vld [vmem:[%s4868_s21 + $0xa8] sm:$0xff]  ;;  %v5107_v43 = vld [vmem:[%s4868_s21 + $0xb8] sm:$0xff]  ;;  %v204_v48 = vld [vmem:[%s4868_s21 + $0x1c0] sm:$0xff] }
  0x24   : > { %4113 = vmatmul.msk.bf16.gmra.mxu3 %vm343_vm1, %v229_v27  ;;  %v314_v27 = vpack.c.bf16 %v257_v23, %v256_v22  ;;  %v203_v22 = vld [vmem:[%s4868_s21 + $0x1b8] sm:$0xff]  ;;  %v4259_v23 = vld [vmem:[%s7218_s1 + $0x48] sm:$0xff] }
  0x26   : > { %1113 = vmatpush.bf16.msrb.mxu2 %v4260_v42  ;;  %v5104_v42 = vld [vmem:[%s4868_s21 + $0xb0] sm:$0xff] }
  0x27   : > { %4065 = vmatmul.msk.bf16.gmra.mxu0 %vm343_vm1, %v309_v28  ;;  %4082 = vmatmul.msk.bf16.gmra.mxu2 %vm343_vm1, %v326_v29  ;;  %v331_v28 = vpack.c.bf16 %v291_v25, %v290_v24  ;;  %v5000_v29 = vld [vmem:[%s4868_s21 + $0x70] sm:$0xff] }
  0x28   : > { %4097 = vmatmul.msk.bf16.gmra.mxu1 %vm343_vm1, %v213_v2  ;;  %v258_v34 = vmul.f32 %v5000_v29, %v5000_v29 }
  0x2a   : > { %1114 = vmatpush.bf16.msrb.mxu2 %v4259_v23  ;;  %v4258_v23 = vld [vmem:[%s7218_s1 + $0x40] sm:$0xff] }
  0x2e   : > { %1115 = vmatpush.bf16.msrb.mxu2 %v4258_v23 }
  0x34   : > { %4114 = vmatmul.msk.bf16.gmra.mxu3 %vm343_vm1, %v230_v39  ;;  %v235_v39 = vpack.c.bf16 %v195_v21, %v194_v20  ;;  %v5080_v20 = vperm.slane %v5069_v4, 0  ;;  %v202_v21 = vld [vmem:[%s4868_s21 + $0x1b0] sm:$0xff] }
  0x37   : > { %4066 = vmatmul.msk.bf16.gmra.mxu0 %vm343_vm1, %v310_v40  ;;  %4083 = vmatmul.msk.bf16.gmra.mxu2 %vm343_vm1, %v327_v41  ;;  %v315_v40 = vpack.c.bf16 %v259_v35, %v258_v34  ;;  %v332_v41 = vpack.c.bf16 %v293_v37, %v292_v36 }
  0x38   : > { %4098 = vmatmul.msk.bf16.gmra.mxu1 %vm343_vm1, %v214_v17 }
  0x44   : > { %4115 = vmatmul.msk.bf16.gmra.mxu3 %vm343_vm1, %v231_v50  ;;  %v295_v50 = vmul.f32 %v199_v47, %v199_v47 }
  0x46   : > { %v333_v54 = vpack.c.bf16 %v295_v50, %v294_v49  ;;  %v205_v49 = vld [vmem:[%s4868_s21 + $0x1c8] sm:$0xff] }
  0x47   : > { %4067 = vmatmul.msk.bf16.gmra.mxu0 %vm343_vm1, %v311_v51  ;;  %4084 = vmatmul.msk.bf16.gmra.mxu2 %vm343_vm1, %v328_v52  ;;  %v216_v51 = vpack.c.bf16 %v4949_v56, %v4946_v55  ;;  %v236_v52 = vpack.c.bf16 %v197_v32, %v196_v31  ;;  %v201_v55 = vld [vmem:[%s4868_s21 + $0x1a8] sm:$0xff]  ;;  %v4272_v56 = vld [vmem:[%s7218_s1 + $0xb0] sm:$0xff]  ;;  %v218_v31 = vpack.c.bf16 %v4988_v19, %v4985_v18 }
  0x48   : > { %4099 = vmatmul.msk.bf16.gmra.mxu1 %vm343_vm1, %v215_v38  ;;  %1439 = vmatpush.bf16.msrb.mxu3 %v4272_v56  ;;  %v297_v2 = vmul.f32 %v201_v55, %v201_v55  ;;  %v238_v34 = vpack.c.bf16 %v201_v55, %v200_v61  ;;  %v4271_v50 = vld [vmem:[%s7218_s1 + $0xa8] sm:$0xff] }
  0x4c   : > { %1440 = vmatpush.bf16.msrb.mxu3 %v4271_v50  ;;  %v5164_v50 = vld [vmem:[%s4868_s21 + $0xd0] sm:$0xff] }
  0x54   : > { %4116 = vmatmul.msk.bf16.gmra.mxu3 %vm343_vm1, %v232_v63 }
  0x57   : > { %4068 = vmatmul.msk.bf16.gmra.mxu0 %vm343_vm1, %v312_v0  ;;  %4085 = vmatmul.msk.bf16.gmra.mxu2 %vm343_vm1, %v329_v1  ;;  %v263_v0 = vmul.f32 %v5047_v60, %v5047_v60  ;;  %v296_v1 = vmul.f32 %v200_v61, %v200_v61  ;;  %v219_v61 = vpack.c.bf16 %v5003_v30, %v5000_v29 }
  0x58   : > { %4100 = vmatmul.msk.bf16.gmra.mxu1 %vm343_vm1, %v216_v51  ;;  %v266_v51 = vmul.f32 %v5104_v42, %v5104_v42 }
  0x59   : > { %v317_v10 = vpack.c.bf16 %v263_v0, %v262_v62  ;;  %v334_v11 = vpack.c.bf16 %v297_v2, %v296_v1  ;;  %v239_v0 = vpack.c.bf16 %v203_v22, %v202_v21 }
  0x64   : > { %4117 = vmatmul.msk.bf16.gmra.mxu3 %vm343_vm1, %v233_v13 }
  0x67   : > { %4069 = vmatmul.msk.bf16.gmra.mxu0 %vm343_vm1, %v313_v14  ;;  %4086 = vmatmul.msk.bf16.gmra.mxu2 %vm343_vm1, %v330_v15  ;;  %v5072_v15 = vld [vmem:[%s4868_s21 + $0xa0] sm:$0xff] }
  0x68   : > { %4101 = vmatmul.msk.bf16.gmra.mxu1 %vm343_vm1, %v217_v7  ;;  %v264_v24 = vmul.f32 %v5072_v15, %v5072_v15 }
  0x74   : > { %4118 = vmatmul.msk.bf16.gmra.mxu3 %vm343_vm1, %v234_v26  ;;  %v265_v26 = vmul.f32 %v5075_v16, %v5075_v16 }
  0x76   : > { %v318_v37 = vpack.c.bf16 %v265_v26, %v264_v24 }
  0x77   : > { %4070 = vmatmul.msk.bf16.gmra.mxu0 %vm343_vm1, %v314_v27  ;;  %4087 = vmatmul.msk.bf16.gmra.mxu2 %vm343_vm1, %v331_v28  ;;  %v298_v27 = vmul.f32 %v202_v21, %v202_v21  ;;  %v299_v28 = vmul.f32 %v203_v22, %v203_v22  ;;  %v206_v21 = vld [vmem:[%s4868_s21 + $0x1d0] sm:$0xff]  ;;  %v207_v22 = vld [vmem:[%s4868_s21 + $0x1d8] sm:$0xff] }
  0x78   : > { %4102 = vmatmul.msk.bf16.gmra.mxu1 %vm343_vm1, %v218_v31  ;;  %v303_v31 = vmul.f32 %v207_v22, %v207_v22 }
  0x79   : > { %v335_v38 = vpack.c.bf16 %v299_v28, %v298_v27  ;;  %v302_v28 = vmul.f32 %v206_v21, %v206_v21 }
  0x84   : > { %4119 = vmatmul.msk.bf16.gmra.mxu3 %vm343_vm1, %v235_v39 }
  0x87   : > { %4071 = vmatmul.msk.bf16.gmra.mxu0 %vm343_vm1, %v315_v40  ;;  %4088 = vmatmul.msk.bf16.gmra.mxu2 %vm343_vm1, %v332_v41 }
  0x88   : > { %4103 = vmatmul.msk.bf16.gmra.mxu1 %vm343_vm1, %v219_v61 }
  0x94   : > { %4120 = vmatmul.msk.bf16.gmra.mxu3 %vm343_vm1, %v236_v52  ;;  %v5077_v17 = vpop.f32.mrf.mxu0 }
  0x95   : > { %v5143_v24 = vpop.f32.mrf.mxu1 }
  0x97   : > { %4072 = vmatmul.msk.bf16.gmra.mxu0 %vm343_vm1, %v316_v53  ;;  %4089 = vmatmul.msk.bf16.gmra.mxu2 %vm343_vm1, %v333_v54  ;;  %v5041_v57 = vpop.f32.mrf.mxu3  ;;  %v267_v53 = vmul.f32 %v5107_v43, %v5107_v43  ;;  %v300_v54 = vmul.f32 %v204_v48, %v204_v48 }
  0x99   : > { %v319_v7 = vpack.c.bf16 %v267_v53, %v266_v51  ;;  %v5167_v51 = vld [vmem:[%s4868_s21 + $0xd8] sm:$0xff]  ;;  %v209_v53 = vld [vmem:[%s4868_s21 + $0x1e8] sm:$0xff] }
  0x9a   : > { %v538_v58 = vpop.f32.mrf.mxu2 }
  0x9c   : > { %v5097_v18 = vpop.f32.mrf.mxu0 }
  0x9f   : > { %v5056_v63 = vpop.f32.mrf.mxu3 }
  0xa2   : > { %v540_v9 = vpop.f32.mrf.mxu2 }
  0xa4   : > { %4121 = vmatmul.msk.bf16.gmra.mxu3 %vm343_vm1, %v237_v8  ;;  %v5120_v55 = vpop.f32.mrf.mxu0 }
  0xa7   : > { %4073 = vmatmul.msk.bf16.gmra.mxu0 %vm343_vm1, %v317_v10  ;;  %4090 = vmatmul.msk.bf16.gmra.mxu2 %vm343_vm1, %v334_v11  ;;  %v806_v13 = vpop.f32.mrf.mxu3 }
  0xa8   : > { %v807_v3 = vadd.f32 %v806_v13, %v538_v58  ;;  %v301_v58 = vmul.f32 %v205_v49, %v205_v49 }
  0xaa   : > { %v543_v14 = vpop.f32.mrf.mxu2  ;;  %v917_v32 = vadd.f32 %v5080_v20, %v807_v3  ;;  %v336_v8 = vpack.c.bf16 %v301_v58, %v300_v54  ;;  %v5133_v3 = vld [vmem:[%s4868_s21 + $0xc0] sm:$0xff] }
  0xab   : > { %v4270_v58 = vld [vmem:[%s7218_s1 + $0xa0] sm:$0xff] }
  0xac   : > { %v981_v39 = vmax.f32 %v917_v32, 0.0  ;;  %v5130_v12 = vpop.f32.mrf.mxu0  ;;  %v220_v32 = vpack.c.bf16 %v5024_v45, %v5021_v44  ;;  %v5157_v44 = vpop.f32.mrf.mxu1  ;;  %1441 = vmatpush.bf16.msrb.mxu3 %v4270_v58 }
  0xae   : > { %4104 = vmatmul.msk.bf16.gmra.mxu1 %vm343_vm1, %v220_v32  ;;  %v5200_v32 = vld [vmem:[%s4868_s21 + $0xe8] sm:$0xff] }
  0xaf   : > { %v808_v25 = vpop.f32.mrf.mxu3 }
  0xb0   : > { %v809_v33 = vadd.f32 %v808_v25, %v540_v9  ;;  %v268_v25 = vmul.f32 %v5133_v3, %v5133_v3 }
  0xb2   : > { %v918_v35 = vadd.f32 %v5080_v20, %v809_v33  ;;  %v545_v36 = vpop.f32.mrf.mxu2 }
  0xb4   : > { %v982_v40 = vmax.f32 %v918_v35, 0.0  ;;  %4122 = vmatmul.msk.bf16.gmra.mxu3 %vm343_vm1, %v238_v34  ;;  %v240_v35 = vpack.c.bf16 %v205_v49, %v204_v48  ;;  %v5171_v54 = vpop.f32.mrf.mxu1 }
  0xb6   : > { %v5099_v19 = vpack.c.bf16 %v982_v40, %v981_v39  ;;  %v337_v39 = vpack.c.bf16 %v303_v31, %v302_v28  ;;  %v5154_v40 = vpop.f32.mrf.mxu0  ;;  %v5197_v31 = vld [vmem:[%s4868_s21 + $0xe0] sm:$0xff] }
  0xb7   : > { %4074 = vmatmul.msk.bf16.gmra.mxu0 %vm343_vm1, %v318_v37  ;;  %4091 = vmatmul.msk.bf16.gmra.mxu2 %vm343_vm1, %v335_v38  ;;  %v811_v41 = vpop.f32.mrf.mxu3 }
  0xb8   : > { %v812_v46 = vadd.f32 %v811_v41, %v543_v14  ;;  %v5136_v14 = vld [vmem:[%s4868_s21 + $0xc8] sm:$0xff] }
  0xb9   : > { %v269_v27 = vmul.f32 %v5136_v14, %v5136_v14 }
  0xba   : > { %v548_v47 = vpop.f32.mrf.mxu2  ;;  %v919_v56 = vadd.f32 %v5080_v20, %v812_v46 }
  0xbb   : > { %v320_v38 = vpack.c.bf16 %v269_v27, %v268_v25 }
  0xbc   : > { %v983_v9 = vmax.f32 %v919_v56, 0.0  ;;  %v270_v56 = vmul.f32 %v5164_v50, %v5164_v50 }
  0xbe   : > { %v5176_v61 = vpop.f32.mrf.mxu0 }
  0xbf   : > { %v813_v52 = vpop.f32.mrf.mxu3 }
  0xc0   : > { %v814_v62 = vadd.f32 %v813_v52, %v545_v36  ;;  %v208_v52 = vld [vmem:[%s4868_s21 + $0x1e0] sm:$0xff] }
  0xc1   : > { %v242_v58 = vpack.c.bf16 %v209_v53, %v208_v52 }
  0xc2   : > { %v920_v1 = vadd.f32 %v5080_v20, %v814_v62  ;;  %v550_v2 = vpop.f32.mrf.mxu2 }
  0xc4   : > { %v984_v10 = vmax.f32 %v920_v1, 0.0  ;;  %4123 = vmatmul.msk.bf16.gmra.mxu3 %vm343_vm1, %v239_v0  ;;  %v271_v0 = vmul.f32 %v5167_v51, %v5167_v51  ;;  %v304_v1 = vmul.f32 %v208_v52, %v208_v52 }
  0xc6   : > { %v5126_v29 = vpack.c.bf16 %v984_v10, %v983_v9  ;;  %v241_v10 = vpack.c.bf16 %v207_v22, %v206_v21  ;;  %v5194_v22 = vpop.f32.mrf.mxu0 }
  0xc7   : > { %4075 = vmatmul.msk.bf16.gmra.mxu0 %vm343_vm1, %v319_v7  ;;  %4092 = vmatmul.msk.bf16.gmra.mxu2 %vm343_vm1, %v336_v8  ;;  %v816_v30 = vpop.f32.mrf.mxu3  ;;  %v221_v7 = vpack.c.bf16 %v5047_v60, %v5044_v59  ;;  %v5188_v59 = vpop.f32.mrf.mxu1 }
  0xc8   : > { %v817_v11 = vadd.f32 %v816_v30, %v548_v47 }
  0xc9   : > { %4105 = vmatmul.msk.bf16.gmra.mxu1 %vm343_vm1, %v221_v7 }
  0xca   : > { %v553_v13 = vpop.f32.mrf.mxu2  ;;  %v921_v33 = vadd.f32 %v5080_v20, %v817_v11 }
  0xcc   : > { %v985_v41 = vmax.f32 %v921_v33, 0.0  ;;  %v210_v33 = vld [vmem:[%s4868_s21 + $0x1f0] sm:$0xff] }
  0xcf   : > { %v818_v26 = vpop.f32.mrf.mxu3 }
  0xd0   : > { %v819_v34 = vadd.f32 %v818_v26, %v550_v2  ;;  %v305_v2 = vmul.f32 %v209_v53, %v209_v53 }
  0xd2   : > { %v922_v36 = vadd.f32 %v5080_v20, %v819_v34  ;;  %v555_v37 = vpop.f32.mrf.mxu2  ;;  %v338_v23 = vpack.c.bf16 %v305_v2, %v304_v1  ;;  %v211_v34 = vld [vmem:[%s4868_s21 + $0x1f8] sm:$0xff] }
  0xd4   : > { %v986_v46 = vmax.f32 %v922_v36, 0.0  ;;  %4124 = vmatmul.msk.bf16.gmra.mxu3 %vm343_vm1, %v240_v35  ;;  %v5204_v35 = vpop.f32.mrf.mxu1  ;;  %v5208_v36 = vmul.f32 %v4871_v5, %v4871_v5 }
  0xd6   : > { %v5159_v45 = vpack.c.bf16 %v986_v46, %v985_v41  ;;  %v306_v41 = vmul.f32 %v210_v33, %v210_v33  ;;  %v307_v46 = vmul.f32 %v211_v34, %v211_v34 }
  0xd7   : > { %4076 = vmatmul.msk.bf16.gmra.mxu0 %vm343_vm1, %v320_v38  ;;  %4093 = vmatmul.msk.bf16.gmra.mxu2 %vm343_vm1, %v337_v39  ;;  %v821_v47 = vpop.f32.mrf.mxu3  ;;  %v273_v39 = vmul.f32 %v5200_v32, %v5200_v32 }
  0xd8   : > { %v822_v48 = vadd.f32 %v821_v47, %v553_v13  ;;  %v321_v13 = vpack.c.bf16 %v271_v0, %v270_v56  ;;  %v222_v47 = vpack.c.bf16 %v5075_v16, %v5072_v15  ;;  %v5222_v56 = vpop.f32.mrf.mxu0  ;;  %v339_v2 = vpack.c.bf16 %v307_v46, %v306_v41 }
  0xda   : > { %v558_v49 = vpop.f32.mrf.mxu2  ;;  %v923_v8 = vadd.f32 %v5080_v20, %v822_v48  ;;  %v5218_v48 = vmul.f32 %v4874_v6, %v4874_v6  ;;  %4106 = vmatmul.msk.bf16.gmra.mxu1 %vm343_vm1, %v222_v47 }
  0xdc   : > { %v987_v25 = vmax.f32 %v923_v8, 0.0  ;;  %v5226_v6 = vpop.f32.mrf.mxu1  ;;  %v324_v52 = vpack.c.bf16 %v5218_v48, %v5208_v36 }
  0xdf   : > { %v823_v62 = vpop.f32.mrf.mxu3 }
  0xe0   : > { %v824_v9 = vadd.f32 %v823_v62, %v555_v37  ;;  %v272_v37 = vmul.f32 %v5197_v31, %v5197_v31 }
  0xe2   : > { %v924_v30 = vadd.f32 %v5080_v20, %v824_v9  ;;  %v560_v11 = vpop.f32.mrf.mxu2  ;;  %v322_v1 = vpack.c.bf16 %v273_v39, %v272_v37  ;;  %v722_v9 = vadd.f32 %v5143_v24, %v5077_v17 }
  0xe4   : > { %v988_v26 = vmax.f32 %v924_v30, 0.0  ;;  %4125 = vmatmul.msk.bf16.gmra.mxu3 %vm343_vm1, %v241_v10  ;;  %v724_v10 = vadd.f32 %v5157_v44, %v5097_v18  ;;  %v223_v44 = vpack.c.bf16 %v5107_v43, %v5104_v42 }
  0xe6   : > { %v5190_v60 = vpack.c.bf16 %v988_v26, %v987_v25  ;;  %v4269_v25 = vld [vmem:[%s7218_s1 + $0x98] sm:$0xff]  ;;  %v883_v26 = vadd.f32 %v5080_v20, %v722_v9 }
  0xe7   : > { %4077 = vmatmul.msk.bf16.gmra.mxu0 %vm343_vm1, %v321_v13  ;;  %4094 = vmatmul.msk.bf16.gmra.mxu2 %vm343_vm1, %v338_v23  ;;  %v826_v21 = vpop.f32.mrf.mxu3  ;;  %v5241_v13 = vld [vmem:[%s4868_s21 + $0xf0] sm:$0xff]  ;;  %v5244_v23 = vld [vmem:[%s4868_s21 + $0xf8] sm:$0xff] }
  0xe8   : > { %v827_v27 = vadd.f32 %v826_v21, %v558_v49  ;;  %v884_v21 = vadd.f32 %v5080_v20, %v724_v10  ;;  %1442 = vmatpush.bf16.msrb.mxu3 %v4269_v25  ;;  %v274_v18 = vmul.f32 %v5241_v13, %v5241_v13  ;;  %v275_v24 = vmul.f32 %v5244_v23, %v5244_v23 }
  0xe9   : > { %v947_v39 = vmax.f32 %v883_v26, 0.0 }
  0xea   : > { %v563_v28 = vpop.f32.mrf.mxu2  ;;  %v925_v49 = vadd.f32 %v5080_v20, %v827_v27  ;;  %v5251_v27 = vpop.f32.mrf.mxu1  ;;  %v948_v41 = vmax.f32 %v884_v21, 0.0  ;;  %4107 = vmatmul.msk.bf16.gmra.mxu1 %vm343_vm1, %v223_v44 }
  0xec   : > { %v989_v15 = vmax.f32 %v925_v49, 0.0  ;;  %v323_v49 = vpack.c.bf16 %v275_v24, %v274_v18 }
  0xef   : > { %v828_v38 = vpop.f32.mrf.mxu3 }
  0xf0   : > { %v829_v5 = vadd.f32 %v828_v38, %v560_v11  ;;  %v5238_v11 = vpop.f32.mrf.mxu0  ;;  %v243_v38 = vpack.c.bf16 %v211_v34, %v210_v33 }
  0xf2   : > { %v926_v62 = vadd.f32 %v5080_v20, %v829_v5  ;;  %v565_v0 = vpop.f32.mrf.mxu2  ;;  %v738_v42 = vpop.f32.mrf.mxu1 }
  0xf4   : > { %v990_v16 = vmax.f32 %v926_v62, 0.0  ;;  %4126 = vmatmul.msk.bf16.gmra.mxu3 %vm343_vm1, %v242_v58  ;;  %v1027_v62 = vpack.c.bf16 %v948_v41, %v947_v39 }
  0xf6   : > { %v5230_v53 = vpack.c.bf16 %v990_v16, %v989_v15  ;;  %v4281_v16 = vld [vmem:[%s7218_s1 + $0xf8] sm:$0xff] }
  0xf7   : > { %4078 = vmatmul.msk.bf16.gmra.mxu0 %vm343_vm1, %v322_v1  ;;  %4095 = vmatmul.msk.bf16.gmra.mxu2 %vm343_vm1, %v339_v2  ;;  %v831_v7 = vpop.f32.mrf.mxu3  ;;  %v729_v2 = vadd.f32 %v5188_v59, %v5130_v12 }
  0xf8   : > { %v832_v8 = vadd.f32 %v831_v7, %v563_v28  ;;  %v5263_v1 = vpop.f32.mrf.mxu0  ;;  %1768 = vmatpush.bf16.msrb.mxu0 %v4281_v16  ;;  %4292 = vmatpush.bf16.msra.mxu2 %v4281_v16  ;;  %v737_v16 = vadd.f32 %v5251_v27, %v5194_v22  ;;  %v226_v22 = vpack.c.bf16 %v5200_v32, %v5197_v31 }
  0xfa   : > { %v568_v30 = vpop.f32.mrf.mxu2  ;;  %v927_v28 = vadd.f32 %v5080_v20, %v832_v8  ;;  %v886_v8 = vadd.f32 %v5080_v20, %v729_v2  ;;  %v5277_v9 = vpop.f32.mrf.mxu1 }
  0xfb   : > { %v742_v32 = vadd.f32 %v5277_v9, %v5238_v11 }
  0xfc   : > { %v991_v5 = vmax.f32 %v927_v28, 0.0  ;;  %v950_v25 = vmax.f32 %v886_v8, 0.0 }
  0xff   : > { %v833_v17 = vpop.f32.mrf.mxu3 }
 0x100   : > { %v834_v37 = vadd.f32 %v833_v17, %v565_v0  ;;  %v727_v0 = vadd.f32 %v5171_v54, %v5120_v55  ;;  %v224_v55 = vpack.c.bf16 %v5136_v14, %v5133_v3  ;;  %v5281_v54 = vpop.f32.mrf.mxu0 }
 0x102   : > { %v928_v46 = vadd.f32 %v5080_v20, %v834_v37  ;;  %v570_v47 = vpop.f32.mrf.mxu2  ;;  %v885_v7 = vadd.f32 %v5080_v20, %v727_v0  ;;  %4108 = vmatmul.msk.bf16.gmra.mxu1 %vm343_vm1, %v224_v55  ;;  %v743_v44 = vpop.f32.mrf.mxu1  ;;  %v732_v37 = vadd.f32 %v5204_v35, %v5154_v40  ;;  %v225_v40 = vpack.c.bf16 %v5167_v51, %v5164_v50 }
 0x103   : > { %v889_v55 = vadd.f32 %v5080_v20, %v737_v16 }
 0x104   : > { %v992_v58 = vmax.f32 %v928_v46, 0.0  ;;  %4127 = vmatmul.msk.bf16.gmra.mxu3 %vm343_vm1, %v243_v38  ;;  %v734_v38 = vadd.f32 %v5226_v6, %v5176_v61  ;;  %v4268_v46 = vld [vmem:[%s7218_s1 + $0x90] sm:$0xff]  ;;  %v887_v36 = vadd.f32 %v5080_v20, %v732_v37 }
 0x105   : > { %1443 = vmatpush.bf16.msrb.mxu3 %v4268_v46  ;;  %v744_v46 = vadd.f32 %v743_v44, %v5263_v1 }
 0x106   : > { %v5265_v43 = vpack.c.bf16 %v992_v58, %v991_v5  ;;  %v888_v48 = vadd.f32 %v5080_v20, %v734_v38  ;;  %v951_v6 = vmax.f32 %v887_v36, 0.0 }
 0x107   : > { %4079 = vmatmul.msk.bf16.gmra.mxu0 %vm343_vm1, %v323_v49  ;;  %1116 = vmatmul.bf16.vlgmr.msrb.gmra.mxu2 %v1027_v62  ;;  %v836_v33 = vpop.f32.mrf.mxu3 }
 0x108   : > { %v837_v34 = vadd.f32 %v836_v33, %v568_v30  ;;  %v949_v30 = vmax.f32 %v885_v7, 0.0  ;;  %v5296_v39 = vpop.f32.mrf.mxu0  ;;  %v952_v49 = vmax.f32 %v888_v48, 0.0  ;;  %v739_v7 = vadd.f32 %v738_v42, %v5222_v56  ;;  %v4267_v48 = vld [vmem:[%s7218_s1 + $0x88] sm:$0xff] }
 0x109   : > { %v953_v42 = vmax.f32 %v889_v55, 0.0  ;;  %1444 = vmatpush.bf16.msrb.mxu3 %v4267_v48  ;;  %v4279_v55 = vld [vmem:[%s7218_s1 + $0xe8] sm:$0xff]  ;;  %v4266_v48 = vld [vmem:[%s7218_s1 + $0x80] sm:$0xff] }
 0x10a   : > { %v573_v15 = vpop.f32.mrf.mxu2  ;;  %v929_v12 = vadd.f32 %v5080_v20, %v837_v34  ;;  %v1028_v24 = vpack.c.bf16 %v950_v25, %v949_v30  ;;  %v1029_v0 = vpack.c.bf16 %v952_v49, %v951_v6  ;;  %v227_v6 = vpack.c.bf16 %v5244_v23, %v5241_v13 }
 0x10c   : > { %v993_v17 = vmax.f32 %v929_v12, 0.0  ;;  %v890_v12 = vadd.f32 %v5080_v20, %v739_v7 }
 0x10d   : > { %1445 = vmatpush.bf16.msrb.mxu3 %v4266_v48 }
 0x10f   : > { %v838_v10 = vpop.f32.mrf.mxu3 }
 0x110   : > { %v839_v59 = vadd.f32 %v838_v10, %v570_v47  ;;  %v5310_v62 = vpop.f32.mrf.mxu0  ;;  %v4280_v10 = vld [vmem:[%s7218_s1 + $0xf0] sm:$0xff] }
 0x111   : > { %1769 = vmatpush.bf16.msrb.mxu0 %v4280_v10  ;;  %4293 = vmatpush.bf16.msra.mxu2 %v4280_v10 }
 0x112   : > { %v930_v26 = vadd.f32 %v5080_v20, %v839_v59  ;;  %v575_v21 = vpop.f32.mrf.mxu2  ;;  %4109 = vmatmul.msk.bf16.gmra.mxu1 %vm343_vm1, %v225_v40  ;;  %v892_v40 = vadd.f32 %v5080_v20, %v744_v46 }
 0x114   : > { %v994_v18 = vmax.f32 %v930_v26, 0.0  ;;  %v954_v26 = vmax.f32 %v890_v12, 0.0  ;;  %v956_v44 = vmax.f32 %v892_v40, 0.0 }
 0x115   : > { %1770 = vmatpush.bf16.msrb.mxu0 %v4279_v55  ;;  %4294 = vmatpush.bf16.msra.mxu2 %v4279_v55 }
 0x116   : > { %v5286_v28 = vpack.c.bf16 %v994_v18, %v993_v17 }
 0x117   : > { %4080 = vmatmul.msk.bf16.gmra.mxu0 %vm343_vm1, %v324_v52  ;;  %1121 = vmatmul.bf16.gmra.mxu2 %v1028_v24  ;;  %v841_v3 = vpop.f32.mrf.mxu3  ;;  %v5303_v52 = vpop.f32.mrf.mxu1 }
 0x118   : > { %v842_v14 = vadd.f32 %v841_v3, %v573_v15  ;;  %v5322_v59 = vpop.f32.mrf.mxu0  ;;  %v1030_v3 = vpack.c.bf16 %v954_v26, %v953_v42  ;;  %v747_v23 = vadd.f32 %v5303_v52, %v5281_v54 }
 0x11a   : > { %v578_v41 = vpop.f32.mrf.mxu2  ;;  %v931_v61 = vadd.f32 %v5080_v20, %v842_v14  ;;  %v893_v12 = vadd.f32 %v5080_v20, %v747_v23 }
 0x11c   : > { %v995_v33 = vmax.f32 %v931_v61, 0.0 }
 0x11f   : > { %v843_v47 = vpop.f32.mrf.mxu3  ;;  %v748_v2 = vpop.f32.mrf.mxu1 }
 0x120   : > { %v844_v35 = vadd.f32 %v843_v47, %v575_v21  ;;  %v891_v47 = vadd.f32 %v5080_v20, %v742_v32  ;;  %v749_v7 = vadd.f32 %v748_v2, %v5296_v39  ;;  %v957_v39 = vmax.f32 %v893_v12, 0.0 }
 0x122   : > { %v932_v5 = vadd.f32 %v5080_v20, %v844_v35  ;;  %v580_v58 = vpop.f32.mrf.mxu2  ;;  %4110 = vmatmul.msk.bf16.gmra.mxu1 %vm343_vm1, %v226_v22  ;;  %v955_v1 = vmax.f32 %v891_v47, 0.0 }
 0x124   : > { %v996_v34 = vmax.f32 %v932_v5, 0.0 }
 0x126   : > { %v5312_v15 = vpack.c.bf16 %v996_v34, %v995_v33 }
 0x127   : > { %1126 = vmatmul.bf16.gmra.mxu2 %v1029_v0  ;;  %v846_v50 = vpop.f32.mrf.mxu3  ;;  %v5324_v30 = vpop.f32.mrf.mxu1  ;;  %v1031_v0 = vpack.c.bf16 %v956_v44, %v955_v1 }
 0x128   : > { %v847_v51 = vadd.f32 %v846_v50, %v578_v41  ;;  %v5333_v41 = vpop.f32.mrf.mxu0 }
 0x12a   : > { %v583_v8 = vpop.f32.mrf.mxu2  ;;  %v933_v56 = vadd.f32 %v5080_v20, %v847_v51 }
 0x12c   : > { %v997_v18 = vmax.f32 %v933_v56, 0.0 }
 0x12f   : > { %v848_v25 = vpop.f32.mrf.mxu3  ;;  %v753_v14 = vpop.f32.mrf.mxu1 }
 0x130   : > { %v849_v27 = vadd.f32 %v848_v25, %v580_v58  ;;  %v490_v49 = vpop.f32.mrf.mxu0  ;;  %v894_v25 = vadd.f32 %v5080_v20, %v749_v7  ;;  %v754_v32 = vadd.f32 %v753_v14, %v5322_v59 }
 0x132   : > { %v934_v21 = vadd.f32 %v5080_v20, %v849_v27  ;;  %v585_v17 = vpop.f32.mrf.mxu2  ;;  %4111 = vmatmul.msk.bf16.gmra.mxu1 %vm343_vm1, %v227_v6  ;;  %v958_v52 = vmax.f32 %v894_v25, 0.0  ;;  %v896_v40 = vadd.f32 %v5080_v20, %v754_v32 }
 0x134   : > { %v998_v24 = vmax.f32 %v934_v21, 0.0 }
 0x136   : > { %v5331_v37 = vpack.c.bf16 %v998_v24, %v997_v18 }
 0x137   : > { %1131 = vmatmul.bf16.gmra.mxu2 %v1030_v3  ;;  %v851_v38 = vpop.f32.mrf.mxu3  ;;  %v5343_v61 = vpop.f32.mrf.mxu1 }
 0x138   : > { %v852_v31 = vadd.f32 %v851_v38, %v583_v8  ;;  %v5355_v10 = vpop.f32.mrf.mxu0 }
 0x13a   : > { %v588_v36 = vpop.f32.mrf.mxu2  ;;  %v935_v11 = vadd.f32 %v5080_v20, %v852_v31  ;;  %v752_v31 = vadd.f32 %v5324_v30, %v5310_v62  ;;  %v960_v30 = vmax.f32 %v896_v40, 0.0 }
 0x13c   : > { %v999_v33 = vmax.f32 %v935_v11, 0.0  ;;  %v895_v47 = vadd.f32 %v5080_v20, %v752_v31 }
 0x13e   : > { %v959_v62 = vmax.f32 %v895_v47, 0.0 }
 0x13f   : > { %v853_v35 = vpop.f32.mrf.mxu3  ;;  %v758_v50 = vpop.f32.mrf.mxu1 }
 0x140   : > { %v854_v9 = vadd.f32 %v853_v35, %v585_v17  ;;  %v1032_v17 = vpack.c.bf16 %v958_v52, %v957_v39  ;;  %v495_v18 = vpop.f32.mrf.mxu0 }
 0x142   : > { %v936_v5 = vadd.f32 %v5080_v20, %v854_v9  ;;  %v590_v58 = vpop.f32.mrf.mxu2 }
 0x144   : > { %v1000_v34 = vmax.f32 %v936_v5, 0.0 }
 0x146   : > { %v5350_v51 = vpack.c.bf16 %v1000_v34, %v999_v33 }
 0x147   : > { %1136 = vmatmul.bf16.gmra.mxu2 %v1031_v0  ;;  %v856_v16 = vpop.f32.mrf.mxu3  ;;  %v5363_v54 = vpop.f32.mrf.mxu1 }
 0x148   : > { %v857_v13 = vadd.f32 %v856_v16, %v588_v36  ;;  %v5376_v6 = vpop.f32.mrf.mxu0  ;;  %v757_v16 = vadd.f32 %v5343_v61, %v5333_v41  ;;  %v4278_v61 = vld [vmem:[%s7218_s1 + $0xe0] sm:$0xff] }
 0x149   : > { %1771 = vmatpush.bf16.msrb.mxu0 %v4278_v61  ;;  %4295 = vmatpush.bf16.msra.mxu2 %v4278_v61  ;;  %v4277_v61 = vld [vmem:[%s7218_s1 + $0xd8] sm:$0xff] }
 0x14a   : > { %v593_v8 = vpop.f32.mrf.mxu2  ;;  %v937_v56 = vadd.f32 %v5080_v20, %v857_v13  ;;  %v759_v13 = vadd.f32 %v758_v50, %v490_v49 }
 0x14c   : > { %v1001_v26 = vmax.f32 %v937_v56, 0.0  ;;  %v898_v55 = vadd.f32 %v5080_v20, %v759_v13  ;;  %v5403_v13 = vperm.slane %v5069_v4, 1 }
 0x14d   : > { %1772 = vmatpush.bf16.msrb.mxu0 %v4277_v61  ;;  %4296 = vmatpush.bf16.msra.mxu2 %v4277_v61 }
 0x14e   : > { %v962_v39 = vmax.f32 %v898_v55, 0.0 }
 0x14f   : > { %v858_v22 = vpop.f32.mrf.mxu3  ;;  %v763_v36 = vpop.f32.mrf.mxu1 }
 0x150   : > { %v859_v27 = vadd.f32 %v858_v22, %v590_v58  ;;  %v1033_v58 = vpack.c.bf16 %v960_v30, %v959_v62  ;;  %v500_v23 = vpop.f32.mrf.mxu0  ;;  %v764_v31 = vadd.f32 %v763_v36, %v495_v18 }
 0x152   : > { %v938_v2 = vadd.f32 %v5080_v20, %v859_v27  ;;  %v595_v42 = vpop.f32.mrf.mxu2  ;;  %v900_v48 = vadd.f32 %v5080_v20, %v764_v31 }
 0x154   : > { %v1002_v21 = vmax.f32 %v938_v2, 0.0  ;;  %v964_v62 = vmax.f32 %v900_v48, 0.0 }
 0x156   : > { %v5366_v24 = vpack.c.bf16 %v1002_v21, %v1001_v26 }
 0x157   : > { %1141 = vmatmul.bf16.gmra.mxu2 %v1032_v17  ;;  %v861_v3 = vpop.f32.mrf.mxu3  ;;  %v766_v5 = vpop.f32.mrf.mxu1 }
 0x158   : > { %v862_v38 = vadd.f32 %v861_v3, %v593_v8  ;;  %v897_v8 = vadd.f32 %v5080_v20, %v757_v16 }
 0x15a   : > { %v598_v46 = vpop.f32.mrf.mxu2  ;;  %v939_v11 = vadd.f32 %v5080_v20, %v862_v38  ;;  %v961_v27 = vmax.f32 %v897_v8, 0.0  ;;  %v762_v38 = vadd.f32 %v5363_v54, %v5355_v10 }
 0x15c   : > { %v1003_v1 = vmax.f32 %v939_v11, 0.0  ;;  %v1034_v49 = vpack.c.bf16 %v962_v39, %v961_v27 }
 0x15f   : > { %v863_v35 = vpop.f32.mrf.mxu3  ;;  %v768_v12 = vpop.f32.mrf.mxu1 }
 0x160   : > { %v864_v9 = vadd.f32 %v863_v35, %v595_v42  ;;  %v503_v42 = vpop.f32.mrf.mxu0 }
 0x162   : > { %v940_v59 = vadd.f32 %v5080_v20, %v864_v9  ;;  %v600_v14 = vpop.f32.mrf.mxu2 }
 0x164   : > { %v1004_v44 = vmax.f32 %v940_v59, 0.0 }
 0x166   : > { %v5380_v33 = vpack.c.bf16 %v1004_v44, %v1003_v1 }
 0x167   : > { %1146 = vmatmul.bf16.gmra.mxu2 %v1033_v58  ;;  %v866_v34 = vpop.f32.mrf.mxu3  ;;  %v771_v3 = vpop.f32.mrf.mxu1 }
 0x168   : > { %v867_v0 = vadd.f32 %v866_v34, %v598_v46  ;;  %v899_v46 = vadd.f32 %v5080_v20, %v762_v38  ;;  %v505_v47 = vpop.f32.mrf.mxu0  ;;  %v767_v34 = vadd.f32 %v766_v5, %v5376_v6 }
 0x16a   : > { %v603_v7 = vpop.f32.mrf.mxu2  ;;  %v941_v22 = vadd.f32 %v5080_v20, %v867_v0  ;;  %v963_v9 = vmax.f32 %v899_v46, 0.0  ;;  %v769_v0 = vadd.f32 %v768_v12, %v500_v23  ;;  %v901_v8 = vadd.f32 %v5080_v20, %v767_v34 }
 0x16c   : > { %v1005_v26 = vmax.f32 %v941_v22, 0.0  ;;  %v1035_v10 = vpack.c.bf16 %v964_v62, %v963_v9  ;;  %v902_v55 = vadd.f32 %v5080_v20, %v769_v0  ;;  %v965_v39 = vmax.f32 %v901_v8, 0.0 }
 0x16f   : > { %v868_v25 = vpop.f32.mrf.mxu3 }
 0x170   : > { %v869_v56 = vadd.f32 %v868_v25, %v600_v14  ;;  %v773_v14 = vpop.f32.mrf.mxu1  ;;  %v508_v36 = vpop.f32.mrf.mxu0 }
 0x171   : > { %v774_v38 = vadd.f32 %v773_v14, %v505_v47  ;;  %v4289_v47 = vld [vmem:[%s7218_s1 + $0x138] sm:$0xff] }
 0x172   : > { %v942_v52 = vadd.f32 %v5080_v20, %v869_v56  ;;  %v605_v2 = vpop.f32.mrf.mxu2  ;;  %2098 = vmatpush.bf16.msrb.mxu1 %v4289_v47 }
 0x174   : > { %v1006_v41 = vmax.f32 %v942_v52, 0.0  ;;  %v966_v52 = vmax.f32 %v902_v55, 0.0 }
 0x176   : > { %v5391_v50 = vpack.c.bf16 %v1006_v41, %v1005_v26  ;;  %v1036_v41 = vpack.c.bf16 %v966_v52, %v965_v39 }
 0x177   : > { %1151 = vmatmul.bf16.gmra.mxu2 %v1034_v49  ;;  %v871_v21 = vpop.f32.mrf.mxu3 }
 0x178   : > { %v872_v17 = vadd.f32 %v871_v21, %v603_v7  ;;  %v776_v7 = vpop.f32.mrf.mxu1 }
 0x179   : > { %v777_v14 = vadd.f32 %v776_v7, %v508_v36 }
 0x17a   : > { %v608_v32 = vpop.f32.mrf.mxu2  ;;  %v943_v35 = vadd.f32 %v5080_v20, %v872_v17  ;;  %v772_v17 = vadd.f32 %v771_v3, %v503_v42 }
 0x17b   : > { %v905_v8 = vadd.f32 %v5080_v20, %v777_v14 }
 0x17c   : > { %v1007_v1 = vmax.f32 %v943_v35, 0.0  ;;  %v903_v35 = vadd.f32 %v5080_v20, %v772_v17 }
 0x17f   : > { %v873_v40 = vpop.f32.mrf.mxu3 }
 0x180   : > { %v874_v11 = vadd.f32 %v873_v40, %v605_v2  ;;  %v510_v2 = vpop.f32.mrf.mxu0  ;;  %v778_v49 = vpop.f32.mrf.mxu1 }
 0x182   : > { %v944_v30 = vadd.f32 %v5080_v20, %v874_v11  ;;  %v610_v59 = vpop.f32.mrf.mxu2  ;;  %v904_v11 = vadd.f32 %v5080_v20, %v774_v38 }
 0x184   : > { %v1008_v44 = vmax.f32 %v944_v30, 0.0  ;;  %v967_v30 = vmax.f32 %v903_v35, 0.0 }
 0x186   : > { %v5399_v54 = vpack.c.bf16 %v1008_v44, %v1007_v1 }
 0x187   : > { %1156 = vmatmul.bf16.gmra.mxu2 %v1035_v10  ;;  %v876_v18 = vpop.f32.mrf.mxu3  ;;  %v779_v10 = vadd.f32 %v778_v49, %v510_v2  ;;  %v4276_v2 = vld [vmem:[%s7218_s1 + $0xd0] sm:$0xff] }
 0x188   : > { %v877_v58 = vadd.f32 %v876_v18, %v608_v32  ;;  %v513_v48 = vpop.f32.mrf.mxu0  ;;  %v781_v62 = vpop.f32.mrf.mxu1  ;;  %1773 = vmatpush.bf16.msrb.mxu0 %v4276_v2  ;;  %4297 = vmatpush.bf16.msra.mxu2 %v4276_v2 }
 0x189   : > { %v906_v55 = vadd.f32 %v5080_v20, %v779_v10 }
 0x18a   : > { %v1117_v16 = vpop.f32.mrf.mxu2  ;;  %v945_v22 = vadd.f32 %v5080_v20, %v877_v58 }
 0x18b   : > { %v1118_v56 = vadd.f32 %v1117_v16, %v5403_v13 }
 0x18c   : > { %v1009_v12 = vmax.f32 %v945_v22, 0.0 }
 0x18d   : > { %4308 = vtanh.f32 %v1118_v56  ;;  %v969_v56 = vmax.f32 %v905_v8, 0.0 }
 0x18f   : > { %v878_v25 = vpop.f32.mrf.mxu3 }
 0x190   : > { %v879_v27 = vadd.f32 %v878_v25, %v610_v59  ;;  %v968_v59 = vmax.f32 %v904_v11, 0.0  ;;  %v515_v3 = vpop.f32.mrf.mxu0  ;;  %v783_v34 = vpop.f32.mrf.mxu1 }
 0x192   : > { %v946_v6 = vadd.f32 %v5080_v20, %v879_v27  ;;  %v1119_v5 = vpop.f32.mrf.mxu2  ;;  %v1037_v42 = vpack.c.bf16 %v968_v59, %v967_v30  ;;  %v970_v27 = vmax.f32 %v906_v55, 0.0 }
 0x193   : > { %v1120_v23 = vadd.f32 %v1119_v5, %v5403_v13  ;;  %v4309_v31 = vpop.eup %4308  ;;  %v784_v5 = vadd.f32 %v783_v34, %v515_v3 }
 0x194   : > { %v1010_v26 = vmax.f32 %v946_v6, 0.0  ;;  %v1038_v52 = vpack.c.bf16 %v970_v27, %v969_v56  ;;  %v782_v6 = vadd.f32 %v781_v62, %v513_v48 }
 0x195   : > { %4310 = vtanh.f32 %v1120_v23  ;;  %v908_v17 = vadd.f32 %v5080_v20, %v784_v5 }
 0x196   : > { %v5414_v21 = vpack.c.bf16 %v1010_v26, %v1009_v12  ;;  %v907_v49 = vadd.f32 %v5080_v20, %v782_v6 }
 0x197   : > { %1161 = vmatmul.bf16.gmra.mxu2 %v1036_v41 }
 0x198   : > { %v518_v25 = vpop.f32.mrf.mxu0  ;;  %v786_v7 = vpop.f32.mrf.mxu1 }
 0x199   : > { %v787_v30 = vadd.f32 %v786_v7, %v518_v25  ;;  %v4275_v25 = vld [vmem:[%s7218_s1 + $0xc8] sm:$0xff] }
 0x19a   : > { %v1122_v32 = vpop.f32.mrf.mxu2  ;;  %1774 = vmatpush.bf16.msrb.mxu0 %v4275_v25  ;;  %4298 = vmatpush.bf16.msra.mxu2 %v4275_v25 }
 0x19b   : > { %v4311_v46 = vpop.eup %4310  ;;  %v1123_v9 = vadd.f32 %v1122_v32, %v5403_v13  ;;  %v971_v32 = vmax.f32 %v907_v49, 0.0  ;;  %v909_v47 = vadd.f32 %v5080_v20, %v787_v30 }
 0x19c   : > { %v1357_v40 = vpack.c.bf16 %v4311_v46, %v4309_v31  ;;  %v972_v46 = vmax.f32 %v908_v17, 0.0 }
 0x19d   : > { %4312 = vtanh.f32 %v1123_v9  ;;  %v4288_v9 = vld [vmem:[%s7218_s1 + $0x130] sm:$0xff] }
 0x19e   : > { %1446 = vmatmul.bf16.vlgmr.msrb.gmra.mxu3 %v1357_v40  ;;  %v1039_v11 = vpack.c.bf16 %v972_v46, %v971_v32  ;;  %2099 = vmatpush.bf16.msrb.mxu1 %v4288_v9 }
 0x1a0   : > { %v520_v12 = vpop.f32.mrf.mxu0  ;;  %v788_v38 = vpop.f32.mrf.mxu1 }
 0x1a1   : > { %v789_v59 = vadd.f32 %v788_v38, %v520_v12 }
 0x1a2   : > { %v1124_v1 = vpop.f32.mrf.mxu2 }
 0x1a3   : > { %v1125_v44 = vadd.f32 %v1124_v1, %v5403_v13  ;;  %v4313_v18 = vpop.eup %4312  ;;  %v910_v14 = vadd.f32 %v5080_v20, %v789_v59 }
 0x1a5   : > { %4314 = vtanh.f32 %v1125_v44  ;;  %v974_v34 = vmax.f32 %v910_v14, 0.0 }
 0x1a7   : > { %1166 = vmatmul.bf16.gmra.mxu2 %v1037_v42 }
 0x1a8   : > { %v523_v48 = vpop.f32.mrf.mxu0  ;;  %v791_v62 = vpop.f32.mrf.mxu1 }
 0x1a9   : > { %v792_v56 = vadd.f32 %v791_v62, %v523_v48 }
 0x1aa   : > { %v1127_v58 = vpop.f32.mrf.mxu2 }
 0x1ab   : > { %v4315_v0 = vpop.eup %4314  ;;  %v1128_v22 = vadd.f32 %v1127_v58, %v5403_v13  ;;  %v973_v58 = vmax.f32 %v909_v47, 0.0  ;;  %v911_v6 = vadd.f32 %v5080_v20, %v792_v56 }
 0x1ac   : > { %v1358_v16 = vpack.c.bf16 %v4315_v0, %v4313_v18 }
 0x1ad   : > { %4316 = vtanh.f32 %v1128_v22  ;;  %v1040_v55 = vpack.c.bf16 %v974_v34, %v973_v58  ;;  %v975_v12 = vmax.f32 %v911_v6, 0.0 }
 0x1ae   : > { %1451 = vmatmul.bf16.gmra.mxu3 %v1358_v16 }
 0x1b0   : > { %v525_v10 = vpop.f32.mrf.mxu0  ;;  %v793_v16 = vpop.f32.mrf.mxu1 }
 0x1b1   : > { %v794_v27 = vadd.f32 %v793_v16, %v525_v10  ;;  %v4274_v10 = vld [vmem:[%s7218_s1 + $0xc0] sm:$0xff] }
 0x1b2   : > { %v1129_v39 = vpop.f32.mrf.mxu2  ;;  %1775 = vmatpush.bf16.msrb.mxu0 %v4274_v10  ;;  %4299 = vmatpush.bf16.msra.mxu2 %v4274_v10 }
 0x1b3   : > { %v1130_v36 = vadd.f32 %v1129_v39, %v5403_v13  ;;  %v4317_v23 = vpop.eup %4316  ;;  %v912_v5 = vadd.f32 %v5080_v20, %v794_v27 }
 0x1b5   : > { %4318 = vtanh.f32 %v1130_v36 }
 0x1b7   : > { %1171 = vmatmul.bf16.gmra.mxu2 %v1038_v52 }
 0x1b8   : > { %v528_v22 = vpop.f32.mrf.mxu0  ;;  %v796_v52 = vpop.f32.mrf.mxu1 }
 0x1b9   : > { %v797_v32 = vadd.f32 %v796_v52, %v528_v22 }
 0x1ba   : > { %v1132_v26 = vpop.f32.mrf.mxu2 }
 0x1bb   : > { %v4319_v41 = vpop.eup %4318  ;;  %v1133_v31 = vadd.f32 %v1132_v26, %v5403_v13  ;;  %v976_v26 = vmax.f32 %v912_v5, 0.0  ;;  %v913_v62 = vadd.f32 %v5080_v20, %v797_v32 }
 0x1bc   : > { %v1359_v61 = vpack.c.bf16 %v4319_v41, %v4317_v23 }
 0x1bd   : > { %4320 = vtanh.f32 %v1133_v31  ;;  %v1041_v17 = vpack.c.bf16 %v976_v26, %v975_v12  ;;  %v4287_v31 = vld [vmem:[%s7218_s1 + $0x128] sm:$0xff] }
 0x1be   : > { %1456 = vmatmul.bf16.gmra.mxu3 %v1359_v61  ;;  %2100 = vmatpush.bf16.msrb.mxu1 %v4287_v31  ;;  %v5472_v31 = vperm.slane %v5069_v4, 2 }
 0x1c0   : > { %v530_v41 = vpop.f32.mrf.mxu0  ;;  %v798_v38 = vpop.f32.mrf.mxu1 }
 0x1c1   : > { %v799_v46 = vadd.f32 %v798_v38, %v530_v41 }
 0x1c2   : > { %v1134_v40 = vpop.f32.mrf.mxu2 }
 0x1c3   : > { %v1135_v35 = vadd.f32 %v1134_v40, %v5403_v13  ;;  %v4321_v1 = vpop.eup %4320  ;;  %v914_v30 = vadd.f32 %v5080_v20, %v799_v46 }
 0x1c5   : > { %4322 = vtanh.f32 %v1135_v35 }
 0x1c7   : > { %1176 = vmatmul.bf16.gmra.mxu2 %v1039_v11 }
 0x1c8   : > { %v533_v11 = vpop.f32.mrf.mxu0 }
 0x1c9   : > { %v802_v16 = vadd.f32 %v5041_v57, %v533_v11  ;;  %v4286_v57 = vld [vmem:[%s7218_s1 + $0x120] sm:$0xff] }
 0x1ca   : > { %v1137_v44 = vpop.f32.mrf.mxu2  ;;  %2101 = vmatpush.bf16.msrb.mxu1 %v4286_v57 }
 0x1cb   : > { %v4323_v42 = vpop.eup %4322  ;;  %v1138_v18 = vadd.f32 %v1137_v44, %v5403_v13  ;;  %v978_v44 = vmax.f32 %v914_v30, 0.0  ;;  %v915_v25 = vadd.f32 %v5080_v20, %v802_v16 }
 0x1cc   : > { %v1360_v3 = vpack.c.bf16 %v4323_v42, %v4321_v1  ;;  %v977_v1 = vmax.f32 %v913_v62, 0.0 }
 0x1cd   : > { %4324 = vtanh.f32 %v1138_v18 }
 0x1ce   : > { %1461 = vmatmul.bf16.gmra.mxu3 %v1360_v3  ;;  %v1042_v47 = vpack.c.bf16 %v978_v44, %v977_v1 }
 0x1d0   : > { %v535_v14 = vpop.f32.mrf.mxu0 }
 0x1d1   : > { %v804_v18 = vadd.f32 %v5056_v63, %v535_v14 }
 0x1d2   : > { %v1139_v0 = vpop.f32.mrf.mxu2 }
 0x1d3   : > { %v1140_v8 = vadd.f32 %v1139_v0, %v5403_v13  ;;  %v4325_v39 = vpop.eup %4324 }
 0x1d5   : > { %4326 = vtanh.f32 %v1140_v8 }
 0x1d7   : > { %1181 = vmatmul.bf16.gmra.mxu2 %v1040_v55  ;;  %v916_v55 = vadd.f32 %v5080_v20, %v804_v18 }
 0x1d9   : > { %v980_v56 = vmax.f32 %v916_v55, 0.0 }
 0x1da   : > { %v1142_v36 = vpop.f32.mrf.mxu2 }
 0x1db   : > { %v4327_v7 = vpop.eup %4326  ;;  %v1143_v23 = vadd.f32 %v1142_v36, %v5403_v13 }
 0x1dc   : > { %v1361_v2 = vpack.c.bf16 %v4327_v7, %v4325_v39  ;;  %v979_v39 = vmax.f32 %v915_v25, 0.0 }
 0x1dd   : > { %4328 = vtanh.f32 %v1143_v23 }
 0x1de   : > { %1466 = vmatmul.bf16.gmra.mxu3 %v1361_v2  ;;  %v1043_v36 = vpack.c.bf16 %v980_v56, %v979_v39  ;;  %v4284_v39 = vld [vmem:[%s7218_s1 + $0x110] sm:$0xff] }
 0x1e2   : > { %v1144_v61 = vpop.f32.mrf.mxu2 }
 0x1e3   : > { %v1145_v49 = vadd.f32 %v1144_v61, %v5403_v13  ;;  %v4329_v40 = vpop.eup %4328 }
 0x1e5   : > { %4330 = vtanh.f32 %v1145_v49 }
 0x1e7   : > { %1186 = vmatmul.bf16.gmra.mxu2 %v1041_v17 }
 0x1ea   : > { %v1147_v35 = vpop.f32.mrf.mxu2 }
 0x1eb   : > { %v4331_v48 = vpop.eup %4330  ;;  %v1148_v59 = vadd.f32 %v1147_v35, %v5403_v13 }
 0x1ec   : > { %v1362_v9 = vpack.c.bf16 %v4331_v48, %v4329_v40 }
 0x1ed   : > { %4332 = vtanh.f32 %v1148_v59 }
 0x1ee   : > { %1471 = vmatmul.bf16.gmra.mxu3 %v1362_v9 }
 0x1f2   : > { %v1149_v42 = vpop.f32.mrf.mxu2 }
 0x1f3   : > { %v1150_v3 = vadd.f32 %v1149_v42, %v5403_v13  ;;  %v4333_v58 = vpop.eup %4332 }
 0x1f5   : > { %4334 = vtanh.f32 %v1150_v3 }
 0x1f7   : > { %1191 = vmatmul.bf16.gmra.mxu2 %v1042_v47 }
 0x1fa   : > { %v1152_v34 = vpop.f32.mrf.mxu2 }
 0x1fb   : > { %v4335_v0 = vpop.eup %4334  ;;  %v1153_v22 = vadd.f32 %v1152_v34, %v5403_v13 }
 0x1fc   : > { %v1363_v8 = vpack.c.bf16 %v4335_v0, %v4333_v58 }
 0x1fd   : > { %4336 = vtanh.f32 %v1153_v22 }
 0x1fe   : > { %1476 = vmatmul.bf16.gmra.mxu3 %v1363_v8 }
 0x202   : > { %v1154_v27 = vpop.f32.mrf.mxu2 }
 0x203   : > { %v1155_v63 = vadd.f32 %v1154_v27, %v5403_v13  ;;  %v4337_v7 = vpop.eup %4336 }
 0x205   : > { %4338 = vtanh.f32 %v1155_v63 }
 0x207   : > { %1196 = vmatmul.bf16.gmra.mxu2 %v1043_v36 }
 0x20a   : > { %v1157_v52 = vpop.f32.mrf.mxu2 }
 0x20b   : > { %v4339_v2 = vpop.eup %4338  ;;  %v1158_v6 = vadd.f32 %v1157_v52, %v5403_v13 }
 0x20c   : > { %v1364_v20 = vpack.c.bf16 %v4339_v2, %v4337_v7 }
 0x20d   : > { %4340 = vtanh.f32 %v1158_v6 }
 0x20e   : > { %1481 = vmatmul.bf16.gmra.mxu3 %v1364_v20 }
 0x212   : > { %v1159_v5 = vpop.f32.mrf.mxu2 }
 0x213   : > { %v1160_v23 = vadd.f32 %v1159_v5, %v5403_v13  ;;  %v4341_v12 = vpop.eup %4340 }
 0x215   : > { %4342 = vtanh.f32 %v1160_v23 }
 0x217   : > { %1201 = vmatmul.bf16.gmra.mxu2 %v5099_v19  ;;  %v4285_v19 = vld [vmem:[%s7218_s1 + $0x118] sm:$0xff] }
 0x218   : > { %2102 = vmatpush.bf16.msrb.mxu1 %v4285_v19 }
 0x21a   : > { %v1162_v26 = vpop.f32.mrf.mxu2 }
 0x21b   : > { %v4343_v41 = vpop.eup %4342  ;;  %v1163_v49 = vadd.f32 %v1162_v26, %v5403_v13 }
 0x21c   : > { %v1365_v61 = vpack.c.bf16 %v4343_v41, %v4341_v12  ;;  %2103 = vmatpush.bf16.msrb.mxu1 %v4284_v39 }
 0x21d   : > { %4344 = vtanh.f32 %v1163_v49 }
 0x21e   : > { %1486 = vmatmul.bf16.gmra.mxu3 %v1365_v61 }
 0x221   : > { %v1447_v17 = vpop.f32.mrf.mxu3 }
 0x222   : > { %v1164_v38 = vpop.f32.mrf.mxu2  ;;  %v1448_v46 = vadd.f32 %v1447_v17, %v5472_v31 }
 0x223   : > { %v1165_v32 = vadd.f32 %v1164_v38, %v5403_v13  ;;  %v4345_v35 = vpop.eup %4344 }
 0x225   : > { %4346 = vtanh.f32 %v1165_v32 }
 0x226   : > { %4348 = vtanh.f32 %v1448_v46 }
 0x227   : > { %1206 = vmatmul.bf16.gmra.mxu2 %v5126_v29 }
 0x229   : > { %v1449_v40 = vpop.f32.mrf.mxu3 }
 0x22a   : > { %v1450_v48 = vadd.f32 %v1449_v40, %v5472_v31  ;;  %v1167_v11 = vpop.f32.mrf.mxu2 }
 0x22b   : > { %v4347_v9 = vpop.eup %4346  ;;  %v1168_v30 = vadd.f32 %v1167_v11, %v5403_v13 }
 0x22c   : > { %4350 = vtanh.f32 %v1450_v48  ;;  %v1366_v62 = vpack.c.bf16 %v4347_v9, %v4345_v35  ;;  %v4349_v59 = vpop.eup %4348 }
 0x22d   : > { %4352 = vtanh.f32 %v1168_v30  ;;  %v4283_v30 = vld [vmem:[%s7218_s1 + $0x108] sm:$0xff] }
 0x22e   : > { %1491 = vmatmul.bf16.gmra.mxu3 %v1366_v62  ;;  %2104 = vmatpush.bf16.msrb.mxu1 %v4283_v30 }
 0x231   : > { %v1452_v1 = vpop.f32.mrf.mxu3 }
 0x232   : > { %v4351_v29 = vpop.eup %4350  ;;  %v1169_v44 = vpop.f32.mrf.mxu2  ;;  %v1453_v47 = vadd.f32 %v1452_v1, %v5472_v31 }
 0x233   : > { %v1170_v42 = vadd.f32 %v1169_v44, %v5403_v13  ;;  %v1687_v3 = vpack.c.bf16 %v4351_v29, %v4349_v59  ;;  %v4353_v10 = vpop.eup %4352 }
 0x235   : > { %4354 = vtanh.f32 %v1170_v42  ;;  %1776 = vmatmul.bf16.vlgmr.msrb.gmra.mxu0 %v1687_v3 }
 0x236   : > { %4356 = vtanh.f32 %v1453_v47 }
 0x237   : > { %1211 = vmatmul.bf16.gmra.mxu2 %v5159_v45 }
 0x239   : > { %v1454_v14 = vpop.f32.mrf.mxu3 }
 0x23a   : > { %v1455_v18 = vadd.f32 %v1454_v14, %v5472_v31  ;;  %v1172_v58 = vpop.f32.mrf.mxu2 }
 0x23b   : > { %v4355_v34 = vpop.eup %4354  ;;  %v1173_v16 = vadd.f32 %v1172_v58, %v5403_v13 }
 0x23c   : > { %4358 = vtanh.f32 %v1455_v18  ;;  %v1367_v0 = vpack.c.bf16 %v4355_v34, %v4353_v10  ;;  %v4357_v8 = vpop.eup %4356 }
 0x23d   : > { %4360 = vtanh.f32 %v1173_v16 }
 0x23e   : > { %1496 = vmatmul.bf16.gmra.mxu3 %v1367_v0 }
 0x241   : > { %v1457_v55 = vpop.f32.mrf.mxu3 }
 0x242   : > { %v4359_v25 = vpop.eup %4358  ;;  %v1174_v22 = vpop.f32.mrf.mxu2  ;;  %v1458_v45 = vadd.f32 %v1457_v55, %v5472_v31 }
 0x243   : > { %v1175_v56 = vadd.f32 %v1174_v22, %v5403_v13  ;;  %v1688_v27 = vpack.c.bf16 %v4359_v25, %v4357_v8  ;;  %v4361_v36 = vpop.eup %4360 }
 0x245   : > { %4362 = vtanh.f32 %v1175_v56  ;;  %1781 = vmatmul.bf16.gmra.mxu0 %v1688_v27 }
 0x246   : > { %4364 = vtanh.f32 %v1458_v45 }
 0x247   : > { %1216 = vmatmul.bf16.gmra.mxu2 %v5190_v60 }
 0x249   : > { %v1459_v63 = vpop.f32.mrf.mxu3 }
 0x24a   : > { %v1460_v57 = vadd.f32 %v1459_v63, %v5472_v31  ;;  %v1177_v7 = vpop.f32.mrf.mxu2 }
 0x24b   : > { %v4363_v52 = vpop.eup %4362  ;;  %v1178_v20 = vadd.f32 %v1177_v7, %v5403_v13 }
 0x24c   : > { %4366 = vtanh.f32 %v1460_v57  ;;  %v1368_v2 = vpack.c.bf16 %v4363_v52, %v4361_v36  ;;  %v4365_v6 = vpop.eup %4364  ;;  %v4282_v52 = vld [vmem:[%s7218_s1 + $0x100] sm:$0xff] }
 0x24d   : > { %4368 = vtanh.f32 %v1178_v20  ;;  %2105 = vmatpush.bf16.msrb.mxu1 %v4282_v52 }
 0x24e   : > { %1501 = vmatmul.bf16.gmra.mxu3 %v1368_v2 }
 0x251   : > { %v1462_v5 = vpop.f32.mrf.mxu3 }
 0x252   : > { %v4367_v60 = vpop.eup %4366  ;;  %v1179_v23 = vpop.f32.mrf.mxu2  ;;  %v1463_v41 = vadd.f32 %v1462_v5, %v5472_v31 }
 0x253   : > { %v1180_v12 = vadd.f32 %v1179_v23, %v5403_v13  ;;  %v1689_v26 = vpack.c.bf16 %v4367_v60, %v4365_v6  ;;  %v4369_v49 = vpop.eup %4368 }
 0x255   : > { %4370 = vtanh.f32 %v1180_v12  ;;  %1786 = vmatmul.bf16.gmra.mxu0 %v1689_v26 }
 0x256   : > { %4372 = vtanh.f32 %v1463_v41 }
 0x257   : > { %1221 = vmatmul.bf16.gmra.mxu2 %v5230_v53 }
 0x259   : > { %v1464_v61 = vpop.f32.mrf.mxu3 }
 0x25a   : > { %v1465_v17 = vadd.f32 %v1464_v61, %v5472_v31  ;;  %v1182_v38 = vpop.f32.mrf.mxu2 }
 0x25b   : > { %v4371_v32 = vpop.eup %4370  ;;  %v1183_v19 = vadd.f32 %v1182_v38, %v5403_v13 }
 0x25c   : > { %4374 = vtanh.f32 %v1465_v17  ;;  %v1369_v46 = vpack.c.bf16 %v4371_v32, %v4369_v49  ;;  %v4373_v40 = vpop.eup %4372 }
 0x25d   : > { %4376 = vtanh.f32 %v1183_v19 }
 0x25e   : > { %1506 = vmatmul.bf16.gmra.mxu3 %v1369_v46 }
 0x261   : > { %v1467_v35 = vpop.f32.mrf.mxu3 }
 0x262   : > { %v4375_v48 = vpop.eup %4374  ;;  %v1184_v11 = vpop.f32.mrf.mxu2  ;;  %v1468_v53 = vadd.f32 %v1467_v35, %v5472_v31 }
 0x263   : > { %v1185_v9 = vadd.f32 %v1184_v11, %v5403_v13  ;;  %v1690_v62 = vpack.c.bf16 %v4375_v48, %v4373_v40  ;;  %v4377_v1 = vpop.eup %4376 }
 0x265   : > { %4378 = vtanh.f32 %v1185_v9  ;;  %1791 = vmatmul.bf16.gmra.mxu0 %v1690_v62 }
 0x266   : > { %4380 = vtanh.f32 %v1468_v53 }
 0x267   : > { %1226 = vmatmul.bf16.gmra.mxu2 %v5265_v43 }
 0x269   : > { %v1469_v59 = vpop.f32.mrf.mxu3 }
 0x26a   : > { %v1470_v29 = vadd.f32 %v1469_v59, %v5472_v31  ;;  %v1187_v44 = vpop.f32.mrf.mxu2 }
 0x26b   : > { %v4379_v42 = vpop.eup %4378  ;;  %v1188_v47 = vadd.f32 %v1187_v44, %v5403_v13 }
 0x26c   : > { %4382 = vtanh.f32 %v1470_v29  ;;  %v1370_v3 = vpack.c.bf16 %v4379_v42, %v4377_v1  ;;  %v4381_v14 = vpop.eup %4380 }
 0x26d   : > { %4384 = vtanh.f32 %v1188_v47 }
 0x26e   : > { %1511 = vmatmul.bf16.gmra.mxu3 %v1370_v3 }
 0x271   : > { %v1472_v10 = vpop.f32.mrf.mxu3 }
 0x272   : > { %v4383_v43 = vpop.eup %4382  ;;  %v1189_v18 = vpop.f32.mrf.mxu2  ;;  %v1473_v0 = vadd.f32 %v1472_v10, %v5472_v31 }
 0x273   : > { %v1190_v58 = vadd.f32 %v1189_v18, %v5403_v13  ;;  %v1691_v34 = vpack.c.bf16 %v4383_v43, %v4381_v14  ;;  %v4385_v8 = vpop.eup %4384 }
 0x275   : > { %4386 = vtanh.f32 %v1190_v58  ;;  %1796 = vmatmul.bf16.gmra.mxu0 %v1691_v34 }
 0x276   : > { %4388 = vtanh.f32 %v1473_v0 }
 0x277   : > { %1231 = vmatmul.bf16.gmra.mxu2 %v5286_v28 }
 0x279   : > { %v1474_v16 = vpop.f32.mrf.mxu3 }
 0x27a   : > { %v1475_v55 = vadd.f32 %v1474_v16, %v5472_v31  ;;  %v1192_v25 = vpop.f32.mrf.mxu2 }
 0x27b   : > { %v4387_v22 = vpop.eup %4386  ;;  %v1193_v27 = vadd.f32 %v1192_v25, %v5403_v13 }
 0x27c   : > { %4390 = vtanh.f32 %v1475_v55  ;;  %v1371_v56 = vpack.c.bf16 %v4387_v22, %v4385_v8  ;;  %v4389_v45 = vpop.eup %4388  ;;  %v5533_v8 = vperm.slane %v5069_v4, 3 }
 0x27d   : > { %4392 = vtanh.f32 %v1193_v27 }
 0x27e   : > { %1516 = vmatmul.bf16.gmra.mxu3 %v1371_v56 }
 0x281   : > { %v1477_v39 = vpop.f32.mrf.mxu3 }
 0x282   : > { %v4391_v63 = vpop.eup %4390  ;;  %v1194_v36 = vpop.f32.mrf.mxu2  ;;  %v1478_v28 = vadd.f32 %v1477_v39, %v5472_v31 }
 0x283   : > { %v1195_v57 = vadd.f32 %v1194_v36, %v5403_v13  ;;  %v1692_v7 = vpack.c.bf16 %v4391_v63, %v4389_v45  ;;  %v4393_v20 = vpop.eup %4392 }
 0x285   : > { %4394 = vtanh.f32 %v1195_v57  ;;  %1801 = vmatmul.bf16.gmra.mxu0 %v1692_v7 }
 0x286   : > { %4396 = vtanh.f32 %v1478_v28 }
 0x287   : > { %1236 = vmatmul.bf16.gmra.mxu2 %v5312_v15 }
 0x289   : > { %v1479_v2 = vpop.f32.mrf.mxu3 }
 0x28a   : > { %v1480_v6 = vadd.f32 %v1479_v2, %v5472_v31  ;;  %v1197_v5 = vpop.f32.mrf.mxu2 }
 0x28b   : > { %v4395_v60 = vpop.eup %4394  ;;  %v1198_v12 = vadd.f32 %v1197_v5, %v5403_v13 }
 0x28c   : > { %4398 = vtanh.f32 %v1480_v6  ;;  %v1372_v23 = vpack.c.bf16 %v4395_v60, %v4393_v20  ;;  %v4397_v26 = vpop.eup %4396 }
 0x28d   : > { %4400 = vtanh.f32 %v1198_v12 }
 0x28e   : > { %1521 = vmatmul.bf16.gmra.mxu3 %v1372_v23 }
 0x291   : > { %v1482_v41 = vpop.f32.mrf.mxu3 }
 0x292   : > { %v4399_v15 = vpop.eup %4398  ;;  %v1199_v61 = vpop.f32.mrf.mxu2  ;;  %v1483_v38 = vadd.f32 %v1482_v41, %v5472_v31 }
 0x293   : > { %v1200_v49 = vadd.f32 %v1199_v61, %v5403_v13  ;;  %v1693_v17 = vpack.c.bf16 %v4399_v15, %v4397_v26  ;;  %v4401_v46 = vpop.eup %4400 }
 0x295   : > { %4402 = vtanh.f32 %v1200_v49  ;;  %1806 = vmatmul.bf16.gmra.mxu0 %v1693_v17 }
 0x296   : > { %4404 = vtanh.f32 %v1483_v38 }
 0x297   : > { %1241 = vmatmul.bf16.gmra.mxu2 %v5331_v37 }
 0x299   : > { %v1484_v32 = vpop.f32.mrf.mxu3 }
 0x29a   : > { %v1485_v19 = vadd.f32 %v1484_v32, %v5472_v31  ;;  %v1202_v40 = vpop.f32.mrf.mxu2 }
 0x29b   : > { %v4403_v35 = vpop.eup %4402  ;;  %v1203_v11 = vadd.f32 %v1202_v40, %v5403_v13 }
 0x29c   : > { %4406 = vtanh.f32 %v1485_v19  ;;  %v1373_v48 = vpack.c.bf16 %v4403_v35, %v4401_v46  ;;  %v4405_v9 = vpop.eup %4404 }
 0x29d   : > { %4408 = vtanh.f32 %v1203_v11 }
 0x29e   : > { %1526 = vmatmul.bf16.gmra.mxu3 %v1373_v48 }
 0x2a1   : > { %v1487_v62 = vpop.f32.mrf.mxu3 }
 0x2a2   : > { %v4407_v53 = vpop.eup %4406  ;;  %v1204_v30 = vpop.f32.mrf.mxu2  ;;  %v1488_v37 = vadd.f32 %v1487_v62, %v5472_v31 }
 0x2a3   : > { %v1205_v59 = vadd.f32 %v1204_v30, %v5403_v13  ;;  %v1694_v1 = vpack.c.bf16 %v4407_v53, %v4405_v9  ;;  %v4409_v44 = vpop.eup %4408 }
 0x2a5   : > { %4410 = vtanh.f32 %v1205_v59  ;;  %1811 = vmatmul.bf16.gmra.mxu0 %v1694_v1 }
 0x2a6   : > { %4412 = vtanh.f32 %v1488_v37 }
 0x2a7   : > { %1246 = vmatmul.bf16.gmra.mxu2 %v5350_v51 }
 0x2a9   : > { %v1489_v29 = vpop.f32.mrf.mxu3 }
 0x2aa   : > { %v1490_v42 = vadd.f32 %v1489_v29, %v5472_v31  ;;  %v1207_v3 = vpop.f32.mrf.mxu2 }
 0x2ab   : > { %v4411_v47 = vpop.eup %4410  ;;  %v1208_v10 = vadd.f32 %v1207_v3, %v5403_v13 }
 0x2ac   : > { %4414 = vtanh.f32 %v1490_v42  ;;  %v1374_v14 = vpack.c.bf16 %v4411_v47, %v4409_v44  ;;  %v4413_v43 = vpop.eup %4412 }
 0x2ad   : > { %4416 = vtanh.f32 %v1208_v10 }
 0x2ae   : > { %1531 = vmatmul.bf16.gmra.mxu3 %v1374_v14 }
 0x2b1   : > { %v1492_v18 = vpop.f32.mrf.mxu3 }
 0x2b2   : > { %v4415_v58 = vpop.eup %4414  ;;  %v1209_v34 = vpop.f32.mrf.mxu2  ;;  %v1493_v55 = vadd.f32 %v1492_v18, %v5472_v31 }
 0x2b3   : > { %v1777_v0 = vpop.f32.mrf.mxu0  ;;  %v1210_v16 = vadd.f32 %v1209_v34, %v5403_v13  ;;  %v1695_v51 = vpack.c.bf16 %v4415_v58, %v4413_v43  ;;  %v4417_v56 = vpop.eup %4416 }
 0x2b4   : > { %v1778_v25 = vadd.f32 %v1777_v0, %v5533_v8 }
 0x2b5   : > { %4418 = vtanh.f32 %v1210_v16  ;;  %1816 = vmatmul.bf16.gmra.mxu0 %v1695_v51 }
 0x2b6   : > { %4420 = vtanh.f32 %v1493_v55  ;;  %v1937_v7 = vmax.f32 %v1778_v25, 0.0 }
 0x2b7   : > { %1251 = vmatmul.bf16.gmra.mxu2 %v5366_v24 }
 0x2b9   : > { %v1494_v22 = vpop.f32.mrf.mxu3 }
 0x2ba   : > { %v1495_v27 = vadd.f32 %v1494_v22, %v5472_v31  ;;  %v1212_v45 = vpop.f32.mrf.mxu2 }
 0x2bb   : > { %v1779_v39 = vpop.f32.mrf.mxu0  ;;  %v4419_v63 = vpop.eup %4418  ;;  %v1213_v24 = vadd.f32 %v1212_v45, %v5403_v13 }
 0x2bc   : > { %v1780_v36 = vadd.f32 %v1779_v39, %v5533_v8  ;;  %4422 = vtanh.f32 %v1495_v27  ;;  %v1375_v57 = vpack.c.bf16 %v4419_v63, %v4417_v56  ;;  %v4421_v2 = vpop.eup %4420 }
 0x2bd   : > { %4424 = vtanh.f32 %v1213_v24 }
 0x2be   : > { %v1938_v28 = vmax.f32 %v1780_v36, 0.0  ;;  %1536 = vmatmul.bf16.gmra.mxu3 %v1375_v57 }
 0x2c0   : > { %v2017_v52 = vpack.c.bf16 %v1938_v28, %v1937_v7 }
 0x2c1   : > { %v1497_v20 = vpop.f32.mrf.mxu3 }
 0x2c2   : > { %2106 = vmatmul.bf16.vlgmr.msrb.gmra.mxu1 %v2017_v52  ;;  %v4423_v6 = vpop.eup %4422  ;;  %v1214_v5 = vpop.f32.mrf.mxu2  ;;  %v1498_v26 = vadd.f32 %v1497_v20, %v5472_v31 }
 0x2c3   : > { %v1782_v60 = vpop.f32.mrf.mxu0  ;;  %v1215_v23 = vadd.f32 %v1214_v5, %v5403_v13  ;;  %v1696_v12 = vpack.c.bf16 %v4423_v6, %v4421_v2  ;;  %v4425_v61 = vpop.eup %4424 }
 0x2c4   : > { %v1783_v41 = vadd.f32 %v1782_v60, %v5533_v8 }
 0x2c5   : > { %4426 = vtanh.f32 %v1215_v23  ;;  %1821 = vmatmul.bf16.gmra.mxu0 %v1696_v12 }
 0x2c6   : > { %4428 = vtanh.f32 %v1498_v26  ;;  %v1939_v40 = vmax.f32 %v1783_v41, 0.0 }
 0x2c7   : > { %1256 = vmatmul.bf16.gmra.mxu2 %v5380_v33 }
 0x2c9   : > { %v1499_v15 = vpop.f32.mrf.mxu3 }
 0x2ca   : > { %v1500_v49 = vadd.f32 %v1499_v15, %v5472_v31  ;;  %v1217_v17 = vpop.f32.mrf.mxu2 }
 0x2cb   : > { %v1784_v38 = vpop.f32.mrf.mxu0  ;;  %v4427_v32 = vpop.eup %4426  ;;  %v1218_v33 = vadd.f32 %v1217_v17, %v5403_v13 }
 0x2cc   : > { %v1785_v46 = vadd.f32 %v1784_v38, %v5533_v8  ;;  %4430 = vtanh.f32 %v1500_v49  ;;  %v1376_v19 = vpack.c.bf16 %v4427_v32, %v4425_v61  ;;  %v4429_v11 = vpop.eup %4428 }
 0x2cd   : > { %4432 = vtanh.f32 %v1218_v33 }
 0x2ce   : > { %v1940_v35 = vmax.f32 %v1785_v46, 0.0  ;;  %1541 = vmatmul.bf16.gmra.mxu3 %v1376_v19 }
 0x2d0   : > { %v2018_v48 = vpack.c.bf16 %v1940_v35, %v1939_v40 }
 0x2d1   : > { %v1502_v9 = vpop.f32.mrf.mxu3 }
 0x2d2   : > { %2111 = vmatmul.bf16.gmra.mxu1 %v2018_v48  ;;  %v4431_v62 = vpop.eup %4430  ;;  %v1219_v53 = vpop.f32.mrf.mxu2  ;;  %v1503_v37 = vadd.f32 %v1502_v9, %v5472_v31 }
 0x2d3   : > { %v1787_v30 = vpop.f32.mrf.mxu0  ;;  %v1220_v59 = vadd.f32 %v1219_v53, %v5403_v13  ;;  %v1697_v1 = vpack.c.bf16 %v4431_v62, %v4429_v11  ;;  %v4433_v42 = vpop.eup %4432 }
 0x2d4   : > { %v1788_v29 = vadd.f32 %v1787_v30, %v5533_v8 }
 0x2d5   : > { %4434 = vtanh.f32 %v1220_v59  ;;  %1826 = vmatmul.bf16.gmra.mxu0 %v1697_v1 }
 0x2d6   : > { %4436 = vtanh.f32 %v1503_v37  ;;  %v1941_v58 = vmax.f32 %v1788_v29, 0.0 }
 0x2d7   : > { %1261 = vmatmul.bf16.gmra.mxu2 %v5391_v50 }
 0x2d9   : > { %v1504_v44 = vpop.f32.mrf.mxu3 }
 0x2da   : > { %v1505_v3 = vadd.f32 %v1504_v44, %v5472_v31  ;;  %v1222_v47 = vpop.f32.mrf.mxu2 }
 0x2db   : > { %v1789_v14 = vpop.f32.mrf.mxu0  ;;  %v4435_v10 = vpop.eup %4434  ;;  %v1223_v50 = vadd.f32 %v1222_v47, %v5403_v13 }
 0x2dc   : > { %v1790_v43 = vadd.f32 %v1789_v14, %v5533_v8  ;;  %4438 = vtanh.f32 %v1505_v3  ;;  %v1377_v18 = vpack.c.bf16 %v4435_v10, %v4433_v42  ;;  %v4437_v16 = vpop.eup %4436 }
 0x2dd   : > { %4440 = vtanh.f32 %v1223_v50 }
 0x2de   : > { %v1942_v34 = vmax.f32 %v1790_v43, 0.0  ;;  %1546 = vmatmul.bf16.gmra.mxu3 %v1377_v18 }
 0x2e0   : > { %v2019_v0 = vpack.c.bf16 %v1942_v34, %v1941_v58 }
 0x2e1   : > { %v1507_v51 = vpop.f32.mrf.mxu3 }
 0x2e2   : > { %2116 = vmatmul.bf16.gmra.mxu1 %v2019_v0  ;;  %v4439_v55 = vpop.eup %4438  ;;  %v1224_v25 = vpop.f32.mrf.mxu2  ;;  %v1508_v45 = vadd.f32 %v1507_v51, %v5472_v31 }
 0x2e3   : > { %v1792_v22 = vpop.f32.mrf.mxu0  ;;  %v1225_v56 = vadd.f32 %v1224_v25, %v5403_v13  ;;  %v1698_v27 = vpack.c.bf16 %v4439_v55, %v4437_v16  ;;  %v4441_v36 = vpop.eup %4440 }
 0x2e4   : > { %v1793_v39 = vadd.f32 %v1792_v22, %v5533_v8 }
 0x2e5   : > { %4442 = vtanh.f32 %v1225_v56  ;;  %1831 = vmatmul.bf16.gmra.mxu0 %v1698_v27 }
 0x2e6   : > { %4444 = vtanh.f32 %v1508_v45  ;;  %v1943_v20 = vmax.f32 %v1793_v39, 0.0 }
 0x2e7   : > { %1266 = vmatmul.bf16.gmra.mxu2 %v5399_v54 }
 0x2e9   : > { %v1509_v63 = vpop.f32.mrf.mxu3 }
 0x2ea   : > { %v1510_v57 = vadd.f32 %v1509_v63, %v5472_v31  ;;  %v1227_v7 = vpop.f32.mrf.mxu2 }
 0x2eb   : > { %v1794_v28 = vpop.f32.mrf.mxu0  ;;  %v4443_v52 = vpop.eup %4442  ;;  %v1228_v54 = vadd.f32 %v1227_v7, %v5403_v13 }
 0x2ec   : > { %v1795_v24 = vadd.f32 %v1794_v28, %v5533_v8  ;;  %4446 = vtanh.f32 %v1510_v57  ;;  %v1378_v2 = vpack.c.bf16 %v4443_v52, %v4441_v36  ;;  %v4445_v60 = vpop.eup %4444 }
 0x2ed   : > { %4448 = vtanh.f32 %v1228_v54 }
 0x2ee   : > { %v1944_v6 = vmax.f32 %v1795_v24, 0.0  ;;  %1551 = vmatmul.bf16.gmra.mxu3 %v1378_v2 }
 0x2f0   : > { %v2020_v5 = vpack.c.bf16 %v1944_v6, %v1943_v20 }
 0x2f1   : > { %v1512_v23 = vpop.f32.mrf.mxu3 }
 0x2f2   : > { %2121 = vmatmul.bf16.gmra.mxu1 %v2020_v5  ;;  %v4447_v12 = vpop.eup %4446  ;;  %v1229_v26 = vpop.f32.mrf.mxu2  ;;  %v1513_v49 = vadd.f32 %v1512_v23, %v5472_v31 }
 0x2f3   : > { %v1797_v41 = vpop.f32.mrf.mxu0  ;;  %v1230_v15 = vadd.f32 %v1229_v26, %v5403_v13  ;;  %v1699_v61 = vpack.c.bf16 %v4447_v12, %v4445_v60  ;;  %v4449_v32 = vpop.eup %4448 }
 0x2f4   : > { %v1798_v17 = vadd.f32 %v1797_v41, %v5533_v8 }
 0x2f5   : > { %4450 = vtanh.f32 %v1230_v15  ;;  %1836 = vmatmul.bf16.gmra.mxu0 %v1699_v61 }
 0x2f6   : > { %4452 = vtanh.f32 %v1513_v49  ;;  %v1945_v11 = vmax.f32 %v1798_v17, 0.0 }
 0x2f7   : > { %1271 = vmatmul.bf16.gmra.mxu2 %v5414_v21 }
 0x2f9   : > { %v1514_v38 = vpop.f32.mrf.mxu3 }
 0x2fa   : > { %v1515_v46 = vadd.f32 %v1514_v38, %v5472_v31  ;;  %v1232_v19 = vpop.f32.mrf.mxu2 }
 0x2fb   : > { %v1799_v40 = vpop.f32.mrf.mxu0  ;;  %v4451_v35 = vpop.eup %4450  ;;  %v1233_v21 = vadd.f32 %v1232_v19, %v5403_v13 }
 0x2fc   : > { %v1800_v48 = vadd.f32 %v1799_v40, %v5533_v8  ;;  %4454 = vtanh.f32 %v1515_v46  ;;  %v1379_v33 = vpack.c.bf16 %v4451_v35, %v4449_v32  ;;  %v4453_v53 = vpop.eup %4452 }
 0x2fd   : > { %4456 = vtanh.f32 %v1233_v21 }
 0x2fe   : > { %v1946_v9 = vmax.f32 %v1800_v48, 0.0  ;;  %1556 = vmatmul.bf16.gmra.mxu3 %v1379_v33 }
 0x300   : > { %v2021_v62 = vpack.c.bf16 %v1946_v9, %v1945_v11 }
 0x301   : > { %v1517_v30 = vpop.f32.mrf.mxu3 }
 0x302   : > { %2126 = vmatmul.bf16.gmra.mxu1 %v2021_v62  ;;  %v4455_v59 = vpop.eup %4454  ;;  %v1234_v1 = vpop.f32.mrf.mxu2  ;;  %v1518_v42 = vadd.f32 %v1517_v30, %v5472_v31 }
 0x303   : > { %v1802_v37 = vpop.f32.mrf.mxu0  ;;  %v1235_v29 = vadd.f32 %v1234_v1, %v5403_v13  ;;  %v1700_v44 = vpack.c.bf16 %v4455_v59, %v4453_v53  ;;  %v4457_v14 = vpop.eup %4456 }
 0x304   : > { %v1803_v3 = vadd.f32 %v1802_v37, %v5533_v8 }
 0x305   : > { %4458 = vtanh.f32 %v1235_v29  ;;  %1841 = vmatmul.bf16.gmra.mxu0 %v1700_v44 }
 0x306   : > { %4460 = vtanh.f32 %v1518_v42  ;;  %v1947_v50 = vmax.f32 %v1803_v3, 0.0 }
 0x309   : > { %v1519_v47 = vpop.f32.mrf.mxu3 }
 0x30a   : > { %v1520_v10 = vadd.f32 %v1519_v47, %v5472_v31  ;;  %v1237_v43 = vpop.f32.mrf.mxu2 }
 0x30b   : > { %v1804_v18 = vpop.f32.mrf.mxu0  ;;  %v4459_v58 = vpop.eup %4458  ;;  %v1238_v55 = vadd.f32 %v1237_v43, %v5403_v13 }
 0x30c   : > { %v1805_v34 = vadd.f32 %v1804_v18, %v5533_v8  ;;  %4462 = vtanh.f32 %v1520_v10  ;;  %v1380_v0 = vpack.c.bf16 %v4459_v58, %v4457_v14  ;;  %v4461_v25 = vpop.eup %4460  ;;  %v2267_v14 = vlaneseq }
 0x30d   : > { %4464 = vtanh.f32 %v1238_v55 }
 0x30e   : > { %v1948_v16 = vmax.f32 %v1805_v34, 0.0  ;;  %1561 = vmatmul.bf16.gmra.mxu3 %v1380_v0 }
 0x310   : > { %v2022_v51 = vpack.c.bf16 %v1948_v16, %v1947_v50  ;;  %v5591_v16 = vand.u32 127, %v2267_v14 }
 0x311   : > { %v1522_v22 = vpop.f32.mrf.mxu3 }
 0x312   : > { %2131 = vmatmul.bf16.gmra.mxu1 %v2022_v51  ;;  %v4463_v56 = vpop.eup %4462  ;;  %v1239_v27 = vpop.f32.mrf.mxu2  ;;  %v1523_v36 = vadd.f32 %v1522_v22, %v5472_v31  ;;  %vm2269_vm2 = vcmp.lt.s32.totalorder %v5591_v16, 8 }
 0x313   : > { %v1807_v45 = vpop.f32.mrf.mxu0  ;;  %v1240_v39 = vadd.f32 %v1239_v27, %v5403_v13  ;;  %v1701_v63 = vpack.c.bf16 %v4463_v56, %v4461_v25  ;;  %v4465_v28 = vpop.eup %4464  ;;  %v5595_v25 = vperm.slane %v5069_v4, 4 }
 0x314   : > { %v1808_v57 = vadd.f32 %v1807_v45, %v5533_v8 }
 0x315   : > { %4466 = vtanh.f32 %v1240_v39  ;;  %1846 = vmatmul.bf16.gmra.mxu0 %v1701_v63 }
 0x316   : > { %4468 = vtanh.f32 %v1523_v36  ;;  %v1949_v54 = vmax.f32 %v1808_v57, 0.0 }
 0x319   : > { %v1524_v7 = vpop.f32.mrf.mxu3 }
 0x31a   : > { %v1525_v52 = vadd.f32 %v1524_v7, %v5472_v31  ;;  %v1242_v24 = vpop.f32.mrf.mxu2 }
 0x31b   : > { %v1809_v2 = vpop.f32.mrf.mxu0  ;;  %v4467_v20 = vpop.eup %4466  ;;  %v1243_v12 = vadd.f32 %v1242_v24, %v5403_v13 }
 0x31c   : > { %v1810_v6 = vadd.f32 %v1809_v2, %v5533_v8  ;;  %4470 = vtanh.f32 %v1525_v52  ;;  %v1381_v5 = vpack.c.bf16 %v4467_v20, %v4465_v28  ;;  %v4469_v26 = vpop.eup %4468 }
 0x31d   : > { %4472 = vtanh.f32 %v1243_v12 }
 0x31e   : > { %v1950_v60 = vmax.f32 %v1810_v6, 0.0  ;;  %1566 = vmatmul.bf16.gmra.mxu3 %v1381_v5 }
 0x320   : > { %v2023_v23 = vpack.c.bf16 %v1950_v60, %v1949_v54 }
 0x321   : > { %v1527_v41 = vpop.f32.mrf.mxu3 }
 0x322   : > { %2136 = vmatmul.bf16.gmra.mxu1 %v2023_v23  ;;  %v4471_v15 = vpop.eup %4470  ;;  %v1244_v61 = vpop.f32.mrf.mxu2  ;;  %v1528_v32 = vadd.f32 %v1527_v41, %v5472_v31 }
 0x323   : > { %v1812_v49 = vpop.f32.mrf.mxu0  ;;  %v1245_v17 = vadd.f32 %v1244_v61, %v5403_v13  ;;  %v1702_v38 = vpack.c.bf16 %v4471_v15, %v4469_v26  ;;  %v4473_v40 = vpop.eup %4472 }
 0x324   : > { %v1813_v46 = vadd.f32 %v1812_v49, %v5533_v8 }
 0x325   : > { %4474 = vtanh.f32 %v1245_v17  ;;  %1851 = vmatmul.bf16.gmra.mxu0 %v1702_v38 }
 0x326   : > { %4476 = vtanh.f32 %v1528_v32  ;;  %v1951_v21 = vmax.f32 %v1813_v46, 0.0 }
 0x329   : > { %v1529_v19 = vpop.f32.mrf.mxu3 }
 0x32a   : > { %v1530_v35 = vadd.f32 %v1529_v19, %v5472_v31  ;;  %v1247_v48 = vpop.f32.mrf.mxu2 }
 0x32b   : > { %v1814_v33 = vpop.f32.mrf.mxu0  ;;  %v4475_v11 = vpop.eup %4474  ;;  %v1248_v59 = vadd.f32 %v1247_v48, %v5403_v13 }
 0x32c   : > { %v1815_v9 = vadd.f32 %v1814_v33, %v5533_v8  ;;  %4478 = vtanh.f32 %v1530_v35  ;;  %v1382_v62 = vpack.c.bf16 %v4475_v11, %v4473_v40  ;;  %v4477_v1 = vpop.eup %4476 }
 0x32d   : > { %4480 = vtanh.f32 %v1248_v59 }
 0x32e   : > { %v1952_v53 = vmax.f32 %v1815_v9, 0.0  ;;  %1571 = vmatmul.bf16.gmra.mxu3 %v1382_v62 }
 0x330   : > { %v2024_v30 = vpack.c.bf16 %v1952_v53, %v1951_v21 }
 0x331   : > { %v1532_v37 = vpop.f32.mrf.mxu3 }
 0x332   : > { %2141 = vmatmul.bf16.gmra.mxu1 %v2024_v30  ;;  %v4479_v29 = vpop.eup %4478  ;;  %v1249_v44 = vpop.f32.mrf.mxu2  ;;  %v1533_v10 = vadd.f32 %v1532_v37, %v5472_v31 }
 0x333   : > { %v1817_v42 = vpop.f32.mrf.mxu0  ;;  %v1250_v3 = vadd.f32 %v1249_v44, %v5403_v13  ;;  %v1703_v47 = vpack.c.bf16 %v4479_v29, %v4477_v1  ;;  %v4481_v58 = vpop.eup %4480 }
 0x334   : > { %v1818_v43 = vadd.f32 %v1817_v42, %v5533_v8 }
 0x335   : > { %4482 = vtanh.f32 %v1250_v3  ;;  %1856 = vmatmul.bf16.gmra.mxu0 %v1703_v47 }
 0x336   : > { %4484 = vtanh.f32 %v1533_v10  ;;  %v1953_v56 = vmax.f32 %v1818_v43, 0.0 }
 0x339   : > { %v1534_v18 = vpop.f32.mrf.mxu3 }
 0x33a   : > { %v1535_v34 = vadd.f32 %v1534_v18, %v5472_v31  ;;  %v1252_v0 = vpop.f32.mrf.mxu2 }
 0x33b   : > { %v1819_v50 = vpop.f32.mrf.mxu0  ;;  %v4483_v51 = vpop.eup %4482  ;;  %v1253_v36 = vadd.f32 %v1252_v0, %v5403_v13 }
 0x33c   : > { %v1820_v55 = vadd.f32 %v1819_v50, %v5533_v8  ;;  %4486 = vtanh.f32 %v1535_v34  ;;  %v1383_v22 = vpack.c.bf16 %v4483_v51, %v4481_v58  ;;  %v4485_v57 = vpop.eup %4484 }
 0x33d   : > { %4488 = vtanh.f32 %v1253_v36 }
 0x33e   : > { %v1954_v27 = vmax.f32 %v1820_v55, 0.0  ;;  %1576 = vmatmul.bf16.gmra.mxu3 %v1383_v22 }
 0x33f   : > { %v2107_v45 = vpop.f32.mrf.mxu1 }
 0x340   : > { %v5599_v39 = vadd.f32 %v2107_v45, %v5595_v25  ;;  %v2025_v63 = vpack.c.bf16 %v1954_v27, %v1953_v56 }
 0x341   : > { %v1537_v7 = vpop.f32.mrf.mxu3 }
 0x342   : > { %2146 = vmatmul.bf16.gmra.mxu1 %v2025_v63  ;;  %v5605_v4 = vsel %vm2269_vm2, %v5599_v39, -inf  ;;  %v4487_v28 = vpop.eup %4486  ;;  %v1254_v52 = vpop.f32.mrf.mxu2  ;;  %v1538_v54 = vadd.f32 %v1537_v7, %v5472_v31 }
 0x343   : > { %v1822_v24 = vpop.f32.mrf.mxu0  ;;  %v2335_v2 = vsel %vm2334_vm3, %v5605_v4, -inf  ;;  %v1255_v20 = vadd.f32 %v1254_v52, %v5403_v13  ;;  %v1704_v6 = vpack.c.bf16 %v4487_v28, %v4485_v57  ;;  %v4489_v41 = vpop.eup %4488 }
 0x344   : > { %2336 = vmax.xlane.f32.xlu0 %v2335_v2  ;;  %v1823_v23 = vadd.f32 %v1822_v24, %v5533_v8 }
 0x345   : > { %4490 = vtanh.f32 %v1255_v20  ;;  %1861 = vmatmul.bf16.gmra.mxu0 %v1704_v6 }
 0x346   : > { %4492 = vtanh.f32 %v1538_v54  ;;  %v1955_v19 = vmax.f32 %v1823_v23, 0.0 }
 0x347   : > { %v2109_v5 = vpop.f32.mrf.mxu1 }
 0x348   : > { %v5612_v60 = vadd.f32 %v2109_v5, %v5595_v25 }
 0x349   : > { %v1539_v12 = vpop.f32.mrf.mxu3 }
 0x34a   : > { %v5618_v26 = vsel %vm2269_vm2, %v5612_v60, -inf  ;;  %v1540_v15 = vadd.f32 %v1539_v12, %v5472_v31  ;;  %v1257_v61 = vpop.f32.mrf.mxu2 }
 0x34b   : > { %v1824_v49 = vpop.f32.mrf.mxu0  ;;  %v2338_v17 = vsel %vm2334_vm3, %v5618_v26, -inf  ;;  %v4491_v38 = vpop.eup %4490  ;;  %v1258_v11 = vadd.f32 %v1257_v61, %v5403_v13 }
 0x34c   : > { %v1825_v32 = vadd.f32 %v1824_v49, %v5533_v8  ;;  %2339 = vmax.xlane.f32.xlu0 %v2338_v17  ;;  %4494 = vtanh.f32 %v1540_v15  ;;  %v1384_v46 = vpack.c.bf16 %v4491_v38, %v4489_v41  ;;  %v4493_v9 = vpop.eup %4492 }
 0x34d   : > { %4496 = vtanh.f32 %v1258_v11 }
 0x34e   : > { %v1956_v40 = vmax.f32 %v1825_v32, 0.0  ;;  %1581 = vmatmul.bf16.gmra.mxu3 %v1384_v46 }
 0x34f   : > { %v2112_v35 = vpop.f32.mrf.mxu1 }
 0x350   : > { %v5625_v48 = vadd.f32 %v2112_v35, %v5595_v25  ;;  %v2026_v33 = vpack.c.bf16 %v1956_v40, %v1955_v19 }
 0x351   : > { %v1542_v62 = vpop.f32.mrf.mxu3 }
 0x352   : > { %2151 = vmatmul.bf16.gmra.mxu1 %v2026_v33  ;;  %v5631_v21 = vsel %vm2269_vm2, %v5625_v48, -inf  ;;  %v4495_v53 = vpop.eup %4494  ;;  %v1259_v30 = vpop.f32.mrf.mxu2  ;;  %v1543_v42 = vadd.f32 %v1542_v62, %v5472_v31 }
 0x353   : > { %v1827_v59 = vpop.f32.mrf.mxu0  ;;  %v2341_v1 = vsel %vm2334_vm3, %v5631_v21, -inf  ;;  %v1260_v37 = vadd.f32 %v1259_v30, %v5403_v13  ;;  %v1705_v29 = vpack.c.bf16 %v4495_v53, %v4493_v9  ;;  %v4497_v43 = vpop.eup %4496 }
 0x354   : > { %2342 = vmax.xlane.f32.xlu1 %v2341_v1  ;;  %v1828_v47 = vadd.f32 %v1827_v59, %v5533_v8 }
 0x355   : > { %4498 = vtanh.f32 %v1260_v37  ;;  %1866 = vmatmul.bf16.gmra.mxu0 %v1705_v29 }
 0x356   : > { %4500 = vtanh.f32 %v1543_v42  ;;  %v1957_v22 = vmax.f32 %v1828_v47, 0.0 }
 0x357   : > { %v2114_v44 = vpop.f32.mrf.mxu1 }
 0x358   : > { %v5638_v3 = vadd.f32 %v2114_v44, %v5595_v25 }
 0x359   : > { %v1544_v14 = vpop.f32.mrf.mxu3 }
 0x35a   : > { %v5644_v10 = vsel %vm2269_vm2, %v5638_v3, -inf  ;;  %v1545_v18 = vadd.f32 %v1544_v14, %v5472_v31  ;;  %v1262_v58 = vpop.f32.mrf.mxu2 }
 0x35b   : > { %v1829_v34 = vpop.f32.mrf.mxu0  ;;  %v2344_v0 = vsel %vm2334_vm3, %v5644_v10, -inf  ;;  %v4499_v50 = vpop.eup %4498  ;;  %v1263_v36 = vadd.f32 %v1262_v58, %v5403_v13 }
 0x35c   : > { %v1830_v51 = vadd.f32 %v1829_v34, %v5533_v8  ;;  %2345 = vmax.xlane.f32.xlu1 %v2344_v0  ;;  %4502 = vtanh.f32 %v1545_v18  ;;  %v1385_v55 = vpack.c.bf16 %v4499_v50, %v4497_v43  ;;  %v4501_v57 = vpop.eup %4500 }
 0x35d   : > { %4504 = vtanh.f32 %v1263_v36 }
 0x35e   : > { %v1958_v56 = vmax.f32 %v1830_v51, 0.0  ;;  %1586 = vmatmul.bf16.gmra.mxu3 %v1385_v55 }
 0x35f   : > { %v2117_v27 = vpop.f32.mrf.mxu1 }
 0x360   : > { %v5651_v45 = vadd.f32 %v2117_v27, %v5595_v25  ;;  %v2027_v63 = vpack.c.bf16 %v1958_v56, %v1957_v22 }
 0x361   : > { %v1547_v7 = vpop.f32.mrf.mxu3 }
 0x362   : > { %2156 = vmatmul.bf16.gmra.mxu1 %v2027_v63  ;;  %v5657_v28 = vsel %vm2269_vm2, %v5651_v45, -inf  ;;  %v4503_v52 = vpop.eup %4502  ;;  %v1264_v24 = vpop.f32.mrf.mxu2  ;;  %v1548_v23 = vadd.f32 %v1547_v7, %v5472_v31 }
 0x363   : > { %v1832_v2 = vpop.f32.mrf.mxu0  ;;  %v2347_v20 = vsel %vm2334_vm3, %v5657_v28, -inf  ;;  %v1265_v6 = vadd.f32 %v1264_v24, %v5403_v13  ;;  %v1706_v5 = vpack.c.bf16 %v4503_v52, %v4501_v57  ;;  %v4505_v49 = vpop.eup %4504 }
 0x364   : > { %2348 = vmax.xlane.f32.xlu2 %v2347_v20  ;;  %v1833_v41 = vadd.f32 %v1832_v2, %v5533_v8 }
 0x365   : > { %4506 = vtanh.f32 %v1265_v6  ;;  %1871 = vmatmul.bf16.gmra.mxu0 %v1706_v5 }
 0x366   : > { %4508 = vtanh.f32 %v1548_v23  ;;  %v1959_v33 = vmax.f32 %v1833_v41, 0.0 }
 0x367   : > { %v2119_v54 = vpop.f32.mrf.mxu1 }
 0x368   : > { %v5664_v12 = vadd.f32 %v2119_v54, %v5595_v25 }
 0x369   : > { %v1549_v15 = vpop.f32.mrf.mxu3 }
 0x36a   : > { %v5670_v61 = vsel %vm2269_vm2, %v5664_v12, -inf  ;;  %v1550_v17 = vadd.f32 %v1549_v15, %v5472_v31  ;;  %v1267_v38 = vpop.f32.mrf.mxu2 }
 0x36b   : > { %v1834_v32 = vpop.f32.mrf.mxu0  ;;  %v2350_v46 = vsel %vm2334_vm3, %v5670_v61, -inf  ;;  %v4507_v19 = vpop.eup %4506  ;;  %v1268_v30 = vadd.f32 %v1267_v38, %v5403_v13 }
 0x36c   : > { %v1835_v40 = vadd.f32 %v1834_v32, %v5533_v8  ;;  %2351 = vmax.xlane.f32.xlu2 %v2350_v46  ;;  %4510 = vtanh.f32 %v1550_v17  ;;  %v1386_v35 = vpack.c.bf16 %v4507_v19, %v4505_v49  ;;  %v4509_v59 = vpop.eup %4508 }
 0x36d   : > { %4512 = vtanh.f32 %v1268_v30 }
 0x36e   : > { %v1960_v11 = vmax.f32 %v1835_v40, 0.0  ;;  %1591 = vmatmul.bf16.gmra.mxu3 %v1386_v35 }
 0x36f   : > { %v2122_v9 = vpop.f32.mrf.mxu1 }
 0x370   : > { %v5677_v62 = vadd.f32 %v2122_v9, %v5595_v25  ;;  %v2028_v53 = vpack.c.bf16 %v1960_v11, %v1959_v33 }
 0x371   : > { %v1552_v1 = vpop.f32.mrf.mxu3 }
 0x372   : > { %2161 = vmatmul.bf16.gmra.mxu1 %v2028_v53  ;;  %v5683_v37 = vsel %vm2269_vm2, %v5677_v62, -inf  ;;  %v4511_v29 = vpop.eup %4510  ;;  %v1269_v44 = vpop.f32.mrf.mxu2  ;;  %v1553_v58 = vadd.f32 %v1552_v1, %v5472_v31 }
 0x373   : > { %v1837_v42 = vpop.f32.mrf.mxu0  ;;  %v2353_v47 = vsel %vm2334_vm3, %v5683_v37, -inf  ;;  %v1270_v14 = vadd.f32 %v1269_v44, %v5403_v13  ;;  %v1707_v43 = vpack.c.bf16 %v4511_v29, %v4509_v59  ;;  %v4513_v55 = vpop.eup %4512 }
 0x374   : > { %2354 = vmax.xlane.f32.xlu0 %v2353_v47  ;;  %v1838_v0 = vadd.f32 %v1837_v42, %v5533_v8 }
 0x375   : > { %4514 = vtanh.f32 %v1270_v14  ;;  %1876 = vmatmul.bf16.gmra.mxu0 %v1707_v43 }
 0x376   : > { %4516 = vtanh.f32 %v1553_v58  ;;  %v1961_v52 = vmax.f32 %v1838_v0, 0.0 }
 0x377   : > { %v2124_v18 = vpop.f32.mrf.mxu1 }
 0x378   : > { %v5690_v34 = vadd.f32 %v2124_v18, %v5595_v25 }
 0x379   : > { %v1554_v50 = vpop.f32.mrf.mxu3 }
 0x37a   : > { %v5696_v51 = vsel %vm2269_vm2, %v5690_v34, -inf  ;;  %v1555_v22 = vadd.f32 %v1554_v50, %v5472_v31  ;;  %v1272_v56 = vpop.f32.mrf.mxu2 }
 0x37b   : > { %v1839_v27 = vpop.f32.mrf.mxu0  ;;  %v2356_v63 = vsel %vm2334_vm3, %v5696_v51, -inf  ;;  %v4515_v36 = vpop.eup %4514  ;;  %v1273_v5 = vadd.f32 %v1272_v56, %v5403_v13 }
 0x37c   : > { %v1840_v57 = vadd.f32 %v1839_v27, %v5533_v8  ;;  %2357 = vmax.xlane.f32.xlu1 %v2356_v63  ;;  %4518 = vtanh.f32 %v1555_v22  ;;  %v1387_v7 = vpack.c.bf16 %v4515_v36, %v4513_v55  ;;  %v4517_v54 = vpop.eup %4516 }
 0x37d   : > { %4520 = vtanh.f32 %v1273_v5 }
 0x37e   : > { %v1962_v24 = vmax.f32 %v1840_v57, 0.0  ;;  %1596 = vmatmul.bf16.gmra.mxu3 %v1387_v7 }
 0x37f   : > { %v2127_v2 = vpop.f32.mrf.mxu1 }
 0x380   : > { %v5703_v20 = vadd.f32 %v2127_v2, %v5595_v25  ;;  %v2029_v6 = vpack.c.bf16 %v1962_v24, %v1961_v52 }
 0x381   : > { %v1557_v23 = vpop.f32.mrf.mxu3 }
 0x382   : > { %2166 = vmatmul.bf16.gmra.mxu1 %v2029_v6  ;;  %v5709_v41 = vsel %vm2269_vm2, %v5703_v20, -inf  ;;  %v4519_v15 = vpop.eup %4518  ;;  %v1274_v49 = vpop.f32.mrf.mxu2  ;;  %v1558_v40 = vadd.f32 %v1557_v23, %v5472_v31 }
 0x383   : > { %v1842_v17 = vpop.f32.mrf.mxu0  ;;  %v2359_v38 = vsel %vm2334_vm3, %v5709_v41, -inf  ;;  %v1275_v32 = vadd.f32 %v1274_v49, %v5403_v13  ;;  %v1708_v46 = vpack.c.bf16 %v4519_v15, %v4517_v54  ;;  %v4521_v13 = vpop.eup %4520 }
 0x384   : > { %2360 = vmax.xlane.f32.xlu2 %v2359_v38  ;;  %v1843_v33 = vadd.f32 %v1842_v17, %v5533_v8 }
 0x385   : > { %4522 = vtanh.f32 %v1275_v32  ;;  %1881 = vmatmul.bf16.gmra.mxu0 %v1708_v46 }
 0x386   : > { %4524 = vtanh.f32 %v1558_v40  ;;  %v1963_v42 = vmax.f32 %v1843_v33, 0.0 }
 0x387   : > { %v2129_v19 = vpop.f32.mrf.mxu1 }
 0x388   : > { %v5716_v35 = vadd.f32 %v2129_v19, %v5595_v25 }
 0x389   : > { %v1559_v11 = vpop.f32.mrf.mxu3 }
 0x38a   : > { %v5722_v9 = vsel %vm2269_vm2, %v5716_v35, -inf  ;;  %v1560_v53 = vadd.f32 %v1559_v11, %v5472_v31 }
 0x38b   : > { %v1844_v30 = vpop.f32.mrf.mxu0  ;;  %v2362_v59 = vsel %vm2334_vm3, %v5722_v9, -inf  ;;  %v4523_v1 = vpop.eup %4522 }
 0x38c   : > { %v1845_v29 = vadd.f32 %v1844_v30, %v5533_v8  ;;  %2363 = vmax.xlane.f32.xlu0 %v2362_v59  ;;  %4526 = vtanh.f32 %v1560_v53  ;;  %v1388_v44 = vpack.c.bf16 %v4523_v1, %v4521_v13  ;;  %v4525_v58 = vpop.eup %4524 }
 0x38e   : > { %v1964_v47 = vmax.f32 %v1845_v29, 0.0  ;;  %1601 = vmatmul.bf16.gmra.mxu3 %v1388_v44 }
 0x38f   : > { %v2132_v14 = vpop.f32.mrf.mxu1 }
 0x390   : > { %v5729_v43 = vadd.f32 %v2132_v14, %v5595_v25  ;;  %v2030_v18 = vpack.c.bf16 %v1964_v47, %v1963_v42 }
 0x391   : > { %v1562_v0 = vpop.f32.mrf.mxu3 }
 0x392   : > { %2171 = vmatmul.bf16.gmra.mxu1 %v2030_v18  ;;  %v5734_v50 = vsel %vm2269_vm2, %v5729_v43, -inf  ;;  %v4527_v55 = vpop.eup %4526  ;;  %v1563_v36 = vadd.f32 %v1562_v0, %v5472_v31 }
 0x393   : > { %v1847_v22 = vpop.f32.mrf.mxu0  ;;  %v2365_v56 = vsel %vm2334_vm3, %v5734_v50, -inf  ;;  %v1709_v27 = vpack.c.bf16 %v4527_v55, %v4525_v58 }
 0x394   : > { %2366 = vmax.xlane.f32.xlu1 %v2365_v56  ;;  %v1848_v7 = vadd.f32 %v1847_v22, %v5533_v8  ;;  %4528 = vtanh.f32 %v1563_v36 }
 0x395   : > { %1886 = vmatmul.bf16.gmra.mxu0 %v1709_v27 }
 0x396   : > { %v1965_v23 = vmax.f32 %v1848_v7, 0.0 }
 0x397   : > { %v2134_v63 = vpop.f32.mrf.mxu1 }
 0x398   : > { %v5740_v57 = vadd.f32 %v2134_v63, %v5595_v25 }
 0x399   : > { %v1564_v52 = vpop.f32.mrf.mxu3 }
 0x39a   : > { %v5746_v24 = vsel %vm2269_vm2, %v5740_v57, -inf  ;;  %v1565_v2 = vadd.f32 %v1564_v52, %v5472_v31  ;;  %v4529_v32 = vpop.eup %4528 }
 0x39b   : > { %v1849_v6 = vpop.f32.mrf.mxu0  ;;  %v2368_v5 = vsel %vm2334_vm3, %v5746_v24, -inf }
 0x39c   : > { %v1850_v54 = vadd.f32 %v1849_v6, %v5533_v8  ;;  %2369 = vmax.xlane.f32.xlu2 %v2368_v5  ;;  %4530 = vtanh.f32 %v1565_v2 }
 0x39e   : > { %v1966_v15 = vmax.f32 %v1850_v54, 0.0 }
 0x39f   : > { %v2137_v49 = vpop.f32.mrf.mxu1 }
 0x3a0   : > { %v5753_v17 = vadd.f32 %v2137_v49, %v5595_v25  ;;  %v2031_v38 = vpack.c.bf16 %v1966_v15, %v1965_v23 }
 0x3a1   : > { %v1567_v46 = vpop.f32.mrf.mxu3 }
 0x3a2   : > { %2176 = vmatmul.bf16.gmra.mxu1 %v2031_v38  ;;  %v5758_v19 = vsel %vm2269_vm2, %v5753_v17, -inf  ;;  %v4531_v40 = vpop.eup %4530  ;;  %v1568_v30 = vadd.f32 %v1567_v46, %v5472_v31 }
 0x3a3   : > { %v1852_v33 = vpop.f32.mrf.mxu0  ;;  %v2371_v11 = vsel %vm2334_vm3, %v5758_v19, -inf  ;;  %v1710_v13 = vpack.c.bf16 %v4531_v40, %v4529_v32 }
 0x3a4   : > { %2372 = vmax.xlane.f32.xlu0 %v2371_v11  ;;  %v1853_v1 = vadd.f32 %v1852_v33, %v5533_v8  ;;  %4532 = vtanh.f32 %v1568_v30 }
 0x3a5   : > { %1891 = vmatmul.bf16.gmra.mxu0 %v1710_v13 }
 0x3a6   : > { %v1967_v58 = vmax.f32 %v1853_v1, 0.0 }
 0x3a7   : > { %v2139_v53 = vpop.f32.mrf.mxu1 }
 0x3a8   : > { %v5764_v59 = vadd.f32 %v2139_v53, %v5595_v25 }
 0x3a9   : > { %v1569_v29 = vpop.f32.mrf.mxu3 }
 0x3aa   : > { %7269 = vst [vmem:[#allocation2_spill] sm:$0xff] %v5764_v59  ;;  %v5770_v44 = vsel %vm2269_vm2, %v5764_v59, -inf  ;;  %v1570_v42 = vadd.f32 %v1569_v29, %v5472_v31  ;;  %v4533_v27 = vpop.eup %4532 }
 0x3ab   : > { %v1854_v47 = vpop.f32.mrf.mxu0  ;;  %v2374_v14 = vsel %vm2334_vm3, %v5770_v44, -inf }
 0x3ac   : > { %v1855_v18 = vadd.f32 %v1854_v47, %v5533_v8  ;;  %2375 = vmax.xlane.f32.xlu1 %v2374_v14  ;;  %4534 = vtanh.f32 %v1570_v42 }
 0x3ae   : > { %v1968_v0 = vmax.f32 %v1855_v18, 0.0 }
 0x3af   : > { %v2142_v55 = vpop.f32.mrf.mxu1 }
 0x3b0   : > { %v5777_v22 = vadd.f32 %v2142_v55, %v5595_v25  ;;  %v2032_v56 = vpack.c.bf16 %v1968_v0, %v1967_v58 }
 0x3b1   : > { %v1572_v63 = vpop.f32.mrf.mxu3 }
 0x3b2   : > { %7270 = vst [vmem:[#allocation3_spill] sm:$0xff] %v5777_v22  ;;  %2181 = vmatmul.bf16.gmra.mxu1 %v2032_v56  ;;  %v5782_v36 = vsel %vm2269_vm2, %v5777_v22, -inf  ;;  %v4535_v7 = vpop.eup %4534  ;;  %v1573_v23 = vadd.f32 %v1572_v63, %v5472_v31 }
 0x3b3   : > { %v1857_v52 = vpop.f32.mrf.mxu0  ;;  %v2377_v2 = vsel %vm2334_vm3, %v5782_v36, -inf  ;;  %v1711_v6 = vpack.c.bf16 %v4535_v7, %v4533_v27 }
 0x3b4   : > { %2378 = vmax.xlane.f32.xlu2 %v2377_v2  ;;  %v1858_v49 = vadd.f32 %v1857_v52, %v5533_v8  ;;  %4536 = vtanh.f32 %v1573_v23 }
 0x3b5   : > { %1896 = vmatmul.bf16.gmra.mxu0 %v1711_v6 }
 0x3b6   : > { %v1969_v53 = vmax.f32 %v1858_v49, 0.0 }
 0x3b7   : > { %v2144_v5 = vpop.f32.mrf.mxu1  ;;  %v2337_v54 = vpop.xlane.xlu0 %2336 }
 0x3b8   : > { %v5788_v15 = vadd.f32 %v2144_v5, %v5595_v25  ;;  %v2527_v38 = vsub.f32 %v5605_v4, %v2337_v54 }
 0x3b9   : > { %v1574_v32 = vpop.f32.mrf.mxu3 }
 0x3ba   : > { %7271 = vst [vmem:[#allocation4_spill] sm:$0xff] %v5788_v15  ;;  %v5795_v46 = vsel %vm2269_vm2, %v5788_v15, -inf  ;;  %v1575_v40 = vadd.f32 %v1574_v32, %v5472_v31  ;;  %v2591_v30 = vmul.f32 1.442695, %v2527_v38  ;;  %v4537_v14 = vpop.eup %4536 }
 0x3bb   : > { %v1859_v33 = vpop.f32.mrf.mxu0  ;;  %v2380_v11 = vsel %vm2334_vm3, %v5795_v46, -inf }
 0x3bc   : > { %v1860_v13 = vadd.f32 %v1859_v33, %v5533_v8  ;;  %2381 = vmax.xlane.f32.xlu0 %v2380_v11  ;;  %4538 = vtanh.f32 %v1575_v40 }
 0x3bd   : > { %4540 = vpow2.f32 %v2591_v30 }
 0x3be   : > { %v1970_v4 = vmax.f32 %v1860_v13, 0.0 }
 0x3bf   : > { %v2147_v1 = vpop.f32.mrf.mxu1  ;;  %v2340_v29 = vpop.xlane.xlu0 %2339 }
 0x3c0   : > { %v5802_v42 = vadd.f32 %v2147_v1, %v5595_v25  ;;  %v2033_v47 = vpack.c.bf16 %v1970_v4, %v1969_v53  ;;  %v2528_v18 = vsub.f32 %v5618_v26, %v2340_v29 }
 0x3c1   : > { %v1577_v58 = vpop.f32.mrf.mxu3 }
 0x3c2   : > { %7272 = vst [vmem:[#allocation5_spill] sm:$0xff] %v5802_v42  ;;  %2186 = vmatmul.bf16.gmra.mxu1 %v2033_v47  ;;  %v5808_v0 = vsel %vm2269_vm2, %v5802_v42, -inf  ;;  %v4539_v55 = vpop.eup %4538  ;;  %v2593_v7 = vmul.f32 1.442695, %v2528_v18  ;;  %v1578_v26 = vadd.f32 %v1577_v58, %v5472_v31 }
 0x3c3   : > { %v1862_v56 = vpop.f32.mrf.mxu0  ;;  %v2383_v27 = vsel %vm2334_vm3, %v5808_v0, -inf  ;;  %v1712_v63 = vpack.c.bf16 %v4539_v55, %v4537_v14  ;;  %v5812_v6 = vpop.eup %4540 }
 0x3c4   : > { %2384 = vmax.xlane.f32.xlu1 %v2383_v27  ;;  %4542 = vpow2.f32 %v2593_v7  ;;  %v1863_v54 = vadd.f32 %v1862_v56, %v5533_v8  ;;  %v2719_v11 = vsel %vm2334_vm3, %v5812_v6, 0.0 }
 0x3c5   : > { %1901 = vmatmul.bf16.gmra.mxu0 %v1712_v63  ;;  %4544 = vtanh.f32 %v1578_v26 }
 0x3c7   : > { %v2149_v52 = vpop.f32.mrf.mxu1  ;;  %v2343_v2 = vpop.xlane.xlu1 %2342 }
 0x3c8   : > { %v5816_v5 = vadd.f32 %v2149_v52, %v5595_v25  ;;  %v2529_v23 = vsub.f32 %v5631_v21, %v2343_v2  ;;  %v1971_v21 = vmax.f32 %v1863_v54, 0.0 }
 0x3c9   : > { %v1579_v49 = vpop.f32.mrf.mxu3 }
 0x3ca   : > { %7273 = vst [vmem:[#allocation6_spill] sm:$0xff] %v5816_v5  ;;  %v5823_v38 = vsel %vm2269_vm2, %v5816_v5, -inf  ;;  %v1580_v32 = vadd.f32 %v1579_v49, %v5472_v31  ;;  %v2595_v53 = vmul.f32 1.442695, %v2529_v23  ;;  %v5831_v29 = vpop.eup %4542 }
 0x3cb   : > { %v1864_v40 = vpop.f32.mrf.mxu0  ;;  %v2386_v33 = vsel %vm2334_vm3, %v5823_v38, -inf  ;;  %v4545_v18 = vpop.eup %4544  ;;  %v2722_v52 = vsel %vm2334_vm3, %v5831_v29, 0.0 }
 0x3cc   : > { %v1865_v13 = vadd.f32 %v1864_v40, %v5533_v8  ;;  %2387 = vmax.xlane.f32.xlu2 %v2386_v33  ;;  %2720 = vadd.xlane.f32.xlu1 %v2719_v11  ;;  %4546 = vtanh.f32 %v1580_v32 }
 0x3cd   : > { %4548 = vpow2.f32 %v2595_v53 }
 0x3ce   : > { %v1972_v30 = vmax.f32 %v1865_v13, 0.0 }
 0x3cf   : > { %v2152_v4 = vpop.f32.mrf.mxu1  ;;  %v2346_v1 = vpop.xlane.xlu1 %2345 }
 0x3d0   : > { %v5834_v47 = vadd.f32 %v2152_v4, %v5595_v25  ;;  %v2034_v14 = vpack.c.bf16 %v1972_v30, %v1971_v21  ;;  %v2530_v58 = vsub.f32 %v5644_v10, %v2346_v1 }
 0x3d1   : > { %v1582_v55 = vpop.f32.mrf.mxu3 }
 0x3d2   : > { %7274 = vst [vmem:[#allocation7_spill] sm:$0xff] %v5834_v47  ;;  %2191 = vmatmul.bf16.gmra.mxu1 %v2034_v14  ;;  %v5840_v56 = vsel %vm2269_vm2, %v5834_v47, -inf  ;;  %v4547_v27 = vpop.eup %4546  ;;  %v2597_v26 = vmul.f32 1.442695, %v2530_v58  ;;  %v1583_v49 = vadd.f32 %v1582_v55, %v5472_v31 }
 0x3d3   : > { %v1867_v63 = vpop.f32.mrf.mxu0  ;;  %v2389_v7 = vsel %vm2334_vm3, %v5840_v56, -inf  ;;  %v1713_v2 = vpack.c.bf16 %v4547_v27, %v4545_v18  ;;  %v5846_v23 = vpop.eup %4548 }
 0x3d4   : > { %2390 = vmax.xlane.f32.xlu0 %v2389_v7  ;;  %2723 = vadd.xlane.f32.xlu2 %v2722_v52  ;;  %4550 = vpow2.f32 %v2597_v26  ;;  %v1868_v40 = vadd.f32 %v1867_v63, %v5533_v8  ;;  %v2725_v30 = vsel %vm2334_vm3, %v5846_v23, 0.0 }
 0x3d5   : > { %1906 = vmatmul.bf16.gmra.mxu0 %v1713_v2  ;;  %4552 = vtanh.f32 %v1583_v49 }
 0x3d7   : > { %v2154_v10 = vpop.f32.mrf.mxu1  ;;  %v2349_v54 = vpop.xlane.xlu2 %2348 }
 0x3d8   : > { %v5850_v32 = vadd.f32 %v2154_v10, %v5595_v25  ;;  %v2531_v33 = vsub.f32 %v5657_v28, %v2349_v54  ;;  %v1973_v28 = vmax.f32 %v1868_v40, 0.0 }
 0x3d9   : > { %v1584_v11 = vpop.f32.mrf.mxu3 }
 0x3da   : > { %7275 = vst [vmem:[#allocation8_spill] sm:$0xff] %v5850_v32  ;;  %v5857_v13 = vsel %vm2269_vm2, %v5850_v32, -inf  ;;  %v1585_v21 = vadd.f32 %v1584_v11, %v5472_v31  ;;  %v2599_v14 = vmul.f32 1.442695, %v2531_v33  ;;  %v5865_v27 = vpop.eup %4550 }
 0x3db   : > { %v1869_v53 = vpop.f32.mrf.mxu0  ;;  %v2392_v4 = vsel %vm2334_vm3, %v5857_v13, -inf  ;;  %v4553_v52 = vpop.eup %4552  ;;  %v2728_v40 = vsel %vm2334_vm3, %v5865_v27, 0.0 }
 0x3dc   : > { %v1870_v1 = vadd.f32 %v1869_v53, %v5533_v8  ;;  %2726 = vadd.xlane.f32.xlu0 %v2725_v30  ;;  %2393 = vmax.xlane.f32.xlu1 %v2392_v4  ;;  %4554 = vtanh.f32 %v1585_v21 }
 0x3dd   : > { %4556 = vpow2.f32 %v2599_v14 }
 0x3de   : > { %v1974_v18 = vmax.f32 %v1870_v1, 0.0 }
 0x3df   : > { %v2157_v58 = vpop.f32.mrf.mxu1  ;;  %v2352_v55 = vpop.xlane.xlu2 %2351 }
 0x3e0   : > { %v5868_v63 = vadd.f32 %v2157_v58, %v5595_v25  ;;  %v2035_v7 = vpack.c.bf16 %v1974_v18, %v1973_v28  ;;  %v2532_v2 = vsub.f32 %v5670_v61, %v2352_v55 }
 0x3e1   : > { %v1587_v26 = vpop.f32.mrf.mxu3 }
 0x3e2   : > { %7276 = vst [vmem:[#allocation9_spill] sm:$0xff] %v5868_v63  ;;  %2196 = vmatmul.bf16.gmra.mxu1 %v2035_v7  ;;  %v5874_v10 = vsel %vm2269_vm2, %v5868_v63, -inf  ;;  %v4555_v54 = vpop.eup %4554  ;;  %v2601_v21 = vmul.f32 1.442695, %v2532_v2  ;;  %v1588_v4 = vadd.f32 %v1587_v26, %v5472_v31 }
 0x3e3   : > { %v1872_v49 = vpop.f32.mrf.mxu0  ;;  %v2395_v33 = vsel %vm2334_vm3, %v5874_v10, -inf  ;;  %v1714_v11 = vpack.c.bf16 %v4555_v54, %v4553_v52  ;;  %v5880_v30 = vpop.eup %4556 }
 0x3e4   : > { %2729 = vadd.xlane.f32.xlu1 %v2728_v40  ;;  %2396 = vmax.xlane.f32.xlu2 %v2395_v33  ;;  %4558 = vpow2.f32 %v2601_v21  ;;  %v1873_v28 = vadd.f32 %v1872_v49, %v5533_v8  ;;  %v2731_v2 = vsel %vm2334_vm3, %v5880_v30, 0.0 }
 0x3e5   : > { %1911 = vmatmul.bf16.gmra.mxu0 %v1714_v11  ;;  %4560 = vtanh.f32 %v1588_v4 }
 0x3e7   : > { %v2159_v61 = vpop.f32.mrf.mxu1  ;;  %v2355_v53 = vpop.xlane.xlu0 %2354 }
 0x3e8   : > { %v5884_v1 = vadd.f32 %v2159_v61, %v5595_v25  ;;  %v2533_v14 = vsub.f32 %v5683_v37, %v2355_v53  ;;  %v1975_v37 = vmax.f32 %v1873_v28, 0.0 }
 0x3e9   : > { %v1589_v18 = vpop.f32.mrf.mxu3 }
 0x3ea   : > { %7277 = vst [vmem:[#allocation10_spill] sm:$0xff] %v5884_v1  ;;  %v5891_v58 = vsel %vm2269_vm2, %v5884_v1, -inf  ;;  %v1590_v55 = vadd.f32 %v1589_v18, %v5472_v31  ;;  %v2603_v54 = vmul.f32 1.442695, %v2533_v14  ;;  %v5899_v11 = vpop.eup %4558 }
 0x3eb   : > { %v1874_v7 = vpop.f32.mrf.mxu0  ;;  %v2398_v52 = vsel %vm2334_vm3, %v5891_v58, -inf  ;;  %v4561_v53 = vpop.eup %4560 }
 0x3ec   : > { %v1875_v26 = vadd.f32 %v1874_v7, %v5533_v8  ;;  %2399 = vmax.xlane.f32.xlu0 %v2398_v52  ;;  %2732 = vadd.xlane.f32.xlu2 %v2731_v2  ;;  %4562 = vtanh.f32 %v1590_v55  ;;  %v2734_v7 = vsel %vm2334_vm3, %v5899_v11, 0.0 }
 0x3ed   : > { %4564 = vpow2.f32 %v2603_v54 }
 0x3ee   : > { %v1976_v49 = vmax.f32 %v1875_v26, 0.0 }
 0x3ef   : > { %v2162_v40 = vpop.f32.mrf.mxu1  ;;  %v2358_v33 = vpop.xlane.xlu1 %2357 }
 0x3f0   : > { %v2036_v21 = vpack.c.bf16 %v1976_v49, %v1975_v37  ;;  %v5902_v61 = vadd.f32 %v2162_v40, %v5595_v25  ;;  %v2534_v4 = vsub.f32 %v5696_v51, %v2358_v33 }
 0x3f1   : > { %v1592_v18 = vpop.f32.mrf.mxu3 }
 0x3f2   : > { %7278 = vst [vmem:[#allocation11_spill] sm:$0xff] %v5902_v61  ;;  %2201 = vmatmul.bf16.gmra.mxu1 %v2036_v21  ;;  %v5908_v28 = vsel %vm2269_vm2, %v5902_v61, -inf  ;;  %v4563_v14 = vpop.eup %4562  ;;  %v2605_v26 = vmul.f32 1.442695, %v2534_v4  ;;  %v1593_v49 = vadd.f32 %v1592_v18, %v5472_v31 }
 0x3f3   : > { %v1877_v55 = vpop.f32.mrf.mxu0  ;;  %v2401_v52 = vsel %vm2334_vm3, %v5908_v28, -inf  ;;  %v1715_v2 = vpack.c.bf16 %v4563_v14, %v4561_v53  ;;  %v5914_v54 = vpop.eup %4564 }
 0x3f4   : > { %2735 = vadd.xlane.f32.xlu0 %v2734_v7  ;;  %2402 = vmax.xlane.f32.xlu1 %v2401_v52  ;;  %4566 = vpow2.f32 %v2605_v26  ;;  %v1878_v33 = vadd.f32 %v1877_v55, %v5533_v8  ;;  %v2737_v7 = vsel %vm2334_vm3, %v5914_v54, 0.0 }
 0x3f5   : > { %1916 = vmatmul.bf16.gmra.mxu0 %v1715_v2  ;;  %4568 = vtanh.f32 %v1593_v49 }
 0x3f7   : > { %v2164_v51 = vpop.f32.mrf.mxu1  ;;  %v2361_v37 = vpop.xlane.xlu2 %2360 }
 0x3f8   : > { %v5918_v40 = vadd.f32 %v2164_v51, %v5595_v25  ;;  %v2535_v21 = vsub.f32 %v5709_v41, %v2361_v37  ;;  %v1977_v41 = vmax.f32 %v1878_v33, 0.0 }
 0x3f9   : > { %v1594_v61 = vpop.f32.mrf.mxu3 }
 0x3fa   : > { %7279 = vst [vmem:[#allocation12_spill] sm:$0xff] %v5918_v40  ;;  %v5925_v53 = vsel %vm2269_vm2, %v5918_v40, -inf  ;;  %v1595_v4 = vadd.f32 %v1594_v61, %v5472_v31  ;;  %v2607_v52 = vmul.f32 1.442695, %v2535_v21  ;;  %v5933_v37 = vpop.eup %4566 }
 0x3fb   : > { %v1879_v14 = vpop.f32.mrf.mxu0  ;;  %v2404_v18 = vsel %vm2334_vm3, %v5925_v53, -inf  ;;  %v4569_v1 = vpop.eup %4568 }
 0x3fc   : > { %v1880_v55 = vadd.f32 %v1879_v14, %v5533_v8  ;;  %2405 = vmax.xlane.f32.xlu2 %v2404_v18  ;;  %2738 = vadd.xlane.f32.xlu1 %v2737_v7  ;;  %4570 = vtanh.f32 %v1595_v4  ;;  %v2740_v18 = vsel %vm2334_vm3, %v5933_v37, 0.0 }
 0x3fd   : > { %4572 = vpow2.f32 %v2607_v52 }
 0x3fe   : > { %v1978_v2 = vmax.f32 %v1880_v55, 0.0 }
 0x3ff   : > { %v2167_v26 = vpop.f32.mrf.mxu1  ;;  %v2364_v51 = vpop.xlane.xlu0 %2363 }
 0x400   : > { %v2037_v61 = vpack.c.bf16 %v1978_v2, %v1977_v41  ;;  %v5936_v40 = vadd.f32 %v2167_v26, %v5595_v25  ;;  %v2536_v49 = vsub.f32 %v5722_v9, %v2364_v51 }
 0x401   : > { %v1597_v63 = vpop.f32.mrf.mxu3 }
 0x402   : > { %7280 = vst [vmem:[#allocation13_spill] sm:$0xff] %v5936_v40  ;;  %2206 = vmatmul.bf16.gmra.mxu1 %v2037_v61  ;;  %v5942_v33 = vsel %vm2269_vm2, %v5936_v40, -inf  ;;  %v4571_v21 = vpop.eup %4570  ;;  %v2609_v55 = vmul.f32 1.442695, %v2536_v49  ;;  %v1598_v2 = vadd.f32 %v1597_v63, %v5472_v31 }
 0x403   : > { %v1882_v4 = vpop.f32.mrf.mxu0  ;;  %v2407_v14 = vsel %vm2334_vm3, %v5942_v33, -inf  ;;  %v1716_v7 = vpack.c.bf16 %v4571_v21, %v4569_v1  ;;  %v5948_v52 = vpop.eup %4572 }
 0x404   : > { %2408 = vmax.xlane.f32.xlu0 %v2407_v14  ;;  %2741 = vadd.xlane.f32.xlu2 %v2740_v18  ;;  %4574 = vpow2.f32 %v2609_v55  ;;  %v1883_v51 = vadd.f32 %v1882_v4, %v5533_v8  ;;  %v2743_v63 = vsel %vm2334_vm3, %v5948_v52, 0.0 }
 0x405   : > { %1921 = vmatmul.bf16.gmra.mxu0 %v1716_v7  ;;  %4576 = vtanh.f32 %v1598_v2 }
 0x407   : > { %v2169_v9 = vpop.f32.mrf.mxu1  ;;  %v2367_v41 = vpop.xlane.xlu1 %2366 }
 0x408   : > { %v5952_v26 = vadd.f32 %v2169_v9, %v5595_v25  ;;  %v2537_v61 = vsub.f32 %v5734_v50, %v2367_v41  ;;  %v1979_v50 = vmax.f32 %v1883_v51, 0.0 }
 0x409   : > { %v1599_v40 = vpop.f32.mrf.mxu3 }
 0x40a   : > { %7281 = vst [vmem:[#allocation14_spill] sm:$0xff] %v5952_v26  ;;  %v5959_v1 = vsel %vm2269_vm2, %v5952_v26, -inf  ;;  %v1600_v49 = vadd.f32 %v1599_v40, %v5472_v31  ;;  %v2611_v18 = vmul.f32 1.442695, %v2537_v61  ;;  %v5967_v41 = vpop.eup %4574 }
 0x40b   : > { %v1884_v21 = vpop.f32.mrf.mxu0  ;;  %v2410_v14 = vsel %vm2334_vm3, %v5959_v1, -inf  ;;  %v4577_v32 = vpop.eup %4576 }
 0x40c   : > { %v1885_v4 = vadd.f32 %v1884_v21, %v5533_v8  ;;  %2744 = vadd.xlane.f32.xlu0 %v2743_v63  ;;  %2411 = vmax.xlane.f32.xlu1 %v2410_v14  ;;  %4578 = vtanh.f32 %v1600_v49  ;;  %v2746_v63 = vsel %vm2334_vm3, %v5967_v41, 0.0 }
 0x40d   : > { %4580 = vpow2.f32 %v2611_v18 }
 0x40e   : > { %v1980_v7 = vmax.f32 %v1885_v4, 0.0 }
 0x40f   : > { %v2172_v55 = vpop.f32.mrf.mxu1  ;;  %v2370_v9 = vpop.xlane.xlu2 %2369 }
 0x410   : > { %v2038_v40 = vpack.c.bf16 %v1980_v7, %v1979_v50  ;;  %v5970_v26 = vadd.f32 %v2172_v55, %v5595_v25  ;;  %v2538_v2 = vsub.f32 %v5746_v24, %v2370_v9 }
 0x411   : > { %v1602_v47 = vpop.f32.mrf.mxu3 }
 0x412   : > { %7282 = vst [vmem:[#allocation15_spill] sm:$0xff] %v5970_v26  ;;  %2211 = vmatmul.bf16.gmra.mxu1 %v2038_v40  ;;  %v5976_v51 = vsel %vm2269_vm2, %v5970_v26, -inf  ;;  %v4579_v61 = vpop.eup %4578  ;;  %v2613_v4 = vmul.f32 1.442695, %v2538_v2  ;;  %v1603_v7 = vadd.f32 %v1602_v47, %v5472_v31 }
 0x413   : > { %v1887_v49 = vpop.f32.mrf.mxu0  ;;  %v2413_v21 = vsel %vm2334_vm3, %v5976_v51, -inf  ;;  %v1717_v14 = vpack.c.bf16 %v4579_v61, %v4577_v32  ;;  %v5982_v18 = vpop.eup %4580 }
 0x414   : > { %2414 = vmax.xlane.f32.xlu2 %v2413_v21  ;;  %2747 = vadd.xlane.f32.xlu1 %v2746_v63  ;;  %4582 = vpow2.f32 %v2613_v4  ;;  %v1888_v9 = vadd.f32 %v1887_v49, %v5533_v8  ;;  %v2749_v21 = vsel %vm2334_vm3, %v5982_v18, 0.0 }
 0x415   : > { %1926 = vmatmul.bf16.gmra.mxu0 %v1717_v14  ;;  %4584 = vtanh.f32 %v1603_v7 }
 0x417   : > { %v2174_v24 = vpop.f32.mrf.mxu1  ;;  %v2373_v50 = vpop.xlane.xlu0 %2372 }
 0x418   : > { %v5986_v55 = vadd.f32 %v2174_v24, %v5595_v25  ;;  %v2539_v40 = vsub.f32 %v5758_v19, %v2373_v50  ;;  %v1981_v19 = vmax.f32 %v1888_v9, 0.0 }
 0x419   : > { %v1604_v26 = vpop.f32.mrf.mxu3 }
 0x41a   : > { %7283 = vst [vmem:[#allocation16_spill] sm:$0xff] %v5986_v55  ;;  %v5993_v32 = vsel %vm2269_vm2, %v5986_v55, -inf  ;;  %v1605_v2 = vadd.f32 %v1604_v26, %v5472_v31  ;;  %v2615_v63 = vmul.f32 1.442695, %v2539_v40  ;;  %v6001_v50 = vpop.eup %4582 }
 0x41b   : > { %v1889_v61 = vpop.f32.mrf.mxu0  ;;  %v2416_v47 = vsel %vm2334_vm3, %v5993_v32, -inf  ;;  %v4585_v55 = vpop.eup %4584 }
 0x41c   : > { %v1890_v49 = vadd.f32 %v1889_v61, %v5533_v8  ;;  %2417 = vmax.xlane.f32.xlu0 %v2416_v47  ;;  %2750 = vadd.xlane.f32.xlu2 %v2749_v21  ;;  %4586 = vtanh.f32 %v1605_v2  ;;  %v2752_v61 = vsel %vm2334_vm3, %v6001_v50, 0.0 }
 0x41d   : > { %4588 = vpow2.f32 %v2615_v63 }
 0x41e   : > { %v1982_v14 = vmax.f32 %v1890_v49, 0.0 }
 0x41f   : > { %v2177_v4 = vpop.f32.mrf.mxu1  ;;  %v2376_v24 = vpop.xlane.xlu1 %2375 }
 0x420   : > { %v2039_v31 = vpack.c.bf16 %v1982_v14, %v1981_v19  ;;  %v6004_v26 = vadd.f32 %v2177_v4, %v5595_v25  ;;  %v2540_v7 = vsub.f32 %v5770_v44, %v2376_v24 }
 0x422   : > { %7284 = vst [vmem:[#allocation17_spill] sm:$0xff] %v6004_v26  ;;  %2216 = vmatmul.bf16.gmra.mxu1 %v2039_v31  ;;  %v6010_v2 = vsel %vm2269_vm2, %v6004_v26, -inf  ;;  %v4587_v9 = vpop.eup %4586  ;;  %v2617_v49 = vmul.f32 1.442695, %v2540_v7 }
 0x423   : > { %v1892_v40 = vpop.f32.mrf.mxu0  ;;  %v2419_v47 = vsel %vm2334_vm3, %v6010_v2, -inf  ;;  %v1718_v21 = vpack.c.bf16 %v4587_v9, %v4585_v55  ;;  %v6016_v63 = vpop.eup %4588 }
 0x424   : > { %2753 = vadd.xlane.f32.xlu0 %v2752_v61  ;;  %2420 = vmax.xlane.f32.xlu1 %v2419_v47  ;;  %4590 = vpow2.f32 %v2617_v49  ;;  %v1893_v4 = vadd.f32 %v1892_v40, %v5533_v8  ;;  %v2755_v9 = vsel %vm2334_vm3, %v6016_v63, 0.0 }
 0x425   : > { %1931 = vmatmul.bf16.vlgmr.msra.gmra.mxu2 %v1718_v21 }
 0x426   : > { %v1983_v47 = vmax.f32 %v1893_v4, 0.0 }
 0x427   : > { %v2179_v44 = vpop.f32.mrf.mxu1  ;;  %v2379_v19 = vpop.xlane.xlu2 %2378 }
 0x428   : > { %v6019_v14 = vadd.f32 %v2179_v44, %v5595_v25  ;;  %v2541_v24 = vsub.f32 %v5782_v36, %v2379_v19 }
 0x42a   : > { %7285 = vst [vmem:[#allocation18_spill] sm:$0xff] %v6019_v14  ;;  %v6026_v55 = vsel %vm2269_vm2, %v6019_v14, -inf  ;;  %v2619_v40 = vmul.f32 1.442695, %v2541_v24  ;;  %v6033_v44 = vpop.eup %4590 }
 0x42b   : > { %v1894_v31 = vpop.f32.mrf.mxu0  ;;  %v2422_v7 = vsel %vm2334_vm3, %v6026_v55, -inf  ;;  %7286 = vst [vmem:[#allocation19_spill] sm:$0xff] %v6033_v44 }
 0x42c   : > { %v1895_v61 = vadd.f32 %v1894_v31, %v5533_v8  ;;  %2423 = vmax.xlane.f32.xlu2 %v2422_v7  ;;  %2756 = vadd.xlane.f32.xlu1 %v2755_v9  ;;  %4592 = vpow2.f32 %v2619_v40  ;;  %v2758_v7 = vsel %vm2334_vm3, %v6033_v44, 0.0 }
 0x42e   : > { %v1984_v21 = vmax.f32 %v1895_v61, 0.0 }
 0x42f   : > { %v2182_v36 = vpop.f32.mrf.mxu1  ;;  %v2382_v49 = vpop.xlane.xlu0 %2381 }
 0x430   : > { %v2040_v19 = vpack.c.bf16 %v1984_v21, %v1983_v47  ;;  %v6036_v14 = vadd.f32 %v2182_v36, %v5595_v25  ;;  %v2542_v26 = vsub.f32 %v5795_v46, %v2382_v49 }
 0x432   : > { %7287 = vst [vmem:[#allocation20_spill] sm:$0xff] %v6036_v14  ;;  %2221 = vmatmul.bf16.gmra.mxu1 %v2040_v19  ;;  %v6042_v31 = vsel %vm2269_vm2, %v6036_v14, -inf  ;;  %v2621_v9 = vmul.f32 1.442695, %v2542_v26  ;;  %v6048_v40 = vpop.eup %4592 }
 0x433   : > { %v1897_v4 = vpop.f32.mrf.mxu0  ;;  %v2425_v24 = vsel %vm2334_vm3, %v6042_v31, -inf  ;;  %7288 = vst [vmem:[#allocation21_spill] sm:$0xff] %v6048_v40  ;;  %v2761_v26 = vsel %vm2334_vm3, %v6048_v40, 0.0 }
 0x434   : > { %2426 = vmax.xlane.f32.xlu0 %v2425_v24  ;;  %2759 = vadd.xlane.f32.xlu2 %v2758_v7  ;;  %4594 = vpow2.f32 %v2621_v9  ;;  %v1898_v21 = vadd.f32 %v1897_v4, %v5533_v8 }
 0x436   : > { %v1985_v9 = vmax.f32 %v1898_v21, 0.0 }
 0x437   : > { %v2184_v61 = vpop.f32.mrf.mxu1  ;;  %v2385_v47 = vpop.xlane.xlu1 %2384 }
 0x438   : > { %v6051_v46 = vadd.f32 %v2184_v61, %v5595_v25  ;;  %v2543_v36 = vsub.f32 %v5808_v0, %v2385_v47 }
 0x43a   : > { %7289 = vst [vmem:[#allocation22_spill] sm:$0xff] %v6051_v46  ;;  %v6058_v49 = vsel %vm2269_vm2, %v6051_v46, -inf  ;;  %v2623_v4 = vmul.f32 1.442695, %v2543_v36  ;;  %v6065_v14 = vpop.eup %4594 }
 0x43b   : > { %7290 = vst [vmem:[#allocation23_spill] sm:$0xff] %v6058_v49  ;;  %v1899_v19 = vpop.f32.mrf.mxu0  ;;  %v2428_v24 = vsel %vm2334_vm3, %v6058_v49, -inf }
 0x43c   : > { %v1900_v7 = vadd.f32 %v1899_v19, %v5533_v8  ;;  %2762 = vadd.xlane.f32.xlu0 %v2761_v26  ;;  %2429 = vmax.xlane.f32.xlu1 %v2428_v24  ;;  %7291 = vst [vmem:[#allocation24_spill] sm:$0xff] %v6065_v14  ;;  %v2764_v26 = vsel %vm2334_vm3, %v6065_v14, 0.0 }
 0x43e   : > { %v1986_v61 = vmax.f32 %v1900_v7, 0.0 }
 0x43f   : > { %v2187_v0 = vpop.f32.mrf.mxu1  ;;  %v2388_v47 = vpop.xlane.xlu2 %2387 }
 0x440   : > { %v2041_v46 = vpack.c.bf16 %v1986_v61, %v1985_v9  ;;  %v6068_v5 = vadd.f32 %v2187_v0, %v5595_v25  ;;  %v2721_v42 = vpop.xlane.xlu1 %2720  ;;  %v2544_v15 = vsub.f32 %v5823_v38, %v2388_v47 }
 0x441   : > { %4596 = vrcp.f32 %v2721_v42  ;;  %vm2916_vm5 = vweird.f32 %v2721_v42 }
 0x442   : > { %7292 = vst [vmem:[#allocation25_spill] sm:$0xff] %v6068_v5  ;;  %4598 = vpow2.f32 %v2623_v4  ;;  %2226 = vmatmul.bf16.gmra.mxu1 %v2041_v46  ;;  %v6074_v21 = vsel %vm2269_vm2, %v6068_v5, -inf  ;;  %v2625_v24 = vmul.f32 1.442695, %v2544_v15 }
 0x443   : > { %7293 = vst [vmem:[#allocation26_spill] sm:$0xff] %v6074_v21  ;;  %v1902_v36 = vpop.f32.mrf.mxu0  ;;  %v2431_v19 = vsel %vm2334_vm3, %v6074_v21, -inf }
 0x444   : > { %2432 = vmax.xlane.f32.xlu2 %v2431_v19  ;;  %2765 = vadd.xlane.f32.xlu1 %v2764_v26  ;;  %v1903_v5 = vadd.f32 %v1902_v36, %v5533_v8  ;;  %v2920_v19 = vand.u32 2147483647, %v2721_v42  ;;  %v2922_v26 = vand.u32 2147483648, %v2721_v42 }
 0x446   : > { %v1987_v59 = vmax.f32 %v1903_v5, 0.0  ;;  %vm2921_vm7 = vcmp.eq.f32.partialorder %v2920_v19, 8.507059e+37 }
 0x447   : > { %v4597_v7 = vpop.eup %4596  ;;  %v2189_v9 = vpop.f32.mrf.mxu1 }
 0x448   : > { %v6080_v4 = vpop.xlane.xlu2 %2723  ;;  %v6082_v38 = vpop.eup %4598  ;;  %v2912_v46 = vmul.f32 %v4597_v7, %v2721_v42  ;;  %v6085_v61 = vadd.f32 %v2189_v9, %v5595_v25  ;;  %vm2917_vm4 = vweird.f32 %v4597_v7 }
 0x449   : > { %7294 = vst [vmem:[#allocation27_spill] sm:$0xff] %v6082_v38  ;;  %4600 = vrcp.f32 %v6080_v4  ;;  %v2391_v0 = vpop.xlane.xlu0 %2390  ;;  %v2767_v9 = vsel %vm2334_vm3, %v6082_v38, 0.0  ;;  %vm2918_vm6 = vmor %vm2916_vm5, %vm2917_vm4  ;;  %vm2931_vm9 = vweird.f32 %v6080_v4 }
 0x44a   : > { %7295 = vst [vmem:[#allocation28_spill] sm:$0xff] %v6085_v61  ;;  %4602 = vpow2.f32 %v2625_v24  ;;  %v2913_v47 = vsub.f32 1.0, %v2912_v46  ;;  %v6092_v15 = vsel %vm2269_vm2, %v6085_v61, -inf  ;;  %v2545_v24 = vsub.f32 %v5840_v56, %v2391_v0 }
 0x44b   : > { %7296 = vst [vmem:[#allocation29_spill] sm:$0xff] %v6092_v15  ;;  %v1904_v14 = vpop.f32.mrf.mxu0  ;;  %v2434_v22 = vsel %vm2334_vm3, %v6092_v15, -inf  ;;  %v2923_v15 = vor.u32 1.1754944e-38, %v2922_v26 }
 0x44c   : > { %v2914_v40 = vmul.f32 %v4597_v7, %v2913_v47  ;;  %v1905_v36 = vadd.f32 %v1904_v14, %v5533_v8  ;;  %2435 = vmax.xlane.f32.xlu0 %v2434_v22  ;;  %2768 = vadd.xlane.f32.xlu2 %v2767_v9  ;;  %v2627_v0 = vmul.f32 1.442695, %v2545_v24 }
 0x44e   : > { %v2915_v61 = vadd.f32 %v4597_v7, %v2914_v40  ;;  %v1988_v21 = vmax.f32 %v1905_v36, 0.0 }
 0x44f   : > { %v4601_v46 = vpop.eup %4600  ;;  %v2192_v38 = vpop.f32.mrf.mxu1 }
 0x450   : > { %v2927_v44 = vmul.f32 %v4601_v46, %v6080_v4  ;;  %v2394_v47 = vpop.xlane.xlu1 %2393  ;;  %v6101_v49 = vpop.eup %4602  ;;  %v2919_v56 = vsel %vm2918_vm6, %v4597_v7, %v2915_v61  ;;  %v2042_v14 = vpack.c.bf16 %v1988_v21, %v1987_v59  ;;  %v6104_v22 = vadd.f32 %v2192_v38, %v5595_v25 }
 0x451   : > { %v6106_v40 = vpop.xlane.xlu0 %2726  ;;  %v2924_v42 = vsel %vm2921_vm7, %v2923_v15, %v2919_v56  ;;  %v2935_v59 = vand.u32 2147483647, %v6080_v4  ;;  %v2937_v21 = vand.u32 2147483648, %v6080_v4  ;;  %v2546_v38 = vsub.f32 %v5857_v13, %v2394_v47 }
 0x452   : > { %v2928_v5 = vsub.f32 1.0, %v2927_v44  ;;  %4604 = vrcp.f32 %v6106_v40  ;;  %v2925_v7 = vmul.f32 %v5812_v6, %v2924_v42  ;;  %2231 = vmatmul.bf16.gmra.mxu1 %v2042_v14  ;;  %vm2932_vm8 = vweird.f32 %v4601_v46 }
 0x453   : > { %v1907_v44 = vpop.f32.mrf.mxu0  ;;  %v2770_v15 = vsel %vm2334_vm3, %v6101_v49, 0.0  ;;  %v6125_v19 = vsel %vm2269_vm2, %v6104_v22, -inf  ;;  %4606 = vpow2.f32 %v2627_v0  ;;  %vm2933_vm10 = vmor %vm2931_vm9, %vm2932_vm8  ;;  %v2938_v9 = vor.u32 1.1754944e-38, %v2937_v21 }
 0x454   : > { %v2929_v61 = vmul.f32 %v4601_v46, %v2928_v5  ;;  %v3871_v6 = vsel %vm2269_vm2, %v2925_v7, %v5599_v39  ;;  %2771 = vadd.xlane.f32.xlu0 %v2770_v15  ;;  %v2437_v26 = vsel %vm2334_vm3, %v6125_v19, -inf  ;;  %v2629_v24 = vmul.f32 1.442695, %v2546_v38 }
 0x455   : > { %3935 = vst.msk [vmem:[%s6114_s11] sm:$0xff] %vm2334_vm3, %v3871_v6  ;;  %2438 = vmax.xlane.f32.xlu1 %v2437_v26  ;;  %vm2936_vm11 = vcmp.eq.f32.partialorder %v2935_v59, 8.507059e+37  ;;  %v1908_v59 = vadd.f32 %v1907_v44, %v5533_v8  ;;  %vm2946_vm13 = vweird.f32 %v6106_v40 }
 0x456   : > { %v2930_v13 = vadd.f32 %v4601_v46, %v2929_v61  ;;  %v2952_v61 = vand.u32 2147483648, %v6106_v40 }
 0x457   : > { %v2194_v56 = vpop.f32.mrf.mxu1  ;;  %v2397_v4 = vpop.xlane.xlu2 %2396 }
 0x458   : > { %v4605_v36 = vpop.eup %4604  ;;  %v2934_v47 = vsel %vm2933_vm10, %v4601_v46, %v2930_v13  ;;  %v6135_v14 = vpop.xlane.xlu1 %2729  ;;  %v6139_v42 = vadd.f32 %v2194_v56, %v5595_v25  ;;  %v2950_v13 = vand.u32 2147483647, %v6106_v40  ;;  %v2953_v56 = vor.u32 1.1754944e-38, %v2952_v61 }
 0x459   : > { %v2939_v39 = vsel %vm2936_vm11, %v2938_v9, %v2934_v47  ;;  %v2942_v0 = vmul.f32 %v4605_v36, %v6106_v40  ;;  %4608 = vrcp.f32 %v6135_v14  ;;  %v6143_v7 = vpop.eup %4606  ;;  %vm2947_vm12 = vweird.f32 %v4605_v36 }
 0x45a   : > { %v2940_v5 = vmul.f32 %v5831_v29, %v2939_v39  ;;  %4610 = vpow2.f32 %v2629_v24  ;;  %v6149_v21 = vsel %vm2269_vm2, %v6139_v42, -inf  ;;  %v2547_v29 = vsub.f32 %v5874_v10, %v2397_v4  ;;  %vm2948_vm14 = vmor %vm2946_vm13, %vm2947_vm12 }
 0x45b   : > { %v2943_v46 = vsub.f32 1.0, %v2942_v0  ;;  %v1909_v15 = vpop.f32.mrf.mxu0  ;;  %v2440_v6 = vsel %vm2334_vm3, %v6149_v21, -inf  ;;  %v1989_v10 = vmax.f32 %v1908_v59, 0.0  ;;  %vm2951_vm15 = vcmp.eq.f32.partialorder %v2950_v13, 8.507059e+37 }
 0x45c   : > { %v3872_v38 = vsel %vm2269_vm2, %v2940_v5, %v5612_v60  ;;  %v1910_v26 = vadd.f32 %v1909_v15, %v5533_v8  ;;  %2441 = vmax.xlane.f32.xlu2 %v2440_v6  ;;  %v2773_v60 = vsel %vm2334_vm3, %v6143_v7, 0.0  ;;  %v2631_v39 = vmul.f32 1.442695, %v2547_v29 }
 0x45d   : > { %3936 = vst.msk [vmem:[%s6114_s11 + $0x8] sm:$0xff] %vm2334_vm3, %v3872_v38  ;;  %v2944_v44 = vmul.f32 %v4605_v36, %v2943_v46  ;;  %2774 = vadd.xlane.f32.xlu1 %v2773_v60  ;;  %v2965_v29 = vand.u32 2147483647, %v6135_v14  ;;  %vm2961_vm1 = vweird.f32 %v6135_v14 }
 0x45e   : > { %v1990_v24 = vmax.f32 %v1910_v26, 0.0 }
 0x45f   : > { %v2945_v9 = vadd.f32 %v4605_v36, %v2944_v44  ;;  %v4609_v47 = vpop.eup %4608  ;;  %v2197_v0 = vpop.f32.mrf.mxu1  ;;  %vm2966_vm5 = vcmp.eq.f32.partialorder %v2965_v29, 8.507059e+37 }
 0x460   : > { %v2400_v4 = vpop.xlane.xlu0 %2399  ;;  %v6165_v5 = vpop.eup %4610  ;;  %v2957_v38 = vmul.f32 %v4609_v47, %v6135_v14  ;;  %v2043_v15 = vpack.c.bf16 %v1990_v24, %v1989_v10  ;;  %v6171_v40 = vadd.f32 %v2197_v0, %v5595_v25  ;;  %vm2962_vm0 = vweird.f32 %v4609_v47 }
 0x461   : > { %v2949_v46 = vsel %vm2948_vm14, %v4605_v36, %v2945_v9  ;;  %v6168_v6 = vpop.xlane.xlu2 %2732  ;;  %v2967_v36 = vand.u32 2147483648, %v6135_v14  ;;  %v2776_v60 = vsel %vm2334_vm3, %v6165_v5, 0.0  ;;  %v2548_v10 = vsub.f32 %v5891_v58, %v2400_v4  ;;  %vm2963_vm4 = vmor %vm2961_vm1, %vm2962_vm0 }
 0x462   : > { %v2954_v44 = vsel %vm2951_vm15, %v2953_v56, %v2949_v46  ;;  %4612 = vrcp.f32 %v6168_v6  ;;  %v2958_v61 = vsub.f32 1.0, %v2957_v38  ;;  %2236 = vmatmul.bf16.gmra.mxu1 %v2043_v15  ;;  %v6180_v26 = vsel %vm2269_vm2, %v6171_v40, -inf }
 0x463   : > { %v2955_v59 = vmul.f32 %v5846_v23, %v2954_v44  ;;  %4614 = vpow2.f32 %v2631_v39  ;;  %v1912_v13 = vpop.f32.mrf.mxu0  ;;  %v2443_v24 = vsel %vm2334_vm3, %v6180_v26, -inf  ;;  %v2968_v0 = vor.u32 1.1754944e-38, %v2967_v36 }
 0x464   : > { %v2959_v9 = vmul.f32 %v4609_v47, %v2958_v61  ;;  %2777 = vadd.xlane.f32.xlu2 %v2776_v60  ;;  %2444 = vmax.xlane.f32.xlu0 %v2443_v24  ;;  %v2633_v58 = vmul.f32 1.442695, %v2548_v10  ;;  %v2980_v36 = vand.u32 2147483647, %v6168_v6  ;;  %v1913_v60 = vadd.f32 %v1912_v13, %v5533_v8 }
 0x465   : > { %v3873_v23 = vsel %vm2269_vm2, %v2955_v59, %v5625_v48  ;;  %vm2976_vm7 = vweird.f32 %v6168_v6 }
 0x466   : > { %3937 = vst.msk [vmem:[%s6114_s11 + $0x10] sm:$0xff] %vm2334_vm3, %v3873_v23  ;;  %v2960_v56 = vadd.f32 %v4609_v47, %v2959_v9  ;;  %vm2981_vm9 = vcmp.eq.f32.partialorder %v2980_v36, 8.507059e+37 }
 0x467   : > { %v2199_v46 = vpop.f32.mrf.mxu1  ;;  %v2403_v48 = vpop.xlane.xlu1 %2402 }
 0x468   : > { %v4613_v39 = vpop.eup %4612  ;;  %v2964_v38 = vsel %vm2963_vm4, %v4609_v47, %v2960_v56  ;;  %v6195_v4 = vadd.f32 %v2199_v46, %v5595_v25  ;;  %v6197_v44 = vpop.xlane.xlu0 %2735  ;;  %v2982_v47 = vand.u32 2147483648, %v6168_v6  ;;  %v2549_v23 = vsub.f32 %v5908_v28, %v2403_v48 }
 0x469   : > { %v2972_v15 = vmul.f32 %v4613_v39, %v6168_v6  ;;  %v6199_v59 = vpop.eup %4614  ;;  %v2969_v14 = vsel %vm2966_vm5, %v2968_v0, %v2964_v38  ;;  %4616 = vrcp.f32 %v6197_v44  ;;  %vm2977_vm6 = vweird.f32 %v4613_v39 }
 0x46a   : > { %v2970_v61 = vmul.f32 %v5865_v27, %v2969_v14  ;;  %v6210_v10 = vsel %vm2269_vm2, %v6195_v4, -inf  ;;  %4618 = vpow2.f32 %v2633_v58  ;;  %v2779_v28 = vsel %vm2334_vm3, %v6199_v59, 0.0  ;;  %vm2978_vm8 = vmor %vm2976_vm7, %vm2977_vm6 }
 0x46b   : > { %v2973_v29 = vsub.f32 1.0, %v2972_v15  ;;  %v1914_v9 = vpop.f32.mrf.mxu0  ;;  %v2446_v13 = vsel %vm2334_vm3, %v6210_v10, -inf  ;;  %v1991_v48 = vmax.f32 %v1913_v60, 0.0  ;;  %v2635_v38 = vmul.f32 1.442695, %v2549_v23 }
 0x46c   : > { %v3874_v24 = vsel %vm2269_vm2, %v2970_v61, %v5638_v3  ;;  %v1915_v56 = vadd.f32 %v1914_v9, %v5533_v8  ;;  %2780 = vadd.xlane.f32.xlu0 %v2779_v28  ;;  %2447 = vmax.xlane.f32.xlu1 %v2446_v13  ;;  %v2983_v3 = vor.u32 1.1754944e-38, %v2982_v47  ;;  %v2997_v36 = vand.u32 2147483648, %v6197_v44 }
 0x46d   : > { %v2974_v27 = vmul.f32 %v4613_v39, %v2973_v29  ;;  %3938 = vst.msk [vmem:[%s6114_s11 + $0x18] sm:$0xff] %vm2334_vm3, %v3874_v24  ;;  %vm2991_vm11 = vweird.f32 %v6197_v44 }
 0x46e   : > { %v1992_v15 = vmax.f32 %v1915_v56, 0.0 }
 0x46f   : > { %v2975_v0 = vadd.f32 %v4613_v39, %v2974_v27  ;;  %v4617_v46 = vpop.eup %4616  ;;  %v2202_v58 = vpop.f32.mrf.mxu1 }
 0x470   : > { %v2406_v14 = vpop.xlane.xlu2 %2405  ;;  %v2987_v29 = vmul.f32 %v4617_v46, %v6197_v44  ;;  %v6225_v9 = vadd.f32 %v2202_v58, %v5595_v25  ;;  %v6227_v24 = vpop.xlane.xlu1 %2738  ;;  %v2044_v27 = vpack.c.bf16 %v1992_v15, %v1991_v48  ;;  %vm2992_vm10 = vweird.f32 %v4617_v46 }
 0x471   : > { %v2979_v61 = vsel %vm2978_vm8, %v4613_v39, %v2975_v0  ;;  %4620 = vrcp.f32 %v6227_v24  ;;  %v6230_v47 = vpop.eup %4618  ;;  %v2995_v39 = vand.u32 2147483647, %v6197_v44  ;;  %vm2993_vm12 = vmor %vm2991_vm11, %vm2992_vm10  ;;  %vm3006_vm15 = vweird.f32 %v6227_v24 }
 0x472   : > { %v2984_v6 = vsel %vm2981_vm9, %v2983_v3, %v2979_v61  ;;  %v2988_v23 = vsub.f32 1.0, %v2987_v29  ;;  %4622 = vpow2.f32 %v2635_v38  ;;  %2241 = vmatmul.bf16.gmra.mxu1 %v2044_v27  ;;  %v6238_v28 = vsel %vm2269_vm2, %v6225_v9, -inf }
 0x473   : > { %v2985_v60 = vmul.f32 %v5880_v30, %v2984_v6  ;;  %v1917_v56 = vpop.f32.mrf.mxu0  ;;  %v2550_v30 = vsub.f32 %v5925_v53, %v2406_v14  ;;  %v2449_v3 = vsel %vm2334_vm3, %v6238_v28, -inf  ;;  %v2782_v48 = vsel %vm2334_vm3, %v6230_v47, 0.0 }
 0x474   : > { %v2989_v0 = vmul.f32 %v4617_v46, %v2988_v23  ;;  %2450 = vmax.xlane.f32.xlu2 %v2449_v3  ;;  %2783 = vadd.xlane.f32.xlu1 %v2782_v48  ;;  %vm2996_vm13 = vcmp.eq.f32.partialorder %v2995_v39, 8.507059e+37 }
 0x475   : > { %v3875_v13 = vsel %vm2269_vm2, %v2985_v60, %v5651_v45  ;;  %v2998_v45 = vor.u32 1.1754944e-38, %v2997_v36  ;;  %v2637_v14 = vmul.f32 1.442695, %v2550_v30  ;;  %v3010_v36 = vand.u32 2147483647, %v6227_v24 }
 0x476   : > { %3939 = vst.msk [vmem:[%s6114_s11 + $0x20] sm:$0xff] %vm2334_vm3, %v3875_v13  ;;  %v2990_v38 = vadd.f32 %v4617_v46, %v2989_v0  ;;  %v1918_v13 = vadd.f32 %v1917_v56, %v5533_v8 }
 0x477   : > { %v4621_v15 = vpop.eup %4620  ;;  %v2204_v58 = vpop.f32.mrf.mxu1  ;;  %vm3011_vm1 = vcmp.eq.f32.partialorder %v3010_v36, 8.507059e+37 }
 0x478   : > { %v6251_v61 = vpop.xlane.xlu2 %2741  ;;  %v2994_v53 = vsel %vm2993_vm12, %v4617_v46, %v2990_v38  ;;  %v3002_v29 = vmul.f32 %v4621_v15, %v6227_v24  ;;  %v6255_v6 = vadd.f32 %v2204_v58, %v5595_v25  ;;  %v2409_v27 = vpop.xlane.xlu0 %2408  ;;  %v3012_v46 = vand.u32 2147483648, %v6227_v24 }
 0x479   : > { %v6257_v60 = vpop.eup %4622  ;;  %v2999_v44 = vsel %vm2996_vm13, %v2998_v45, %v2994_v53  ;;  %4624 = vrcp.f32 %v6251_v61  ;;  %v2551_v0 = vsub.f32 %v5942_v33, %v2409_v27  ;;  %vm3007_vm14 = vweird.f32 %v4621_v15 }
 0x47a   : > { %v3000_v23 = vmul.f32 %v5899_v11, %v2999_v44  ;;  %v3003_v39 = vsub.f32 1.0, %v3002_v29  ;;  %v6268_v3 = vsel %vm2269_vm2, %v6255_v6, -inf  ;;  %4626 = vpow2.f32 %v2637_v14  ;;  %vm3008_vm0 = vmor %vm3006_vm15, %vm3007_vm14 }
 0x47b   : > { %v1919_v30 = vpop.f32.mrf.mxu0  ;;  %v2785_v33 = vsel %vm2334_vm3, %v6257_v60, 0.0  ;;  %v2452_v56 = vsel %vm2334_vm3, %v6268_v3, -inf  ;;  %v1993_v53 = vmax.f32 %v1918_v13, 0.0  ;;  %v2639_v14 = vmul.f32 1.442695, %v2551_v0 }
 0x47c   : > { %v3876_v48 = vsel %vm2269_vm2, %v3000_v23, %v5664_v12  ;;  %v3004_v11 = vmul.f32 %v4621_v15, %v3003_v39  ;;  %v1920_v38 = vadd.f32 %v1919_v30, %v5533_v8  ;;  %2786 = vadd.xlane.f32.xlu2 %v2785_v33  ;;  %2453 = vmax.xlane.f32.xlu0 %v2452_v56  ;;  %v3013_v12 = vor.u32 1.1754944e-38, %v3012_v46 }
 0x47d   : > { %3940 = vst.msk [vmem:[%s6114_s11 + $0x28] sm:$0xff] %vm2334_vm3, %v3876_v48  ;;  %v3027_v36 = vand.u32 2147483648, %v6251_v61  ;;  %vm3021_vm5 = vweird.f32 %v6251_v61 }
 0x47e   : > { %v3005_v45 = vadd.f32 %v4621_v15, %v3004_v11  ;;  %v1994_v29 = vmax.f32 %v1920_v38, 0.0 }
 0x47f   : > { %v4625_v58 = vpop.eup %4624  ;;  %v2207_v27 = vpop.f32.mrf.mxu1 }
 0x480   : > { %v2412_v44 = vpop.xlane.xlu1 %2411  ;;  %v3009_v23 = vsel %vm3008_vm0, %v4621_v15, %v3005_v45  ;;  %v3017_v39 = vmul.f32 %v4625_v58, %v6251_v61  ;;  %v6283_v30 = vadd.f32 %v2207_v27, %v5595_v25  ;;  %v6285_v48 = vpop.xlane.xlu0 %2744  ;;  %v2045_v11 = vpack.c.bf16 %v1994_v29, %v1993_v53 }
 0x481   : > { %v3014_v24 = vsel %vm3011_vm1, %v3013_v12, %v3009_v23  ;;  %4628 = vrcp.f32 %v6285_v48  ;;  %v6288_v46 = vpop.eup %4626  ;;  %v3025_v15 = vand.u32 2147483647, %v6251_v61  ;;  %vm3022_vm4 = vweird.f32 %v4625_v58 }
 0x482   : > { %v3015_v13 = vmul.f32 %v5914_v54, %v3014_v24  ;;  %v3018_v0 = vsub.f32 1.0, %v3017_v39  ;;  %4630 = vpow2.f32 %v2639_v14  ;;  %2246 = vmatmul.bf16.gmra.mxu1 %v2045_v11  ;;  %v6296_v33 = vsel %vm2269_vm2, %v6283_v30, -inf  ;;  %vm3023_vm6 = vmor %vm3021_vm5, %vm3022_vm4 }
 0x483   : > { %v1922_v38 = vpop.f32.mrf.mxu0  ;;  %v2552_v54 = vsub.f32 %v5959_v1, %v2412_v44  ;;  %v2788_v12 = vsel %vm2334_vm3, %v6288_v46, 0.0  ;;  %v2455_v53 = vsel %vm2334_vm3, %v6296_v33, -inf  ;;  %vm3026_vm7 = vcmp.eq.f32.partialorder %v3025_v15, 8.507059e+37 }
 0x484   : > { %v3877_v56 = vsel %vm2269_vm2, %v3015_v13, %v5677_v62  ;;  %v3019_v45 = vmul.f32 %v4625_v58, %v3018_v0  ;;  %2789 = vadd.xlane.f32.xlu0 %v2788_v12  ;;  %2456 = vmax.xlane.f32.xlu1 %v2455_v53  ;;  %v3028_v62 = vor.u32 1.1754944e-38, %v3027_v36  ;;  %v3040_v36 = vand.u32 2147483647, %v6285_v48 }
 0x485   : > { %3941 = vst.msk [vmem:[%s6114_s11 + $0x30] sm:$0xff] %vm2334_vm3, %v3877_v56  ;;  %v2641_v44 = vmul.f32 1.442695, %v2552_v54  ;;  %v1923_v56 = vadd.f32 %v1922_v38, %v5533_v8  ;;  %vm3036_vm9 = vweird.f32 %v6285_v48 }
 0x486   : > { %v3020_v14 = vadd.f32 %v4625_v58, %v3019_v45  ;;  %vm3041_vm11 = vcmp.eq.f32.partialorder %v3040_v36, 8.507059e+37 }
 0x487   : > { %v4629_v29 = vpop.eup %4628  ;;  %v2209_v27 = vpop.f32.mrf.mxu1 }
 0x488   : > { %v2415_v23 = vpop.xlane.xlu2 %2414  ;;  %v3024_v1 = vsel %vm3023_vm6, %v4625_v58, %v3020_v14  ;;  %v3032_v39 = vmul.f32 %v4629_v29, %v6285_v48  ;;  %v6311_v24 = vadd.f32 %v2209_v27, %v5595_v25  ;;  %v6313_v11 = vpop.xlane.xlu1 %2747  ;;  %v3042_v58 = vand.u32 2147483648, %v6285_v48 }
 0x489   : > { %v6315_v13 = vpop.eup %4630  ;;  %v3029_v61 = vsel %vm3026_vm7, %v3028_v62, %v3024_v1  ;;  %4632 = vrcp.f32 %v6313_v11  ;;  %v2553_v45 = vsub.f32 %v5976_v51, %v2415_v23  ;;  %vm3037_vm8 = vweird.f32 %v4629_v29 }
 0x48a   : > { %v3030_v0 = vmul.f32 %v5933_v37, %v3029_v61  ;;  %v3033_v15 = vsub.f32 1.0, %v3032_v39  ;;  %v6326_v12 = vsel %vm2269_vm2, %v6311_v24, -inf  ;;  %4634 = vpow2.f32 %v2641_v44  ;;  %vm3038_vm10 = vmor %vm3036_vm9, %vm3037_vm8 }
 0x48b   : > { %v1924_v54 = vpop.f32.mrf.mxu0  ;;  %v2458_v51 = vsel %vm2334_vm3, %v6326_v12, -inf  ;;  %v2791_v38 = vsel %vm2334_vm3, %v6315_v13, 0.0  ;;  %v1995_v23 = vmax.f32 %v1923_v56, 0.0  ;;  %v2643_v1 = vmul.f32 1.442695, %v2553_v45 }
 0x48c   : > { %v3878_v53 = vsel %vm2269_vm2, %v3030_v0, %v5690_v34  ;;  %v3034_v37 = vmul.f32 %v4629_v29, %v3033_v15  ;;  %v1925_v14 = vadd.f32 %v1924_v54, %v5533_v8  ;;  %2459 = vmax.xlane.f32.xlu2 %v2458_v51  ;;  %2792 = vadd.xlane.f32.xlu1 %v2791_v38  ;;  %v3043_v34 = vor.u32 1.1754944e-38, %v3042_v58 }
 0x48d   : > { %3942 = vst.msk [vmem:[%s6114_s11 + $0x38] sm:$0xff] %vm2334_vm3, %v3878_v53  ;;  %v3057_v36 = vand.u32 2147483648, %v6313_v11  ;;  %vm3051_vm13 = vweird.f32 %v6313_v11 }
 0x48e   : > { %v3035_v62 = vadd.f32 %v4629_v29, %v3034_v37  ;;  %v1996_v44 = vmax.f32 %v1925_v14, 0.0 }
 0x48f   : > { %v4633_v27 = vpop.eup %4632  ;;  %v2212_v39 = vpop.f32.mrf.mxu1 }
 0x490   : > { %v6339_v61 = vpop.xlane.xlu2 %2750  ;;  %v3039_v0 = vsel %vm3038_vm10, %v4629_v29, %v3035_v62  ;;  %v3047_v15 = vmul.f32 %v4633_v27, %v6313_v11  ;;  %v6343_v54 = vadd.f32 %v2212_v39, %v5595_v25  ;;  %v2418_v53 = vpop.xlane.xlu0 %2417  ;;  %v2046_v37 = vpack.c.bf16 %v1996_v44, %v1995_v23 }
 0x491   : > { %v3044_v48 = vsel %vm3041_vm11, %v3043_v34, %v3039_v0  ;;  %4636 = vrcp.f32 %v6339_v61  ;;  %v6346_v58 = vpop.eup %4634  ;;  %v3055_v29 = vand.u32 2147483647, %v6313_v11  ;;  %vm3052_vm12 = vweird.f32 %v4633_v27 }
 0x492   : > { %7297 = vst [vmem:[#allocation30_spill] sm:$0xff] %v6343_v54  ;;  %v3045_v56 = vmul.f32 %v5948_v52, %v3044_v48  ;;  %v3048_v45 = vsub.f32 1.0, %v3047_v15  ;;  %4638 = vpow2.f32 %v2643_v1  ;;  %2251 = vmatmul.bf16.gmra.mxu1 %v2046_v37  ;;  %v6354_v51 = vsel %vm2269_vm2, %v6343_v54, -inf  ;;  %vm3053_vm14 = vmor %vm3051_vm13, %vm3052_vm12 }
 0x493   : > { %v1927_v14 = vpop.f32.mrf.mxu0  ;;  %v2554_v52 = vsub.f32 %v5993_v32, %v2418_v53  ;;  %v2461_v34 = vsel %vm2334_vm3, %v6354_v51, -inf  ;;  %v2794_v23 = vsel %vm2334_vm3, %v6346_v58, 0.0  ;;  %vm3056_vm15 = vcmp.eq.f32.partialorder %v3055_v29, 8.507059e+37 }
 0x494   : > { %v3879_v38 = vsel %vm2269_vm2, %v3045_v56, %v5703_v20  ;;  %v3049_v62 = vmul.f32 %v4633_v27, %v3048_v45  ;;  %2462 = vmax.xlane.f32.xlu0 %v2461_v34  ;;  %2795 = vadd.xlane.f32.xlu2 %v2794_v23  ;;  %v3058_v20 = vor.u32 1.1754944e-38, %v3057_v36  ;;  %v3070_v36 = vand.u32 2147483647, %v6339_v61 }
 0x495   : > { %3943 = vst.msk [vmem:[%s6114_s11 + $0x40] sm:$0xff] %vm2334_vm3, %v3879_v38  ;;  %v2645_v53 = vmul.f32 1.442695, %v2554_v52  ;;  %v1928_v38 = vadd.f32 %v1927_v14, %v5533_v8  ;;  %vm3066_vm1 = vweird.f32 %v6339_v61 }
 0x496   : > { %v3050_v1 = vadd.f32 %v4633_v27, %v3049_v62  ;;  %vm3071_vm5 = vcmp.eq.f32.partialorder %v3070_v36, 8.507059e+37 }
 0x497   : > { %v4637_v44 = vpop.eup %4636  ;;  %v2214_v39 = vpop.f32.mrf.mxu1 }
 0x498   : > { %v2421_v0 = vpop.xlane.xlu1 %2420  ;;  %v3054_v32 = vsel %vm3053_vm14, %v4633_v27, %v3050_v1  ;;  %v3062_v15 = vmul.f32 %v4637_v44, %v6339_v61  ;;  %v6369_v48 = vadd.f32 %v2214_v39, %v5595_v25  ;;  %v6371_v37 = vpop.xlane.xlu0 %2753  ;;  %v3072_v27 = vand.u32 2147483648, %v6339_v61 }
 0x499   : > { %v6373_v56 = vpop.eup %4638  ;;  %v3059_v11 = vsel %vm3056_vm15, %v3058_v20, %v3054_v32  ;;  %4640 = vrcp.f32 %v6371_v37  ;;  %v2555_v62 = vsub.f32 %v6010_v2, %v2421_v0  ;;  %vm3067_vm0 = vweird.f32 %v4637_v44 }
 0x49a   : > { %7298 = vst [vmem:[#allocation31_spill] sm:$0xff] %v6369_v48  ;;  %v3060_v45 = vmul.f32 %v5967_v41, %v3059_v11  ;;  %v3063_v29 = vsub.f32 1.0, %v3062_v15  ;;  %v6384_v34 = vsel %vm2269_vm2, %v6369_v48, -inf  ;;  %4642 = vpow2.f32 %v2645_v53  ;;  %vm3068_vm4 = vmor %vm3066_vm1, %vm3067_vm0 }
 0x49b   : > { %v1929_v52 = vpop.f32.mrf.mxu0  ;;  %v2797_v2 = vsel %vm2334_vm3, %v6373_v56, 0.0  ;;  %v2464_v14 = vsel %vm2334_vm3, %v6384_v34, -inf  ;;  %v1997_v0 = vmax.f32 %v1928_v38, 0.0  ;;  %v2647_v32 = vmul.f32 1.442695, %v2555_v62 }
 0x49c   : > { %v3880_v23 = vsel %vm2269_vm2, %v3060_v45, %v5716_v35  ;;  %v3064_v41 = vmul.f32 %v4637_v44, %v3063_v29  ;;  %v1930_v1 = vadd.f32 %v1929_v52, %v5533_v8  ;;  %2798 = vadd.xlane.f32.xlu0 %v2797_v2  ;;  %2465 = vmax.xlane.f32.xlu1 %v2464_v14  ;;  %v3073_v35 = vor.u32 1.1754944e-38, %v3072_v27 }
 0x49d   : > { %3944 = vst.msk [vmem:[%s6114_s11 + $0x48] sm:$0xff] %vm2334_vm3, %v3880_v23  ;;  %v3087_v36 = vand.u32 2147483648, %v6371_v37  ;;  %vm3081_vm7 = vweird.f32 %v6371_v37 }
 0x49e   : > { %v3065_v20 = vadd.f32 %v4637_v44, %v3064_v41  ;;  %v1998_v15 = vmax.f32 %v1930_v1, 0.0 }
 0x49f   : > { %v4641_v39 = vpop.eup %4640  ;;  %v2217_v53 = vpop.f32.mrf.mxu1 }
 0x4a0   : > { %v2424_v11 = vpop.xlane.xlu2 %2423  ;;  %v3069_v45 = vsel %vm3068_vm4, %v4637_v44, %v3065_v20  ;;  %v3077_v29 = vmul.f32 %v4641_v39, %v6371_v37  ;;  %v6399_v52 = vadd.f32 %v2217_v53, %v5595_v25  ;;  %v6401_v23 = vpop.xlane.xlu1 %2756  ;;  %v2047_v41 = vpack.c.bf16 %v1998_v15, %v1997_v0 }
 0x4a1   : > { %v3074_v61 = vsel %vm3071_vm5, %v3073_v35, %v3069_v45  ;;  %4644 = vrcp.f32 %v6401_v23  ;;  %v6404_v27 = vpop.eup %4642  ;;  %v3085_v44 = vand.u32 2147483647, %v6371_v37  ;;  %v2556_v1 = vsub.f32 %v6026_v55, %v2424_v11 }
 0x4a2   : > { %7299 = vst [vmem:[#allocation32_spill] sm:$0xff] %v6399_v52  ;;  %v3075_v38 = vmul.f32 %v5982_v18, %v3074_v61  ;;  %v3078_v62 = vsub.f32 1.0, %v3077_v29  ;;  %4646 = vpow2.f32 %v2647_v32  ;;  %2256 = vmatmul.bf16.gmra.mxu1 %v2047_v41  ;;  %v6413_v2 = vsel %vm2269_vm2, %v6399_v52, -inf }
 0x4a3   : > { %vm3082_vm6 = vweird.f32 %v4641_v39  ;;  %v2467_v18 = vsel %vm2334_vm3, %v6413_v2, -inf  ;;  %v2800_v55 = vsel %vm2334_vm3, %v6404_v27, 0.0  ;;  %v3088_v32 = vor.u32 1.1754944e-38, %v3087_v36 }
 0x4a4   : > { %v3881_v14 = vsel %vm2269_vm2, %v3075_v38, %v5729_v43  ;;  %v3079_v20 = vmul.f32 %v4641_v39, %v3078_v62  ;;  %2468 = vmax.xlane.f32.xlu2 %v2467_v18  ;;  %2801 = vadd.xlane.f32.xlu1 %v2800_v55  ;;  %vm3083_vm8 = vmor %vm3081_vm7, %vm3082_vm6  ;;  %v2649_v15 = vmul.f32 1.442695, %v2556_v1  ;;  %vm3086_vm9 = vcmp.eq.f32.partialorder %v3085_v44, 8.507059e+37 }
 0x4a5   : > { %3945 = vst.msk [vmem:[%s6114_s11 + $0x50] sm:$0xff] %vm2334_vm3, %v3881_v14  ;;  %v3100_v1 = vand.u32 2147483647, %v6401_v23  ;;  %vm3096_vm11 = vweird.f32 %v6401_v23 }
 0x4a6   : > { %v3080_v35 = vadd.f32 %v4641_v39, %v3079_v20 }
 0x4a7   : > { %v4645_v0 = vpop.eup %4644  ;;  %v2219_v43 = vpop.f32.mrf.mxu1  ;;  %vm3101_vm13 = vcmp.eq.f32.partialorder %v3100_v1, 8.507059e+37 }
 0x4a8   : > { %v6425_v53 = vpop.xlane.xlu2 %2759  ;;  %v3084_v11 = vsel %vm3083_vm8, %v4641_v39, %v3080_v35  ;;  %v3092_v45 = vmul.f32 %v4645_v0, %v6401_v23  ;;  %v6429_v29 = vadd.f32 %v2219_v43, %v5595_v25  ;;  %v2427_v61 = vpop.xlane.xlu0 %2426  ;;  %v3102_v39 = vand.u32 2147483648, %v6401_v23 }
 0x4a9   : > { %v6431_v41 = vpop.eup %4646  ;;  %v3089_v37 = vsel %vm3086_vm9, %v3088_v32, %v3084_v11  ;;  %4648 = vrcp.f32 %v6425_v53  ;;  %v1932_v38 = vpop.f32.mrf.mxu2  ;;  %v2557_v44 = vsub.f32 %v6042_v31, %v2427_v61  ;;  %vm3097_vm10 = vweird.f32 %v4645_v0 }
 0x4aa   : > { %7300 = vst [vmem:[#allocation33_spill] sm:$0xff] %v6429_v29  ;;  %v3090_v62 = vmul.f32 %v6001_v50, %v3089_v37  ;;  %v3093_v36 = vsub.f32 1.0, %v3092_v45  ;;  %4650 = vpow2.f32 %v2649_v15  ;;  %v6441_v14 = vsel %vm2269_vm2, %v6429_v29, -inf  ;;  %vm3098_vm12 = vmor %vm3096_vm11, %vm3097_vm10 }
 0x4ab   : > { %v2803_v50 = vsel %vm2334_vm3, %v6431_v41, 0.0  ;;  %v2470_v55 = vsel %vm2334_vm3, %v6441_v14, -inf  ;;  %v3103_v32 = vor.u32 1.1754944e-38, %v3102_v39  ;;  %v2651_v15 = vmul.f32 1.442695, %v2557_v44 }
 0x4ac   : > { %v3882_v20 = vsel %vm2269_vm2, %v3090_v62, %v5740_v57  ;;  %v3094_v18 = vmul.f32 %v4645_v0, %v3093_v36  ;;  %2804 = vadd.xlane.f32.xlu2 %v2803_v50  ;;  %2471 = vmax.xlane.f32.xlu0 %v2470_v55  ;;  %v1933_v36 = vadd.f32 %v1932_v38, %v5533_v8  ;;  %v3115_v1 = vand.u32 2147483647, %v6425_v53 }
 0x4ad   : > { %3946 = vst.msk [vmem:[%s6114_s11 + $0x58] sm:$0xff] %vm2334_vm3, %v3882_v20  ;;  %v3117_v20 = vand.u32 2147483648, %v6425_v53  ;;  %vm3111_vm15 = vweird.f32 %v6425_v53 }
 0x4ae   : > { %v3095_v31 = vadd.f32 %v4645_v0, %v3094_v18  ;;  %vm3116_vm1 = vcmp.eq.f32.partialorder %v3115_v1, 8.507059e+37 }
 0x4af   : > { %v4649_v35 = vpop.eup %4648  ;;  %v2222_v57 = vpop.f32.mrf.mxu1 }
 0x4b0   : > { %v2430_v43 = vpop.xlane.xlu1 %2429  ;;  %v3099_v11 = vsel %vm3098_vm12, %v4645_v0, %v3095_v31  ;;  %v3107_v45 = vmul.f32 %v4649_v35, %v6425_v53  ;;  %v6455_v61 = vadd.f32 %v2222_v57, %v5595_v25  ;;  %v6457_v37 = vpop.xlane.xlu0 %2762  ;;  %vm3112_vm14 = vweird.f32 %v4649_v35 }
 0x4b1   : > { %v6459_v62 = vpop.eup %4650  ;;  %v3104_v23 = vsel %vm3101_vm13, %v3103_v32, %v3099_v11  ;;  %4652 = vrcp.f32 %v6457_v37  ;;  %v1934_v39 = vpop.f32.mrf.mxu2  ;;  %v1999_v32 = vmax.f32 %v1933_v36, 0.0  ;;  %vm3113_vm0 = vmor %vm3111_vm15, %vm3112_vm14  ;;  %vm3126_vm5 = vweird.f32 %v6457_v37 }
 0x4b2   : > { %7301 = vst [vmem:[#allocation34_spill] sm:$0xff] %v6455_v61  ;;  %v3105_v44 = vmul.f32 %v6016_v63, %v3104_v23  ;;  %v3108_v0 = vsub.f32 1.0, %v3107_v45  ;;  %4654 = vpow2.f32 %v2651_v15  ;;  %v1935_v18 = vadd.f32 %v1934_v39, %v5533_v8  ;;  %v7302_v63 = vld [vmem:[#allocation23_spill] sm:$0xff] }
 0x4b3   : > { %v6470_v50 = vsel %vm2269_vm2, %v6455_v61, -inf  ;;  %v2558_v31 = vsub.f32 %v7302_v63, %v2430_v43  ;;  %v2806_v8 = vsel %vm2334_vm3, %v6459_v62, 0.0  ;;  %v3118_v45 = vor.u32 1.1754944e-38, %v3117_v20  ;;  %v7304_v63 = vld [vmem:[#allocation19_spill] sm:$0xff] }
 0x4b4   : > { %v3883_v38 = vsel %vm2269_vm2, %v3105_v44, %v5753_v17  ;;  %v3109_v55 = vmul.f32 %v4649_v35, %v3108_v0  ;;  %v2000_v57 = vmax.f32 %v1935_v18, 0.0  ;;  %v2473_v15 = vsel %vm2334_vm3, %v6470_v50, -inf  ;;  %2807 = vadd.xlane.f32.xlu0 %v2806_v8 }
 0x4b5   : > { %3947 = vst.msk [vmem:[%s6114_s11 + $0x60] sm:$0xff] %vm2334_vm3, %v3883_v38  ;;  %2474 = vmax.xlane.f32.xlu1 %v2473_v15  ;;  %v2653_v44 = vmul.f32 1.442695, %v2558_v31  ;;  %v7305_v31 = vld [vmem:[#allocation26_spill] sm:$0xff] }
 0x4b6   : > { %v3110_v11 = vadd.f32 %v4649_v35, %v3109_v55  ;;  %v2048_v43 = vpack.c.bf16 %v2000_v57, %v1999_v32  ;;  %v3130_v32 = vand.u32 2147483647, %v6457_v37  ;;  %v7306_v15 = vld [vmem:[#allocation2_spill] sm:$0xff] }
 0x4b7   : > { %v4653_v17 = vpop.eup %4652  ;;  %v2224_v23 = vpop.f32.mrf.mxu1 }
 0x4b8   : > { %v2433_v39 = vpop.xlane.xlu2 %2432  ;;  %v3114_v36 = vsel %vm3113_vm0, %v4649_v35, %v3110_v11  ;;  %v3122_v0 = vmul.f32 %v4653_v17, %v6457_v37  ;;  %v6485_v18 = vadd.f32 %v2224_v23, %v5595_v25  ;;  %v2766_v38 = vpop.xlane.xlu1 %2765  ;;  %2261 = vmatmul.bf16.gmra.mxu1 %v2048_v43  ;;  %v3132_v35 = vand.u32 2147483648, %v6457_v37 }
 0x4b9   : > { %v6487_v55 = vpop.eup %4654  ;;  %v3119_v53 = vsel %vm3116_vm1, %v3118_v45, %v3114_v36  ;;  %4656 = vrcp.f32 %v2766_v38  ;;  %v2559_v57 = vsub.f32 %v7305_v31, %v2433_v39  ;;  %vm3127_vm4 = vweird.f32 %v4653_v17 }
 0x4ba   : > { %7303 = vst [vmem:[#allocation23_spill] sm:$0xff] %v6485_v18  ;;  %v3120_v1 = vmul.f32 %v7304_v63, %v3119_v53  ;;  %v3123_v20 = vsub.f32 1.0, %v3122_v0  ;;  %v6496_v8 = vsel %vm2269_vm2, %v6485_v18, -inf  ;;  %4658 = vpow2.f32 %v2653_v44  ;;  %vm3128_vm6 = vmor %vm3126_vm5, %vm3127_vm4 }
 0x4bb   : > { %v2476_v43 = vsel %vm2334_vm3, %v6496_v8, -inf  ;;  %v2809_v23 = vsel %vm2334_vm3, %v6487_v55, 0.0  ;;  %v3133_v0 = vor.u32 1.1754944e-38, %v3132_v35  ;;  %v2655_v53 = vmul.f32 1.442695, %v2559_v57 }
 0x4bc   : > { %v3884_v11 = vsel %vm2269_vm2, %v3120_v1, %v7306_v15  ;;  %v3124_v45 = vmul.f32 %v4653_v17, %v3123_v20  ;;  %2477 = vmax.xlane.f32.xlu2 %v2476_v43  ;;  %vm3131_vm7 = vcmp.eq.f32.partialorder %v3130_v32, 8.507059e+37  ;;  %v3145_v57 = vand.u32 2147483647, %v2766_v38  ;;  %v7309_v32 = vld [vmem:[#allocation3_spill] sm:$0xff] }
 0x4bd   : > { %3948 = vst.msk [vmem:[%s6114_s11 + $0x68] sm:$0xff] %vm2334_vm3, %v3884_v11  ;;  %2810 = vadd.xlane.f32.xlu1 %v2809_v23  ;;  %v3147_v23 = vand.u32 2147483648, %v2766_v38  ;;  %vm3141_vm9 = vweird.f32 %v2766_v38 }
 0x4be   : > { %v3125_v39 = vadd.f32 %v4653_v17, %v3124_v45  ;;  %v7308_v45 = vld [vmem:[#allocation21_spill] sm:$0xff]  ;;  %vm3146_vm11 = vcmp.eq.f32.partialorder %v3145_v57, 8.507059e+37 }
 0x4bf   : > { %v4657_v36 = vpop.eup %4656  ;;  %v2227_v44 = vpop.f32.mrf.mxu1 }
 0x4c0   : > { %v6508_v63 = vpop.xlane.xlu2 %2768  ;;  %v3129_v1 = vsel %vm3128_vm6, %v4653_v17, %v3125_v39  ;;  %v3137_v20 = vmul.f32 %v4657_v36, %v2766_v38  ;;  %v6511_v31 = vadd.f32 %v2227_v44, %v5595_v25  ;;  %v2436_v15 = vpop.xlane.xlu0 %2435  ;;  %vm3142_vm8 = vweird.f32 %v4657_v36  ;;  %v7310_v44 = vld [vmem:[#allocation29_spill] sm:$0xff] }
 0x4c1   : > { %v3134_v11 = vsel %vm3131_vm7, %v3133_v0, %v3129_v1  ;;  %4660 = vrcp.f32 %v6508_v63  ;;  %v6514_v37 = vpop.eup %4658  ;;  %v2560_v1 = vsub.f32 %v7310_v44, %v2436_v15  ;;  %vm3143_vm10 = vmor %vm3141_vm9, %vm3142_vm8  ;;  %v3160_v57 = vand.u32 2147483647, %v6508_v63 }
 0x4c2   : > { %7307 = vst [vmem:[#allocation19_spill] sm:$0xff] %v6511_v31  ;;  %v3135_v43 = vmul.f32 %v7308_v45, %v3134_v11  ;;  %v3138_v35 = vsub.f32 1.0, %v3137_v20  ;;  %4662 = vpow2.f32 %v2655_v53  ;;  %v6520_v17 = vsel %vm2269_vm2, %v6511_v31, -inf }
 0x4c3   : > { %v2479_v53 = vsel %vm2334_vm3, %v6520_v17, -inf  ;;  %v2812_v20 = vsel %vm2334_vm3, %v6514_v37, 0.0  ;;  %v2657_v44 = vmul.f32 1.442695, %v2560_v1  ;;  %vm3156_vm13 = vweird.f32 %v6508_v63 }
 0x4c4   : > { %v3885_v39 = vsel %vm2269_vm2, %v3135_v43, %v7309_v32  ;;  %v3139_v0 = vmul.f32 %v4657_v36, %v3138_v35  ;;  %2480 = vmax.xlane.f32.xlu0 %v2479_v53  ;;  %2813 = vadd.xlane.f32.xlu2 %v2812_v20  ;;  %v3148_v43 = vor.u32 1.1754944e-38, %v3147_v23  ;;  %v7312_v53 = vld [vmem:[#allocation24_spill] sm:$0xff]  ;;  %vm3161_vm15 = vcmp.eq.f32.partialorder %v3160_v57, 8.507059e+37  ;;  %v7316_v57 = vld [vmem:[#allocation5_spill] sm:$0xff] }
 0x4c5   : > { %3949 = vst.msk [vmem:[%s6114_s11 + $0x70] sm:$0xff] %vm2334_vm3, %v3885_v39 }
 0x4c6   : > { %v3140_v11 = vadd.f32 %v4657_v36, %v3139_v0 }
 0x4c7   : > { %v4661_v45 = vpop.eup %4660  ;;  %v2229_v35 = vpop.f32.mrf.mxu1 }
 0x4c8   : > { %v3144_v32 = vsel %vm3143_vm10, %v4657_v36, %v3140_v11  ;;  %v3152_v15 = vmul.f32 %v4661_v45, %v6508_v63  ;;  %v6534_v39 = vadd.f32 %v2229_v35, %v5595_v25  ;;  %v2772_v18 = vpop.xlane.xlu0 %2771  ;;  %v6536_v52 = vpop.eup %4662  ;;  %v3162_v36 = vand.u32 2147483648, %v6508_v63  ;;  %v7313_v11 = vld [vmem:[#allocation4_spill] sm:$0xff] }
 0x4c9   : > { %v3149_v0 = vsel %vm3146_vm11, %v3148_v43, %v3144_v32  ;;  %v2439_v38 = vpop.xlane.xlu1 %2438  ;;  %4664 = vrcp.f32 %v2772_v18  ;;  %vm3157_vm12 = vweird.f32 %v4661_v45  ;;  %v2815_v32 = vsel %vm2334_vm3, %v6536_v52, 0.0 }
 0x4ca   : > { %7311 = vst [vmem:[#allocation26_spill] sm:$0xff] %v6534_v39  ;;  %v3150_v20 = vmul.f32 %v7312_v53, %v3149_v0  ;;  %v3153_v61 = vsub.f32 1.0, %v3152_v15  ;;  %v2561_v23 = vsub.f32 %v6125_v19, %v2439_v38  ;;  %v6545_v1 = vsel %vm2269_vm2, %v6534_v39, -inf  ;;  %vm3158_vm14 = vmor %vm3156_vm13, %vm3157_vm12 }
 0x4cb   : > { %4666 = vpow2.f32 %v2657_v44  ;;  %v2482_v19 = vsel %vm2334_vm3, %v6545_v1, -inf  ;;  %v3163_v38 = vor.u32 1.1754944e-38, %v3162_v36  ;;  %v3175_v36 = vand.u32 2147483647, %v2772_v18 }
 0x4cc   : > { %v3886_v43 = vsel %vm2269_vm2, %v3150_v20, %v7313_v11  ;;  %v3154_v35 = vmul.f32 %v4661_v45, %v3153_v61  ;;  %2816 = vadd.xlane.f32.xlu0 %v2815_v32  ;;  %2483 = vmax.xlane.f32.xlu1 %v2482_v19  ;;  %v2659_v53 = vmul.f32 1.442695, %v2561_v23  ;;  %v7315_v32 = vld [vmem:[#allocation27_spill] sm:$0xff]  ;;  %v3177_v23 = vand.u32 2147483648, %v2772_v18 }
 0x4cd   : > { %3950 = vst.msk [vmem:[%s6114_s11 + $0x78] sm:$0xff] %vm2334_vm3, %v3886_v43  ;;  %vm3171_vm1 = vweird.f32 %v2772_v18  ;;  %vm3176_vm5 = vcmp.eq.f32.partialorder %v3175_v36, 8.507059e+37 }
 0x4ce   : > { %v3155_v15 = vadd.f32 %v4661_v45, %v3154_v35 }
 0x4cf   : > { %v4665_v0 = vpop.eup %4664  ;;  %v2232_v61 = vpop.f32.mrf.mxu1 }
 0x4d0   : > { %v2442_v20 = vpop.xlane.xlu2 %2441  ;;  %v3159_v44 = vsel %vm3158_vm14, %v4661_v45, %v3155_v15  ;;  %v3167_v11 = vmul.f32 %v4665_v0, %v2772_v18  ;;  %v6558_v43 = vadd.f32 %v2232_v61, %v5595_v25  ;;  %vm3172_vm0 = vweird.f32 %v4665_v0 }
 0x4d1   : > { %v3164_v39 = vsel %vm3161_vm15, %v3163_v38, %v3159_v44  ;;  %v2562_v35 = vsub.f32 %v6149_v21, %v2442_v20  ;;  %v2775_v31 = vpop.xlane.xlu1 %2774  ;;  %v6561_v63 = vpop.eup %4666  ;;  %vm3173_vm4 = vmor %vm3171_vm1, %vm3172_vm0  ;;  %v3178_v20 = vor.u32 1.1754944e-38, %v3177_v23 }
 0x4d2   : > { %7314 = vst [vmem:[#allocation2_spill] sm:$0xff] %v6558_v43  ;;  %v3165_v19 = vmul.f32 %v7315_v32, %v3164_v39  ;;  %v3168_v48 = vsub.f32 1.0, %v3167_v11  ;;  %4668 = vrcp.f32 %v2775_v31  ;;  %v6567_v45 = vsel %vm2269_vm2, %v6558_v43, -inf }
 0x4d3   : > { %4670 = vpow2.f32 %v2659_v53  ;;  %v2485_v38 = vsel %vm2334_vm3, %v6567_v45, -inf  ;;  %v2661_v39 = vmul.f32 1.442695, %v2562_v35  ;;  %v2818_v53 = vsel %vm2334_vm3, %v6561_v63, 0.0 }
 0x4d4   : > { %v3887_v15 = vsel %vm2269_vm2, %v3165_v19, %v7316_v57  ;;  %v3169_v21 = vmul.f32 %v4665_v0, %v3168_v48  ;;  %2486 = vmax.xlane.f32.xlu2 %v2485_v38  ;;  %2819 = vadd.xlane.f32.xlu1 %v2818_v53  ;;  %v7318_v38 = vld [vmem:[#allocation6_spill] sm:$0xff]  ;;  %vm3186_vm7 = vweird.f32 %v2775_v31 }
 0x4d5   : > { %3951 = vst.msk [vmem:[%s6114_s11 + $0x80] sm:$0xff] %vm2334_vm3, %v3887_v15 }
 0x4d6   : > { %v3170_v61 = vadd.f32 %v4665_v0, %v3169_v21 }
 0x4d7   : > { %v2234_v44 = vpop.f32.mrf.mxu1  ;;  %v2445_v21 = vpop.xlane.xlu0 %2444 }
 0x4d8   : > { %v2778_v11 = vpop.xlane.xlu2 %2777  ;;  %v4669_v32 = vpop.eup %4668  ;;  %v3174_v48 = vsel %vm3173_vm4, %v4665_v0, %v3170_v61  ;;  %v6579_v19 = vadd.f32 %v2234_v44, %v5595_v25  ;;  %v3190_v61 = vand.u32 2147483647, %v2775_v31  ;;  %v2563_v44 = vsub.f32 %v6180_v26, %v2445_v21 }
 0x4d9   : > { %4672 = vrcp.f32 %v2778_v11  ;;  %v6581_v35 = vpop.eup %4670  ;;  %v3179_v57 = vsel %vm3176_vm5, %v3178_v20, %v3174_v48  ;;  %v3182_v15 = vmul.f32 %v4669_v32, %v2775_v31  ;;  %v3192_v20 = vand.u32 2147483648, %v2775_v31 }
 0x4da   : > { %7317 = vst [vmem:[#allocation21_spill] sm:$0xff] %v6579_v19  ;;  %4674 = vpow2.f32 %v2661_v39  ;;  %v3180_v18 = vmul.f32 %v6101_v49, %v3179_v57  ;;  %v6587_v23 = vsel %vm2269_vm2, %v6579_v19, -inf  ;;  %v2821_v39 = vsel %vm2334_vm3, %v6581_v35, 0.0 }
 0x4db   : > { %v3183_v0 = vsub.f32 1.0, %v3182_v15  ;;  %v2488_v36 = vsel %vm2334_vm3, %v6587_v23, -inf  ;;  %vm3187_vm6 = vweird.f32 %v4669_v32  ;;  %vm3191_vm9 = vcmp.eq.f32.partialorder %v3190_v61, 8.507059e+37 }
 0x4dc   : > { %v3888_v53 = vsel %vm2269_vm2, %v3180_v18, %v7318_v38  ;;  %2489 = vmax.xlane.f32.xlu0 %v2488_v36  ;;  %2822 = vadd.xlane.f32.xlu2 %v2821_v39  ;;  %vm3188_vm8 = vmor %vm3186_vm7, %vm3187_vm6  ;;  %v3193_v36 = vor.u32 1.1754944e-38, %v3192_v20  ;;  %v2663_v29 = vmul.f32 1.442695, %v2563_v44  ;;  %v3207_v39 = vand.u32 2147483648, %v2778_v11 }
 0x4dd   : > { %3952 = vst.msk [vmem:[%s6114_s11 + $0x88] sm:$0xff] %vm2334_vm3, %v3888_v53  ;;  %v3184_v49 = vmul.f32 %v4669_v32, %v3183_v0  ;;  %v3205_v0 = vand.u32 2147483647, %v2778_v11  ;;  %vm3201_vm11 = vweird.f32 %v2778_v11 }
 0x4df   : > { %v4673_v48 = vpop.eup %4672  ;;  %v3185_v15 = vadd.f32 %v4669_v32, %v3184_v49  ;;  %v2237_v18 = vpop.f32.mrf.mxu1  ;;  %vm3206_vm13 = vcmp.eq.f32.partialorder %v3205_v0, 8.507059e+37 }
 0x4e0   : > { %v6599_v57 = vpop.eup %4674  ;;  %v3197_v19 = vmul.f32 %v4673_v48, %v2778_v11  ;;  %v6602_v38 = vadd.f32 %v2237_v18, %v5595_v25  ;;  %v2448_v54 = vpop.xlane.xlu1 %2447  ;;  %vm3202_vm10 = vweird.f32 %v4673_v48 }
 0x4e1   : > { %v3189_v43 = vsel %vm3188_vm8, %v4669_v32, %v3185_v15  ;;  %v2781_v26 = vpop.xlane.xlu0 %2780  ;;  %v2824_v31 = vsel %vm2334_vm3, %v6599_v57, 0.0  ;;  %v2564_v20 = vsub.f32 %v6210_v10, %v2448_v54  ;;  %vm3203_vm12 = vmor %vm3201_vm11, %vm3202_vm10 }
 0x4e2   : > { %7319 = vst [vmem:[#allocation3_spill] sm:$0xff] %v6602_v38  ;;  %v3198_v53 = vsub.f32 1.0, %v3197_v19  ;;  %v3194_v21 = vsel %vm3191_vm9, %v3193_v36, %v3189_v43  ;;  %4676 = vrcp.f32 %v2781_v26  ;;  %v6611_v32 = vsel %vm2269_vm2, %v6602_v38, -inf  ;;  %v7320_v19 = vld [vmem:[#allocation7_spill] sm:$0xff] }
 0x4e3   : > { %v3195_v49 = vmul.f32 %v6143_v7, %v3194_v21  ;;  %4678 = vpow2.f32 %v2663_v29  ;;  %v3208_v7 = vor.u32 1.1754944e-38, %v3207_v39  ;;  %v2491_v10 = vsel %vm2334_vm3, %v6611_v32, -inf }
 0x4e4   : > { %v3199_v61 = vmul.f32 %v4673_v48, %v3198_v53  ;;  %2825 = vadd.xlane.f32.xlu0 %v2824_v31  ;;  %v2665_v15 = vmul.f32 1.442695, %v2564_v20  ;;  %2492 = vmax.xlane.f32.xlu1 %v2491_v10  ;;  %vm3216_vm15 = vweird.f32 %v2781_v26 }
 0x4e5   : > { %v3889_v43 = vsel %vm2269_vm2, %v3195_v49, %v7320_v19  ;;  %v3222_v19 = vand.u32 2147483648, %v2781_v26 }
 0x4e6   : > { %v3200_v44 = vadd.f32 %v4673_v48, %v3199_v61  ;;  %3953 = vst.msk [vmem:[%s6114_s11 + $0x90] sm:$0xff] %vm2334_vm3, %v3889_v43  ;;  %v7322_v61 = vld [vmem:[#allocation8_spill] sm:$0xff] }
 0x4e7   : > { %v2239_v18 = vpop.f32.mrf.mxu1  ;;  %v2451_v31 = vpop.xlane.xlu2 %2450 }
 0x4e8   : > { %v3204_v54 = vsel %vm3203_vm12, %v4673_v48, %v3200_v44  ;;  %v4677_v36 = vpop.eup %4676  ;;  %v6621_v21 = vadd.f32 %v2239_v18, %v5595_v25  ;;  %v2784_v49 = vpop.xlane.xlu1 %2783  ;;  %v3223_v18 = vor.u32 1.1754944e-38, %v3222_v19 }
 0x4e9   : > { %v3209_v53 = vsel %vm3206_vm13, %v3208_v7, %v3204_v54  ;;  %v3212_v11 = vmul.f32 %v4677_v36, %v2781_v26  ;;  %4680 = vrcp.f32 %v2784_v49  ;;  %v6624_v39 = vpop.eup %4678  ;;  %vm3217_vm14 = vweird.f32 %v4677_v36 }
 0x4ea   : > { %7321 = vst [vmem:[#allocation29_spill] sm:$0xff] %v6621_v21  ;;  %v3210_v29 = vmul.f32 %v6165_v5, %v3209_v53  ;;  %4682 = vpow2.f32 %v2665_v15  ;;  %v6632_v20 = vsel %vm2269_vm2, %v6621_v21, -inf  ;;  %v3220_v5 = vand.u32 2147483647, %v2781_v26  ;;  %vm3218_vm0 = vmor %vm3216_vm15, %vm3217_vm14 }
 0x4eb   : > { %v3213_v0 = vsub.f32 1.0, %v3212_v11  ;;  %v2494_v43 = vsel %vm2334_vm3, %v6632_v20, -inf  ;;  %v2565_v7 = vsub.f32 %v6238_v28, %v2451_v31  ;;  %v2827_v10 = vsel %vm2334_vm3, %v6624_v39, 0.0 }
 0x4ec   : > { %v3890_v48 = vsel %vm2269_vm2, %v3210_v29, %v7322_v61  ;;  %2495 = vmax.xlane.f32.xlu2 %v2494_v43  ;;  %2828 = vadd.xlane.f32.xlu1 %v2827_v10  ;;  %vm3221_vm1 = vcmp.eq.f32.partialorder %v3220_v5, 8.507059e+37  ;;  %v3235_v10 = vand.u32 2147483647, %v2784_v49  ;;  %v3237_v5 = vand.u32 2147483648, %v2784_v49 }
 0x4ed   : > { %3954 = vst.msk [vmem:[%s6114_s11 + $0x98] sm:$0xff] %vm2334_vm3, %v3890_v48  ;;  %v3214_v44 = vmul.f32 %v4677_v36, %v3213_v0  ;;  %v2667_v61 = vmul.f32 1.442695, %v2565_v7  ;;  %vm3231_vm5 = vweird.f32 %v2784_v49 }
 0x4ee   : > { %vm3236_vm7 = vcmp.eq.f32.partialorder %v3235_v10, 8.507059e+37  ;;  %v7326_v10 = vld [vmem:[#allocation10_spill] sm:$0xff] }
 0x4ef   : > { %v3215_v54 = vadd.f32 %v4677_v36, %v3214_v44  ;;  %v4681_v15 = vpop.eup %4680  ;;  %v2242_v53 = vpop.f32.mrf.mxu1 }
 0x4f0   : > { %v6641_v29 = vpop.eup %4682  ;;  %v3227_v48 = vmul.f32 %v4681_v15, %v2784_v49  ;;  %v6644_v0 = vadd.f32 %v2242_v53, %v5595_v25  ;;  %v2787_v28 = vpop.xlane.xlu2 %2786  ;;  %vm3232_vm4 = vweird.f32 %v4681_v15 }
 0x4f1   : > { %v3219_v11 = vsel %vm3218_vm0, %v4677_v36, %v3215_v54  ;;  %v2454_v31 = vpop.xlane.xlu0 %2453  ;;  %4684 = vrcp.f32 %v2787_v28  ;;  %v2830_v7 = vsel %vm2334_vm3, %v6641_v29, 0.0  ;;  %v7324_v54 = vld [vmem:[#allocation9_spill] sm:$0xff]  ;;  %vm3233_vm6 = vmor %vm3231_vm5, %vm3232_vm4  ;;  %vm3246_vm9 = vweird.f32 %v2787_v28 }
 0x4f2   : > { %7323 = vst [vmem:[#allocation24_spill] sm:$0xff] %v6644_v0  ;;  %v3224_v43 = vsel %vm3221_vm1, %v3223_v18, %v3219_v11  ;;  %v3228_v44 = vsub.f32 1.0, %v3227_v48  ;;  %v2566_v19 = vsub.f32 %v6268_v3, %v2454_v31  ;;  %v6651_v36 = vsel %vm2269_vm2, %v6644_v0, -inf }
 0x4f3   : > { %v3225_v26 = vmul.f32 %v6199_v59, %v3224_v43  ;;  %4686 = vpow2.f32 %v2667_v61  ;;  %v2497_v59 = vsel %vm2334_vm3, %v6651_v36, -inf  ;;  %v3238_v48 = vor.u32 1.1754944e-38, %v3237_v5 }
 0x4f4   : > { %v3229_v53 = vmul.f32 %v4681_v15, %v3228_v44  ;;  %2831 = vadd.xlane.f32.xlu2 %v2830_v7  ;;  %2498 = vmax.xlane.f32.xlu0 %v2497_v59  ;;  %v2669_v31 = vmul.f32 1.442695, %v2566_v19  ;;  %v3250_v59 = vand.u32 2147483647, %v2787_v28  ;;  %v3252_v5 = vand.u32 2147483648, %v2787_v28 }
 0x4f5   : > { %v3891_v18 = vsel %vm2269_vm2, %v3225_v26, %v7324_v54 }
 0x4f6   : > { %3955 = vst.msk [vmem:[%s6114_s11 + $0xa0] sm:$0xff] %vm2334_vm3, %v3891_v18  ;;  %v3230_v3 = vadd.f32 %v4681_v15, %v3229_v53  ;;  %vm3251_vm11 = vcmp.eq.f32.partialorder %v3250_v59, 8.507059e+37 }
 0x4f7   : > { %v4685_v11 = vpop.eup %4684  ;;  %v2244_v43 = vpop.f32.mrf.mxu1 }
 0x4f8   : > { %v3234_v0 = vsel %vm3233_vm6, %v4681_v15, %v3230_v3  ;;  %v3242_v26 = vmul.f32 %v4685_v11, %v2787_v28  ;;  %v6663_v61 = vadd.f32 %v2244_v43, %v5595_v25  ;;  %v2457_v44 = vpop.xlane.xlu1 %2456  ;;  %vm3247_vm8 = vweird.f32 %v4685_v11 }
 0x4f9   : > { %v2790_v7 = vpop.xlane.xlu0 %2789  ;;  %v3239_v54 = vsel %vm3236_vm7, %v3238_v48, %v3234_v0  ;;  %v6665_v18 = vpop.eup %4686  ;;  %v2567_v0 = vsub.f32 %v6296_v33, %v2457_v44  ;;  %vm3248_vm10 = vmor %vm3246_vm9, %vm3247_vm8 }
 0x4fa   : > { %7325 = vst [vmem:[#allocation4_spill] sm:$0xff] %v6663_v61  ;;  %4688 = vrcp.f32 %v2790_v7  ;;  %v3240_v49 = vmul.f32 %v6230_v47, %v3239_v54  ;;  %v3243_v53 = vsub.f32 1.0, %v3242_v26  ;;  %v6671_v15 = vsel %vm2269_vm2, %v6663_v61, -inf }
 0x4fb   : > { %4690 = vpow2.f32 %v2669_v31  ;;  %v2833_v47 = vsel %vm2334_vm3, %v6665_v18, 0.0  ;;  %v2500_v48 = vsel %vm2334_vm3, %v6671_v15, -inf  ;;  %v3253_v26 = vor.u32 1.1754944e-38, %v3252_v5 }
 0x4fc   : > { %v3892_v19 = vsel %vm2269_vm2, %v3240_v49, %v7326_v10  ;;  %v3244_v3 = vmul.f32 %v4685_v11, %v3243_v53  ;;  %2834 = vadd.xlane.f32.xlu0 %v2833_v47  ;;  %2501 = vmax.xlane.f32.xlu1 %v2500_v48  ;;  %v2671_v53 = vmul.f32 1.442695, %v2567_v0  ;;  %v3265_v48 = vand.u32 2147483647, %v2790_v7  ;;  %v7328_v0 = vld [vmem:[#allocation11_spill] sm:$0xff] }
 0x4fd   : > { %3956 = vst.msk [vmem:[%s6114_s11 + $0xa8] sm:$0xff] %vm2334_vm3, %v3892_v19  ;;  %v3267_v59 = vand.u32 2147483648, %v2790_v7  ;;  %vm3261_vm13 = vweird.f32 %v2790_v7 }
 0x4fe   : > { %v3245_v31 = vadd.f32 %v4685_v11, %v3244_v3  ;;  %vm3266_vm15 = vcmp.eq.f32.partialorder %v3265_v48, 8.507059e+37  ;;  %v7330_v48 = vld [vmem:[#allocation12_spill] sm:$0xff] }
 0x4ff   : > { %v2247_v54 = vpop.f32.mrf.mxu1  ;;  %v2460_v10 = vpop.xlane.xlu2 %2459 }
 0x500   : > { %v4689_v43 = vpop.eup %4688  ;;  %v3249_v49 = vsel %vm3248_vm10, %v4685_v11, %v3245_v31  ;;  %v6684_v44 = vadd.f32 %v2247_v54, %v5595_v25  ;;  %v2793_v19 = vpop.xlane.xlu1 %2792  ;;  %v2568_v5 = vsub.f32 %v6326_v12, %v2460_v10 }
 0x501   : > { %v3257_v33 = vmul.f32 %v4689_v43, %v2790_v7  ;;  %v6686_v61 = vpop.eup %4690  ;;  %v3254_v3 = vsel %vm3251_vm11, %v3253_v26, %v3249_v49  ;;  %4692 = vrcp.f32 %v2793_v19  ;;  %vm3262_vm12 = vweird.f32 %v4689_v43 }
 0x502   : > { %7327 = vst [vmem:[#allocation27_spill] sm:$0xff] %v6684_v44  ;;  %v3255_v28 = vmul.f32 %v6257_v60, %v3254_v3  ;;  %v6693_v11 = vsel %vm2269_vm2, %v6684_v44, -inf  ;;  %4694 = vpow2.f32 %v2671_v53  ;;  %v2836_v12 = vsel %vm2334_vm3, %v6686_v61, 0.0  ;;  %vm3263_vm14 = vmor %vm3261_vm13, %vm3262_vm12 }
 0x503   : > { %v3258_v47 = vsub.f32 1.0, %v3257_v33  ;;  %v2503_v60 = vsel %vm2334_vm3, %v6693_v11, -inf  ;;  %v3268_v33 = vor.u32 1.1754944e-38, %v3267_v59  ;;  %v2673_v10 = vmul.f32 1.442695, %v2568_v5 }
 0x504   : > { %v3893_v31 = vsel %vm2269_vm2, %v3255_v28, %v7328_v0  ;;  %2504 = vmax.xlane.f32.xlu2 %v2503_v60  ;;  %2837 = vadd.xlane.f32.xlu1 %v2836_v12  ;;  %v3280_v59 = vand.u32 2147483647, %v2793_v19  ;;  %v3282_v5 = vand.u32 2147483648, %v2793_v19  ;;  %vm3276_vm1 = vweird.f32 %v2793_v19 }
 0x505   : > { %v3259_v54 = vmul.f32 %v4689_v43, %v3258_v47  ;;  %3957 = vst.msk [vmem:[%s6114_s11 + $0xb0] sm:$0xff] %vm2334_vm3, %v3893_v31 }
 0x506   : > { %vm3281_vm5 = vcmp.eq.f32.partialorder %v3280_v59, 8.507059e+37 }
 0x507   : > { %v3260_v26 = vadd.f32 %v4689_v43, %v3259_v54  ;;  %v4693_v49 = vpop.eup %4692  ;;  %v2249_v3 = vpop.f32.mrf.mxu1 }
 0x508   : > { %v3272_v28 = vmul.f32 %v4693_v49, %v2793_v19  ;;  %v6705_v47 = vadd.f32 %v2249_v3, %v5595_v25  ;;  %v2796_v0 = vpop.xlane.xlu2 %2795  ;;  %v2463_v31 = vpop.xlane.xlu0 %2462  ;;  %vm3277_vm0 = vweird.f32 %v4693_v49 }
 0x509   : > { %v3264_v53 = vsel %vm3263_vm14, %v4689_v43, %v3260_v26  ;;  %4696 = vrcp.f32 %v2796_v0  ;;  %v6707_v54 = vpop.eup %4694  ;;  %vm3278_vm4 = vmor %vm3276_vm1, %vm3277_vm0  ;;  %v3295_v59 = vand.u32 2147483647, %v2796_v0  ;;  %vm3291_vm7 = vweird.f32 %v2796_v0 }
 0x50a   : > { %7329 = vst [vmem:[#allocation5_spill] sm:$0xff] %v6705_v47  ;;  %v3269_v44 = vsel %vm3266_vm15, %v3268_v33, %v3264_v53  ;;  %v3273_v60 = vsub.f32 1.0, %v3272_v28  ;;  %4698 = vpow2.f32 %v2673_v10  ;;  %v6713_v43 = vsel %vm2269_vm2, %v6705_v47, -inf }
 0x50b   : > { %v3270_v7 = vmul.f32 %v6288_v46, %v3269_v44  ;;  %v2569_v33 = vsub.f32 %v6354_v51, %v2463_v31  ;;  %v2506_v46 = vsel %vm2334_vm3, %v6713_v43, -inf  ;;  %v2839_v44 = vsel %vm2334_vm3, %v6707_v54, 0.0 }
 0x50c   : > { %v3274_v26 = vmul.f32 %v4693_v49, %v3273_v60  ;;  %2507 = vmax.xlane.f32.xlu0 %v2506_v46  ;;  %2840 = vadd.xlane.f32.xlu2 %v2839_v44  ;;  %v3283_v53 = vor.u32 1.1754944e-38, %v3282_v5  ;;  %v3297_v5 = vand.u32 2147483648, %v2796_v0  ;;  %vm3296_vm9 = vcmp.eq.f32.partialorder %v3295_v59, 8.507059e+37 }
 0x50d   : > { %v3894_v12 = vsel %vm2269_vm2, %v3270_v7, %v7330_v48  ;;  %v2675_v51 = vmul.f32 1.442695, %v2569_v33  ;;  %v7332_v33 = vld [vmem:[#allocation13_spill] sm:$0xff] }
 0x50e   : > { %3958 = vst.msk [vmem:[%s6114_s11 + $0xb8] sm:$0xff] %vm2334_vm3, %v3894_v12  ;;  %v3275_v10 = vadd.f32 %v4693_v49, %v3274_v26 }
 0x50f   : > { %v4697_v3 = vpop.eup %4696  ;;  %v2252_v28 = vpop.f32.mrf.mxu1 }
 0x510   : > { %v3279_v7 = vsel %vm3278_vm4, %v4693_v49, %v3275_v10  ;;  %v3287_v60 = vmul.f32 %v4697_v3, %v2796_v0  ;;  %v6726_v31 = vadd.f32 %v2252_v28, %v5595_v25  ;;  %v6728_v48 = vpop.xlane.xlu1 %2465  ;;  %v2799_v12 = vpop.xlane.xlu0 %2798  ;;  %vm3292_vm6 = vweird.f32 %v4697_v3 }
 0x511   : > { %v6730_v47 = vpop.eup %4698  ;;  %v3284_v19 = vsel %vm3281_vm5, %v3283_v53, %v3279_v7  ;;  %4700 = vrcp.f32 %v2799_v12  ;;  %vm3293_vm8 = vmor %vm3291_vm7, %vm3292_vm6  ;;  %vm3306_vm11 = vweird.f32 %v2799_v12 }
 0x512   : > { %7331 = vst [vmem:[#allocation6_spill] sm:$0xff] %v6726_v31  ;;  %v3285_v26 = vmul.f32 %v6315_v13, %v3284_v19  ;;  %v3288_v46 = vsub.f32 1.0, %v3287_v60  ;;  %v6736_v49 = vsel %vm2269_vm2, %v6726_v31, -inf  ;;  %4702 = vpow2.f32 %v2675_v51 }
 0x513   : > { %v2842_v13 = vsel %vm2334_vm3, %v6730_v47, 0.0  ;;  %v2509_v53 = vsel %vm2334_vm3, %v6736_v49, -inf  ;;  %v3298_v60 = vor.u32 1.1754944e-38, %v3297_v5 }
 0x514   : > { %v3895_v44 = vsel %vm2269_vm2, %v3285_v26, %v7332_v33  ;;  %v3289_v10 = vmul.f32 %v4697_v3, %v3288_v46  ;;  %2843 = vadd.xlane.f32.xlu0 %v2842_v13  ;;  %2510 = vmax.xlane.f32.xlu1 %v2509_v53  ;;  %v3312_v53 = vand.u32 2147483648, %v2799_v12 }
 0x515   : > { %3959 = vst.msk [vmem:[%s6114_s11 + $0xc0] sm:$0xff] %vm2334_vm3, %v3895_v44 }
 0x516   : > { %v3290_v28 = vadd.f32 %v4697_v3, %v3289_v10 }
 0x517   : > { %v4701_v7 = vpop.eup %4700  ;;  %v2254_v19 = vpop.f32.mrf.mxu1 }
 0x518   : > { %v6747_v26 = vpop.xlane.xlu2 %2468  ;;  %v3294_v46 = vsel %vm3293_vm8, %v4697_v3, %v3290_v28  ;;  %v3302_v51 = vmul.f32 %v4701_v7, %v2799_v12  ;;  %v6750_v33 = vadd.f32 %v2254_v19, %v5595_v25  ;;  %v2802_v44 = vpop.xlane.xlu1 %2801  ;;  %v7335_v3 = vld [vmem:[#allocation14_spill] sm:$0xff]  ;;  %vm3307_vm10 = vweird.f32 %v4701_v7 }
 0x519   : > { %v3299_v31 = vsel %vm3296_vm9, %v3298_v60, %v3294_v46  ;;  %4704 = vrcp.f32 %v2802_v44  ;;  %v6752_v10 = vpop.eup %4702  ;;  %v3310_v19 = vand.u32 2147483647, %v2799_v12  ;;  %vm3308_vm12 = vmor %vm3306_vm11, %vm3307_vm10  ;;  %vm3321_vm15 = vweird.f32 %v2802_v44 }
 0x51a   : > { %7333 = vst [vmem:[#allocation7_spill] sm:$0xff] %v6750_v33  ;;  %v3300_v0 = vmul.f32 %v6346_v58, %v3299_v31  ;;  %v3303_v13 = vsub.f32 1.0, %v3302_v51  ;;  %v6758_v5 = vsel %vm2269_vm2, %v6750_v33, -inf  ;;  %v2845_v58 = vsel %vm2334_vm3, %v6752_v10, 0.0 }
 0x51b   : > { %7334 = vst [vmem:[#allocation8_spill] sm:$0xff] %v6752_v10  ;;  %v2512_v60 = vsel %vm2334_vm3, %v6758_v5, -inf  ;;  %v3313_v51 = vor.u32 1.1754944e-38, %v3312_v53  ;;  %vm3311_vm13 = vcmp.eq.f32.partialorder %v3310_v19, 8.507059e+37 }
 0x51c   : > { %v3896_v59 = vsel %vm2269_vm2, %v3300_v0, %v7335_v3  ;;  %v3304_v28 = vmul.f32 %v4701_v7, %v3303_v13  ;;  %2513 = vmax.xlane.f32.xlu2 %v2512_v60  ;;  %2846 = vadd.xlane.f32.xlu1 %v2845_v58  ;;  %v3325_v60 = vand.u32 2147483647, %v2802_v44  ;;  %v3327_v58 = vand.u32 2147483648, %v2802_v44 }
 0x51d   : > { %3960 = vst.msk [vmem:[%s6114_s11 + $0xc8] sm:$0xff] %vm2334_vm3, %v3896_v59 }
 0x51e   : > { %v3305_v31 = vadd.f32 %v4701_v7, %v3304_v28  ;;  %vm3326_vm1 = vcmp.eq.f32.partialorder %v3325_v60, 8.507059e+37  ;;  %v7339_v60 = vld [vmem:[#allocation16_spill] sm:$0xff] }
 0x51f   : > { %v4705_v46 = vpop.eup %4704  ;;  %v2257_v33 = vpop.f32.mrf.mxu1 }
 0x520   : > { %v2805_v0 = vpop.xlane.xlu2 %2804  ;;  %v3309_v13 = vsel %vm3308_vm12, %v4701_v7, %v3305_v31  ;;  %v3317_v3 = vmul.f32 %v4705_v46, %v2802_v44  ;;  %v6770_v59 = vadd.f32 %v2257_v33, %v5595_v25  ;;  %v2472_v21 = vpop.xlane.xlu0 %2471  ;;  %v7337_v7 = vld [vmem:[#allocation15_spill] sm:$0xff]  ;;  %vm3322_vm14 = vweird.f32 %v4705_v46 }
 0x521   : > { %v3314_v38 = vsel %vm3311_vm13, %v3313_v51, %v3309_v13  ;;  %4706 = vrcp.f32 %v2805_v0  ;;  %v2572_v33 = vsub.f32 %v6441_v14, %v2472_v21  ;;  %vm3323_vm0 = vmor %vm3321_vm15, %vm3322_vm14  ;;  %v3328_v13 = vor.u32 1.1754944e-38, %v3327_v58 }
 0x522   : > { %7336 = vst [vmem:[#allocation9_spill] sm:$0xff] %v6770_v59  ;;  %v3315_v28 = vmul.f32 %v6373_v56, %v3314_v38  ;;  %v3318_v12 = vsub.f32 1.0, %v3317_v3  ;;  %v6776_v53 = vsel %vm2269_vm2, %v6770_v59, -inf  ;;  %vm3336_vm5 = vweird.f32 %v2805_v0 }
 0x523   : > { %v2515_v56 = vsel %vm2334_vm3, %v6776_v53, -inf }
 0x524   : > { %v3897_v19 = vsel %vm2269_vm2, %v3315_v28, %v7337_v7  ;;  %v3319_v31 = vmul.f32 %v4705_v46, %v3318_v12  ;;  %2516 = vmax.xlane.f32.xlu0 %v2515_v56  ;;  %v2681_v28 = vmul.f32 1.442695, %v2572_v33  ;;  %v3342_v56 = vand.u32 2147483648, %v2805_v0 }
 0x525   : > { %3961 = vst.msk [vmem:[%s6114_s11 + $0xd0] sm:$0xff] %vm2334_vm3, %v3897_v19 }
 0x526   : > { %v3320_v38 = vadd.f32 %v4705_v46, %v3319_v31  ;;  %v3340_v31 = vand.u32 2147483647, %v2805_v0 }
 0x527   : > { %v4707_v51 = vpop.eup %4706  ;;  %v2259_v3 = vpop.f32.mrf.mxu1 }
 0x528   : > { %v3324_v59 = vsel %vm3323_vm0, %v4705_v46, %v3320_v38  ;;  %v3332_v10 = vmul.f32 %v4707_v51, %v2805_v0  ;;  %v6787_v12 = vadd.f32 %v2259_v3, %v5595_v25  ;;  %v6789_v14 = vpop.xlane.xlu1 %2474  ;;  %v2808_v21 = vpop.xlane.xlu0 %2807  ;;  %vm3337_vm4 = vweird.f32 %v4707_v51 }
 0x529   : > { %v3329_v7 = vsel %vm3326_vm1, %v3328_v13, %v3324_v59  ;;  %4708 = vrcp.f32 %v2808_v21  ;;  %vm3338_vm6 = vmor %vm3336_vm5, %vm3337_vm4  ;;  %v3343_v38 = vor.u32 1.1754944e-38, %v3342_v56  ;;  %vm3341_vm7 = vcmp.eq.f32.partialorder %v3340_v31, 8.507059e+37 }
 0x52a   : > { %7338 = vst [vmem:[#allocation10_spill] sm:$0xff] %v6787_v12  ;;  %v3330_v44 = vmul.f32 %v6404_v27, %v3329_v7  ;;  %v3333_v19 = vsub.f32 1.0, %v3332_v10  ;;  %v6795_v46 = vsel %vm2269_vm2, %v6787_v12, -inf  ;;  %4710 = vpow2.f32 %v2681_v28 }
 0x52b   : > { %v2518_v27 = vsel %vm2334_vm3, %v6795_v46, -inf  ;;  %v3355_v56 = vand.u32 2147483647, %v2808_v21  ;;  %vm3351_vm9 = vweird.f32 %v2808_v21 }
 0x52c   : > { %v3898_v58 = vsel %vm2269_vm2, %v3330_v44, %v7339_v60  ;;  %v3334_v33 = vmul.f32 %v4707_v51, %v3333_v19  ;;  %2519 = vmax.xlane.f32.xlu1 %v2518_v27  ;;  %v2570_v60 = vsub.f32 %v6384_v34, %v6728_v48  ;;  %v7340_v27 = vld [vmem:[#allocation17_spill] sm:$0xff]  ;;  %v2571_v48 = vsub.f32 %v6413_v2, %v6747_v26 }
 0x52d   : > { %3962 = vst.msk [vmem:[%s6114_s11 + $0xd8] sm:$0xff] %vm2334_vm3, %v3898_v58  ;;  %vm3356_vm11 = vcmp.eq.f32.partialorder %v3355_v56, 8.507059e+37 }
 0x52e   : > { %v3335_v10 = vadd.f32 %v4707_v51, %v3334_v33  ;;  %v3357_v33 = vand.u32 2147483648, %v2808_v21 }
 0x52f   : > { %v4709_v59 = vpop.eup %4708  ;;  %v6804_v7 = vpop.xlane.xlu2 %2477 }
 0x530   : > { %v3339_v13 = vsel %vm3338_vm6, %v4707_v51, %v3335_v10  ;;  %v3347_v3 = vmul.f32 %v4709_v59, %v2808_v21  ;;  %v2811_v44 = vpop.xlane.xlu1 %2810  ;;  %v6806_v28 = vpop.eup %4710  ;;  %vm3352_vm8 = vweird.f32 %v4709_v59 }
 0x531   : > { %v3344_v19 = vsel %vm3341_vm7, %v3343_v38, %v3339_v13  ;;  %4712 = vrcp.f32 %v2811_v44  ;;  %v2854_v10 = vsel %vm2334_vm3, %v6806_v28, 0.0  ;;  %v2677_v13 = vmul.f32 1.442695, %v2570_v60  ;;  %vm3353_vm10 = vmor %vm3351_vm9, %vm3352_vm8 }
 0x532   : > { %v3345_v0 = vmul.f32 %v6431_v41, %v3344_v19  ;;  %v3348_v58 = vsub.f32 1.0, %v3347_v3  ;;  %v3358_v3 = vor.u32 1.1754944e-38, %v3357_v33  ;;  %v2573_v60 = vsub.f32 %v6470_v50, %v6789_v14 }
 0x533   : > { %v3370_v33 = vand.u32 2147483647, %v2811_v44  ;;  %vm3366_vm13 = vweird.f32 %v2811_v44 }
 0x534   : > { %v3899_v51 = vsel %vm2269_vm2, %v3345_v0, %v7340_v27  ;;  %v3349_v31 = vmul.f32 %v4709_v59, %v3348_v58  ;;  %2855 = vadd.xlane.f32.xlu1 %v2854_v10  ;;  %v7341_v10 = vld [vmem:[#allocation18_spill] sm:$0xff] }
 0x535   : > { %3963 = vst.msk [vmem:[%s6114_s11 + $0xe0] sm:$0xff] %vm2334_vm3, %v3899_v51  ;;  %v2262_v38 = vpop.f32.mrf.mxu1  ;;  %vm3371_vm15 = vcmp.eq.f32.partialorder %v3370_v33, 8.507059e+37 }
 0x536   : > { %v3350_v12 = vadd.f32 %v4709_v59, %v3349_v31  ;;  %v6819_v34 = vadd.f32 %v2262_v38, %v5595_v25  ;;  %v3372_v31 = vand.u32 2147483648, %v2811_v44 }
 0x537   : > { %v4713_v41 = vpop.eup %4712  ;;  %v6823_v58 = vpop.xlane.xlu2 %2813 }
 0x538   : > { %v3354_v19 = vsel %vm3353_vm10, %v4709_v59, %v3350_v12  ;;  %v3362_v0 = vmul.f32 %v4713_v41, %v2811_v44  ;;  %v2481_v27 = vpop.xlane.xlu0 %2480  ;;  %v6828_v21 = vsel %vm2269_vm2, %v6819_v34, -inf  ;;  %4714 = vrcp.f32 %v6823_v58 }
 0x539   : > { %v3359_v51 = vsel %vm3356_vm11, %v3358_v3, %v3354_v19  ;;  %4716 = vpow2.f32 %v2677_v13  ;;  %v2575_v12 = vsub.f32 %v6520_v17, %v2481_v27  ;;  %v2679_v59 = vmul.f32 1.442695, %v2571_v48 }
 0x53a   : > { %v3360_v2 = vmul.f32 %v6459_v62, %v3359_v51  ;;  %v3363_v26 = vsub.f32 1.0, %v3362_v0  ;;  %v2521_v56 = vsel %vm2334_vm3, %v6828_v21, -inf  ;;  %vm3367_vm12 = vweird.f32 %v4713_v41 }
 0x53b   : > { %v2687_v38 = vmul.f32 1.442695, %v2575_v12  ;;  %2522 = vmax.xlane.f32.xlu2 %v2521_v56  ;;  %v2683_v13 = vmul.f32 1.442695, %v2573_v60  ;;  %v2574_v19 = vsub.f32 %v6496_v8, %v6804_v7  ;;  %vm3368_vm14 = vmor %vm3366_vm13, %vm3367_vm12  ;;  %v3373_v0 = vor.u32 1.1754944e-38, %v3372_v31 }
 0x53c   : > { %v3900_v50 = vsel %vm2269_vm2, %v3360_v2, %v7341_v10  ;;  %v3364_v14 = vmul.f32 %v4713_v41, %v3363_v26  ;;  %v7342_v10 = vld [vmem:[#allocation20_spill] sm:$0xff]  ;;  %vm3381_vm1 = vweird.f32 %v6823_v58 }
 0x53d   : > { %3964 = vst.msk [vmem:[%s6114_s11 + $0xe8] sm:$0xff] %vm2334_vm3, %v3900_v50  ;;  %v2264_v62 = vpop.f32.mrf.mxu1  ;;  %4718 = vpow2.f32 %v2687_v38  ;;  %v2685_v12 = vmul.f32 1.442695, %v2574_v19 }
 0x53e   : > { %v3365_v3 = vadd.f32 %v4713_v41, %v3364_v14  ;;  %v6843_v17 = vadd.f32 %v2264_v62, %v5595_v25  ;;  %v4715_v48 = vpop.eup %4714  ;;  %4720 = vpow2.f32 %v2679_v59  ;;  %v3387_v59 = vand.u32 2147483648, %v6823_v58 }
 0x53f   : > { %v6847_v27 = vpop.eup %4716  ;;  %v3377_v60 = vmul.f32 %v4715_v48, %v6823_v58  ;;  %v2484_v2 = vpop.xlane.xlu1 %2483  ;;  %vm3382_vm0 = vweird.f32 %v4715_v48 }
 0x540   : > { %v3369_v51 = vsel %vm3368_vm14, %v4713_v41, %v3365_v3  ;;  %v6850_v26 = vpop.xlane.xlu0 %2816  ;;  %v6855_v25 = vsel %vm2269_vm2, %v6843_v17, -inf  ;;  %v2576_v41 = vsub.f32 %v6545_v1, %v2484_v2  ;;  %v2848_v31 = vsel %vm2334_vm3, %v6847_v27, 0.0  ;;  %vm3383_vm4 = vmor %vm3381_vm1, %vm3382_vm0 }
 0x541   : > { %v3374_v44 = vsel %vm3371_vm15, %v3373_v0, %v3369_v51  ;;  %4722 = vrcp.f32 %v6850_v26  ;;  %v3378_v7 = vsub.f32 1.0, %v3377_v60  ;;  %v2524_v33 = vsel %vm2334_vm3, %v6855_v25, -inf }
 0x542   : > { %4724 = vpow2.f32 %v2683_v13  ;;  %v3375_v8 = vmul.f32 %v6487_v55, %v3374_v44  ;;  %v3385_v55 = vand.u32 2147483647, %v6823_v58  ;;  %2525 = vmax.xlane.f32.xlu0 %v2524_v33  ;;  %v2689_v62 = vmul.f32 1.442695, %v2576_v41 }
 0x543   : > { %v6865_v56 = vpop.eup %4718  ;;  %v3379_v14 = vmul.f32 %v4715_v48, %v3378_v7  ;;  %2849 = vadd.xlane.f32.xlu2 %v2848_v31  ;;  %v3388_v19 = vor.u32 1.1754944e-38, %v3387_v59  ;;  %4726 = vpow2.f32 %v2685_v12  ;;  %v3402_v59 = vand.u32 2147483648, %v6850_v26  ;;  %v7343_v12 = vld [vmem:[#allocation22_spill] sm:$0xff] }
 0x544   : > { %v3901_v50 = vsel %vm2269_vm2, %v3375_v8, %v7342_v10  ;;  %v6871_v1 = vpop.eup %4720  ;;  %v2863_v38 = vsel %vm2334_vm3, %v6865_v56, 0.0  ;;  %vm3386_vm5 = vcmp.eq.f32.partialorder %v3385_v55, 8.507059e+37  ;;  %vm3396_vm7 = vweird.f32 %v6850_v26 }
 0x545   : > { %3965 = vst.msk [vmem:[%s6114_s11 + $0xf0] sm:$0xff] %vm2334_vm3, %v3901_v50  ;;  %v3380_v13 = vadd.f32 %v4715_v48, %v3379_v14  ;;  %2864 = vadd.xlane.f32.xlu1 %v2863_v38  ;;  %v2851_v33 = vsel %vm2334_vm3, %v6871_v1, 0.0 }
 0x547   : > { %v4723_v3 = vpop.eup %4722  ;;  %v2487_v0 = vpop.xlane.xlu2 %2486  ;;  %v3384_v60 = vsel %vm3383_vm4, %v4715_v48, %v3380_v13  ;;  %v3403_v13 = vor.u32 1.1754944e-38, %v3402_v59 }
 0x548   : > { %v6878_v51 = vpop.eup %4724  ;;  %v3392_v2 = vmul.f32 %v4723_v3, %v6850_v26  ;;  %v2820_v44 = vpop.xlane.xlu1 %2819  ;;  %v3389_v8 = vsel %vm3386_vm5, %v3388_v19, %v3384_v60  ;;  %v2577_v41 = vsub.f32 %v6567_v45, %v2487_v0  ;;  %vm3397_vm6 = vweird.f32 %v4723_v3 }
 0x549   : > { %4728 = vrcp.f32 %v2820_v44  ;;  %v3390_v7 = vmul.f32 %v6514_v37, %v3389_v8  ;;  %v2857_v48 = vsel %vm2334_vm3, %v6878_v51, 0.0  ;;  %v3400_v37 = vand.u32 2147483647, %v6850_v26  ;;  %v6894_v45 = vpop.eup %4726  ;;  %vm3398_vm8 = vmor %vm3396_vm7, %vm3397_vm6 }
 0x54a   : > { %4730 = vpow2.f32 %v2689_v62  ;;  %v3393_v58 = vsub.f32 1.0, %v3392_v2  ;;  %2852 = vadd.xlane.f32.xlu0 %v2851_v33  ;;  %v2691_v14 = vmul.f32 1.442695, %v2577_v41  ;;  %v3415_v41 = vand.u32 2147483647, %v2820_v44 }
 0x54b   : > { %v3902_v31 = vsel %vm2269_vm2, %v3390_v7, %v7343_v12  ;;  %2858 = vadd.xlane.f32.xlu2 %v2857_v48  ;;  %vm3401_vm9 = vcmp.eq.f32.partialorder %v3400_v37, 8.507059e+37  ;;  %v3417_v33 = vand.u32 2147483648, %v2820_v44  ;;  %v2860_v59 = vsel %vm2334_vm3, %v6894_v45, 0.0  ;;  %v7344_v48 = vld [vmem:[#allocation25_spill] sm:$0xff] }
 0x54c   : > { %v3394_v10 = vmul.f32 %v4723_v3, %v3393_v58  ;;  %3966 = vst.msk [vmem:[%s6114_s11 + $0xf8] sm:$0xff] %vm2334_vm3, %v3902_v31  ;;  %vm3411_vm11 = vweird.f32 %v2820_v44  ;;  %vm3416_vm13 = vcmp.eq.f32.partialorder %v3415_v41, 8.507059e+37  ;;  %v7345_v41 = vld [vmem:[#allocation28_spill] sm:$0xff] }
 0x54d   : > { %v3418_v37 = vor.u32 1.1754944e-38, %v3417_v33 }
 0x54e   : > { %v3395_v50 = vadd.f32 %v4723_v3, %v3394_v10 }
 0x54f   : > { %v2490_v55 = vpop.xlane.xlu0 %2489  ;;  %v4729_v38 = vpop.eup %4728 }
 0x550   : > { %v2823_v62 = vpop.xlane.xlu2 %2822  ;;  %v2578_v19 = vsub.f32 %v6587_v23, %v2490_v55  ;;  %v6898_v0 = vpop.eup %4730  ;;  %v3399_v60 = vsel %vm3398_vm8, %v4723_v3, %v3395_v50  ;;  %v3407_v2 = vmul.f32 %v4729_v38, %v2820_v44  ;;  %vm3412_vm10 = vweird.f32 %v4729_v38 }
 0x551   : > { %4732 = vrcp.f32 %v2823_v62  ;;  %v3404_v8 = vsel %vm3401_vm9, %v3403_v13, %v3399_v60  ;;  %v2866_v23 = vsel %vm2334_vm3, %v6898_v0, 0.0  ;;  %vm3413_vm12 = vmor %vm3411_vm11, %vm3412_vm10  ;;  %vm3426_vm15 = vweird.f32 %v2823_v62 }
 0x552   : > { %v3405_v7 = vmul.f32 %v6536_v52, %v3404_v8  ;;  %4734 = vpow2.f32 %v2691_v14  ;;  %v3408_v26 = vsub.f32 1.0, %v3407_v2  ;;  %v2693_v58 = vmul.f32 1.442695, %v2578_v19  ;;  %2861 = vadd.xlane.f32.xlu0 %v2860_v59 }
 0x553   : > { %2867 = vadd.xlane.f32.xlu2 %v2866_v23 }
 0x554   : > { %v3903_v3 = vsel %vm2269_vm2, %v3405_v7, %v7344_v48  ;;  %v3409_v12 = vmul.f32 %v4729_v38, %v3408_v26  ;;  %4736 = vpow2.f32 %v2693_v58  ;;  %v3430_v7 = vand.u32 2147483647, %v2823_v62 }
 0x555   : > { %3967 = vst.msk [vmem:[%s6114_s11 + $0x100] sm:$0xff] %vm2334_vm3, %v3903_v3  ;;  %v3432_v26 = vand.u32 2147483648, %v2823_v62 }
 0x556   : > { %v3410_v31 = vadd.f32 %v4729_v38, %v3409_v12  ;;  %vm3431_vm1 = vcmp.eq.f32.partialorder %v3430_v7, 8.507059e+37 }
 0x557   : > { %v4733_v52 = vpop.eup %4732  ;;  %v2826_v10 = vpop.xlane.xlu0 %2825 }
 0x558   : > { %v3422_v50 = vmul.f32 %v4733_v52, %v2823_v62  ;;  %4738 = vrcp.f32 %v2826_v10  ;;  %v6910_v14 = vpop.eup %4734  ;;  %v3414_v55 = vsel %vm3413_vm12, %v4729_v38, %v3410_v31  ;;  %v2493_v60 = vpop.xlane.xlu1 %2492  ;;  %vm3427_vm14 = vweird.f32 %v4733_v52 }
 0x559   : > { %v3419_v13 = vsel %vm3416_vm13, %v3418_v37, %v3414_v55  ;;  %v2579_v44 = vsub.f32 %v6611_v32, %v2493_v60  ;;  %v2869_v33 = vsel %vm2334_vm3, %v6910_v14, 0.0  ;;  %vm3428_vm0 = vmor %vm3426_vm15, %vm3427_vm14  ;;  %v3433_v32 = vor.u32 1.1754944e-38, %v3432_v26 }
 0x55a   : > { %v3423_v19 = vsub.f32 1.0, %v3422_v50  ;;  %v6912_v2 = vpop.eup %4736  ;;  %v3420_v8 = vmul.f32 %v6561_v63, %v3419_v13  ;;  %2870 = vadd.xlane.f32.xlu0 %v2869_v33  ;;  %v3447_v60 = vand.u32 2147483648, %v2826_v10  ;;  %vm3441_vm5 = vweird.f32 %v2826_v10 }
 0x55b   : > { %v2872_v38 = vsel %vm2334_vm3, %v6912_v2, 0.0  ;;  %v2695_v23 = vmul.f32 1.442695, %v2579_v44 }
 0x55c   : > { %v3424_v58 = vmul.f32 %v4733_v52, %v3423_v19  ;;  %v3904_v59 = vsel %vm2269_vm2, %v3420_v8, %v7345_v41  ;;  %2873 = vadd.xlane.f32.xlu1 %v2872_v38  ;;  %v3445_v19 = vand.u32 2147483647, %v2826_v10 }
 0x55d   : > { %3968 = vst.msk [vmem:[%s6114_s11 + $0x108] sm:$0xff] %vm2334_vm3, %v3904_v59  ;;  %4740 = vpow2.f32 %v2695_v23 }
 0x55e   : > { %v4739_v63 = vpop.eup %4738  ;;  %v3425_v48 = vadd.f32 %v4733_v52, %v3424_v58  ;;  %vm3446_vm7 = vcmp.eq.f32.partialorder %v3445_v19, 8.507059e+37 }
 0x55f   : > { %v3437_v3 = vmul.f32 %v4739_v63, %v2826_v10  ;;  %v2496_v31 = vpop.xlane.xlu2 %2495  ;;  %vm3442_vm4 = vweird.f32 %v4739_v63 }
 0x560   : > { %v3429_v12 = vsel %vm3428_vm0, %v4733_v52, %v3425_v48  ;;  %v2580_v55 = vsub.f32 %v6632_v20, %v2496_v31  ;;  %v2829_v8 = vpop.xlane.xlu1 %2828  ;;  %vm3443_vm6 = vmor %vm3441_vm5, %vm3442_vm4 }
 0x561   : > { %v3434_v37 = vsel %vm3431_vm1, %v3433_v32, %v3429_v12  ;;  %v3438_v50 = vsub.f32 1.0, %v3437_v3  ;;  %4742 = vrcp.f32 %v2829_v8  ;;  %v3462_v12 = vand.u32 2147483648, %v2829_v8 }
 0x562   : > { %v3435_v13 = vmul.f32 %v6581_v35, %v3434_v37  ;;  %v2697_v62 = vmul.f32 1.442695, %v2580_v55  ;;  %v3448_v35 = vor.u32 1.1754944e-38, %v3447_v60  ;;  %v3460_v37 = vand.u32 2147483647, %v2829_v8 }
 0x563   : > { %v3439_v44 = vmul.f32 %v4739_v63, %v3438_v50  ;;  %v6930_v26 = vpop.eup %4740  ;;  %vm3456_vm9 = vweird.f32 %v2829_v8 }
 0x564   : > { %v3905_v52 = vsel %vm2269_vm2, %v3435_v13, %v6104_v22  ;;  %4744 = vpow2.f32 %v2697_v62  ;;  %v2875_v20 = vsel %vm2334_vm3, %v6930_v26, 0.0  ;;  %vm3461_vm11 = vcmp.eq.f32.partialorder %v3460_v37, 8.507059e+37 }
 0x565   : > { %3969 = vst.msk [vmem:[%s6114_s11 + $0x110] sm:$0xff] %vm2334_vm3, %v3905_v52  ;;  %v3440_v7 = vadd.f32 %v4739_v63, %v3439_v44  ;;  %2876 = vadd.xlane.f32.xlu2 %v2875_v20 }
 0x567   : > { %v3444_v58 = vsel %vm3443_vm6, %v4739_v63, %v3440_v7  ;;  %v2832_v38 = vpop.xlane.xlu2 %2831  ;;  %v4743_v41 = vpop.eup %4742 }
 0x568   : > { %v3449_v33 = vsel %vm3446_vm7, %v3448_v35, %v3444_v58  ;;  %4746 = vrcp.f32 %v2832_v38  ;;  %v3452_v59 = vmul.f32 %v4743_v41, %v2829_v8  ;;  %v2499_v23 = vpop.xlane.xlu0 %2498  ;;  %vm3457_vm8 = vweird.f32 %v4743_v41 }
 0x569   : > { %v3450_v22 = vmul.f32 %v6599_v57, %v3449_v33  ;;  %v2581_v32 = vsub.f32 %v6651_v36, %v2499_v23  ;;  %vm3458_vm10 = vmor %vm3456_vm9, %vm3457_vm8  ;;  %v3477_v52 = vand.u32 2147483648, %v2832_v38  ;;  %v3475_v58 = vand.u32 2147483647, %v2832_v38 }
 0x56a   : > { %v6937_v48 = vpop.eup %4744  ;;  %v3453_v63 = vsub.f32 1.0, %v3452_v59  ;;  %vm3471_vm13 = vweird.f32 %v2832_v38 }
 0x56b   : > { %v3906_v10 = vsel %vm2269_vm2, %v3450_v22, %v6139_v42  ;;  %v2878_v3 = vsel %vm2334_vm3, %v6937_v48, 0.0  ;;  %v2699_v31 = vmul.f32 1.442695, %v2581_v32  ;;  %v3463_v42 = vor.u32 1.1754944e-38, %v3462_v12 }
 0x56c   : > { %3970 = vst.msk [vmem:[%s6114_s11 + $0x118] sm:$0xff] %vm2334_vm3, %v3906_v10  ;;  %2879 = vadd.xlane.f32.xlu0 %v2878_v3  ;;  %v3454_v57 = vmul.f32 %v4743_v41, %v3453_v63  ;;  %v3478_v59 = vor.u32 1.1754944e-38, %v3477_v52  ;;  %vm3476_vm15 = vcmp.eq.f32.partialorder %v3475_v58, 8.507059e+37 }
 0x56d   : > { %4748 = vpow2.f32 %v2699_v31 }
 0x56e   : > { %v4747_v50 = vpop.eup %4746  ;;  %v3455_v55 = vadd.f32 %v4743_v41, %v3454_v57 }
 0x56f   : > { %v3467_v13 = vmul.f32 %v4747_v50, %v2832_v38  ;;  %v2502_v60 = vpop.xlane.xlu1 %2501  ;;  %vm3472_vm12 = vweird.f32 %v4747_v50 }
 0x570   : > { %v3459_v36 = vsel %vm3458_vm10, %v4743_v41, %v3455_v55  ;;  %v2835_v44 = vpop.xlane.xlu0 %2834  ;;  %v2582_v7 = vsub.f32 %v6671_v15, %v2502_v60  ;;  %vm3473_vm14 = vmor %vm3471_vm13, %vm3472_vm12 }
 0x571   : > { %v3468_v19 = vsub.f32 1.0, %v3467_v13  ;;  %v3464_v62 = vsel %vm3461_vm11, %v3463_v42, %v3459_v36  ;;  %4750 = vrcp.f32 %v2835_v44  ;;  %v3492_v37 = vand.u32 2147483648, %v2835_v44 }
 0x572   : > { %v3465_v35 = vmul.f32 %v6624_v39, %v3464_v62  ;;  %v2701_v33 = vmul.f32 1.442695, %v2582_v7  ;;  %vm3486_vm1 = vweird.f32 %v2835_v44 }
 0x573   : > { %v3469_v20 = vmul.f32 %v4747_v50, %v3468_v19  ;;  %v6949_v8 = vpop.eup %4748 }
 0x574   : > { %v3907_v41 = vsel %vm2269_vm2, %v3465_v35, %v6171_v40  ;;  %4752 = vpow2.f32 %v2701_v33  ;;  %v2881_v39 = vsel %vm2334_vm3, %v6949_v8, 0.0 }
 0x575   : > { %v3470_v22 = vadd.f32 %v4747_v50, %v3469_v20  ;;  %3971 = vst.msk [vmem:[%s6114_s11 + $0x120] sm:$0xff] %vm2334_vm3, %v3907_v41  ;;  %2882 = vadd.xlane.f32.xlu1 %v2881_v39 }
 0x577   : > { %v3474_v15 = vsel %vm3473_vm14, %v4747_v50, %v3470_v22  ;;  %v4751_v23 = vpop.eup %4750  ;;  %v2505_v40 = vpop.xlane.xlu2 %2504 }
 0x578   : > { %v3479_v10 = vsel %vm3476_vm15, %v3478_v59, %v3474_v15  ;;  %v3482_v63 = vmul.f32 %v4751_v23, %v2835_v44  ;;  %v2838_v3 = vpop.xlane.xlu1 %2837  ;;  %v2583_v38 = vsub.f32 %v6693_v11, %v2505_v40  ;;  %vm3487_vm0 = vweird.f32 %v4751_v23 }
 0x579   : > { %v3480_v32 = vmul.f32 %v6641_v29, %v3479_v10  ;;  %4754 = vrcp.f32 %v2838_v3  ;;  %v3490_v29 = vand.u32 2147483647, %v2835_v44  ;;  %vm3488_vm4 = vmor %vm3486_vm1, %vm3487_vm0  ;;  %v3505_v33 = vand.u32 2147483647, %v2838_v3 }
 0x57a   : > { %v3483_v31 = vsub.f32 1.0, %v3482_v63  ;;  %v6963_v57 = vpop.eup %4752  ;;  %v2703_v50 = vmul.f32 1.442695, %v2583_v38  ;;  %v3507_v44 = vand.u32 2147483648, %v2838_v3  ;;  %vm3501_vm7 = vweird.f32 %v2838_v3 }
 0x57b   : > { %v3908_v12 = vsel %vm2269_vm2, %v3480_v32, %v6195_v4  ;;  %v2884_v13 = vsel %vm2334_vm3, %v6963_v57, 0.0  ;;  %v3493_v4 = vor.u32 1.1754944e-38, %v3492_v37  ;;  %vm3491_vm5 = vcmp.eq.f32.partialorder %v3490_v29, 8.507059e+37 }
 0x57c   : > { %3972 = vst.msk [vmem:[%s6114_s11 + $0x128] sm:$0xff] %vm2334_vm3, %v3908_v12  ;;  %v3484_v55 = vmul.f32 %v4751_v23, %v3483_v31  ;;  %4756 = vpow2.f32 %v2703_v50  ;;  %2885 = vadd.xlane.f32.xlu2 %v2884_v13  ;;  %v3508_v15 = vor.u32 1.1754944e-38, %v3507_v44  ;;  %vm3506_vm9 = vcmp.eq.f32.partialorder %v3505_v33, 8.507059e+37 }
 0x57e   : > { %v3485_v11 = vadd.f32 %v4751_v23, %v3484_v55 }
 0x57f   : > { %v4755_v42 = vpop.eup %4754  ;;  %v2841_v60 = vpop.xlane.xlu2 %2840 }
 0x580   : > { %v3489_v36 = vsel %vm3488_vm4, %v4751_v23, %v3485_v11  ;;  %v3497_v19 = vmul.f32 %v4755_v42, %v2838_v3  ;;  %v2508_v62 = vpop.xlane.xlu0 %2507  ;;  %4758 = vrcp.f32 %v2841_v60  ;;  %vm3502_vm6 = vweird.f32 %v4755_v42 }
 0x581   : > { %v3494_v52 = vsel %vm3491_vm5, %v3493_v4, %v3489_v36  ;;  %v2584_v20 = vsub.f32 %v6713_v43, %v2508_v62  ;;  %vm3503_vm8 = vmor %vm3501_vm7, %vm3502_vm6  ;;  %v3522_v31 = vand.u32 2147483648, %v2841_v60  ;;  %v3520_v29 = vand.u32 2147483647, %v2841_v60 }
 0x582   : > { %v3495_v7 = vmul.f32 %v6665_v18, %v3494_v52  ;;  %v3498_v35 = vsub.f32 1.0, %v3497_v19  ;;  %v6971_v58 = vpop.eup %4756  ;;  %vm3516_vm11 = vweird.f32 %v2841_v60 }
 0x583   : > { %v2705_v59 = vmul.f32 1.442695, %v2584_v20  ;;  %v2887_v39 = vsel %vm2334_vm3, %v6971_v58, 0.0  ;;  %v3523_v11 = vor.u32 1.1754944e-38, %v3522_v31  ;;  %vm3521_vm13 = vcmp.eq.f32.partialorder %v3520_v29, 8.507059e+37  ;;  %v7346_v29 = vld [vmem:[#allocation8_spill] sm:$0xff] }
 0x584   : > { %v3909_v41 = vsel %vm2269_vm2, %v3495_v7, %v6225_v9  ;;  %v3499_v22 = vmul.f32 %v4755_v42, %v3498_v35  ;;  %2888 = vadd.xlane.f32.xlu0 %v2887_v39 }
 0x585   : > { %3973 = vst.msk [vmem:[%s6114_s11 + $0x130] sm:$0xff] %vm2334_vm3, %v3909_v41  ;;  %4760 = vpow2.f32 %v2705_v59 }
 0x586   : > { %v3500_v18 = vadd.f32 %v4755_v42, %v3499_v22  ;;  %v4759_v43 = vpop.eup %4758 }
 0x587   : > { %v3512_v10 = vmul.f32 %v4759_v43, %v2841_v60  ;;  %v2511_v9 = vpop.xlane.xlu1 %2510  ;;  %vm3517_vm10 = vweird.f32 %v4759_v43 }
 0x588   : > { %v3504_v23 = vsel %vm3503_vm8, %v4755_v42, %v3500_v18  ;;  %v2844_v32 = vpop.xlane.xlu0 %2843  ;;  %v2585_v40 = vsub.f32 %v6736_v49, %v2511_v9  ;;  %vm3518_vm12 = vmor %vm3516_vm11, %vm3517_vm10 }
 0x589   : > { %v3509_v63 = vsel %vm3506_vm9, %v3508_v15, %v3504_v23  ;;  %4762 = vrcp.f32 %v2844_v32  ;;  %v3513_v12 = vsub.f32 1.0, %v3512_v10  ;;  %v3537_v60 = vand.u32 2147483648, %v2844_v32 }
 0x58a   : > { %v3510_v38 = vmul.f32 %v6686_v61, %v3509_v63  ;;  %v2707_v3 = vmul.f32 1.442695, %v2585_v40  ;;  %v3535_v41 = vand.u32 2147483647, %v2844_v32  ;;  %vm3531_vm15 = vweird.f32 %v2844_v32 }
 0x58b   : > { %v6982_v37 = vpop.eup %4760  ;;  %v3514_v55 = vmul.f32 %v4759_v43, %v3513_v12  ;;  %v3538_v59 = vor.u32 1.1754944e-38, %v3537_v60 }
 0x58c   : > { %v3910_v50 = vsel %vm2269_vm2, %v3510_v38, %v6255_v6  ;;  %4764 = vpow2.f32 %v2707_v3  ;;  %v2890_v49 = vsel %vm2334_vm3, %v6982_v37, 0.0  ;;  %vm3536_vm1 = vcmp.eq.f32.partialorder %v3535_v41, 8.507059e+37 }
 0x58d   : > { %3974 = vst.msk [vmem:[%s6114_s11 + $0x138] sm:$0xff] %vm2334_vm3, %v3910_v50  ;;  %v3515_v13 = vadd.f32 %v4759_v43, %v3514_v55  ;;  %2891 = vadd.xlane.f32.xlu1 %v2890_v49 }
 0x58f   : > { %v4763_v61 = vpop.eup %4762  ;;  %v3519_v42 = vsel %vm3518_vm12, %v4759_v43, %v3515_v13  ;;  %v2514_v6 = vpop.xlane.xlu2 %2513 }
 0x590   : > { %v3527_v4 = vmul.f32 %v4763_v61, %v2844_v32  ;;  %v2847_v36 = vpop.xlane.xlu1 %2846  ;;  %v3524_v19 = vsel %vm3521_vm13, %v3523_v11, %v3519_v42  ;;  %v2586_v62 = vsub.f32 %v6758_v5, %v2514_v6  ;;  %vm3532_vm14 = vweird.f32 %v4763_v61  ;;  %v7347_v11 = vld [vmem:[#allocation30_spill] sm:$0xff] }
 0x591   : > { %4766 = vrcp.f32 %v2847_v36  ;;  %v3525_v52 = vmul.f32 %v6707_v54, %v3524_v19  ;;  %vm3533_vm0 = vmor %vm3531_vm15, %vm3532_vm14  ;;  %v3550_v63 = vand.u32 2147483647, %v2847_v36  ;;  %v3552_v40 = vand.u32 2147483648, %v2847_v36 }
 0x592   : > { %v3528_v7 = vsub.f32 1.0, %v3527_v4  ;;  %v6993_v35 = vpop.eup %4764  ;;  %v2709_v20 = vmul.f32 1.442695, %v2586_v62  ;;  %vm3546_vm5 = vweird.f32 %v2847_v36 }
 0x593   : > { %v3911_v33 = vsel %vm2269_vm2, %v3525_v52, %v6283_v30  ;;  %v2893_v5 = vsel %vm2334_vm3, %v6993_v35, 0.0  ;;  %vm3551_vm7 = vcmp.eq.f32.partialorder %v3550_v63, 8.507059e+37  ;;  %v7348_v63 = vld [vmem:[#allocation33_spill] sm:$0xff] }
 0x594   : > { %v3529_v44 = vmul.f32 %v4763_v61, %v3528_v7  ;;  %3975 = vst.msk [vmem:[%s6114_s11 + $0x140] sm:$0xff] %vm2334_vm3, %v3911_v33  ;;  %4768 = vpow2.f32 %v2709_v20  ;;  %2894 = vadd.xlane.f32.xlu2 %v2893_v5 }
 0x596   : > { %v3530_v22 = vadd.f32 %v4763_v61, %v3529_v44 }
 0x597   : > { %v4767_v54 = vpop.eup %4766  ;;  %v2517_v30 = vpop.xlane.xlu0 %2516 }
 0x598   : > { %v3534_v39 = vsel %vm3533_vm0, %v4763_v61, %v3530_v22  ;;  %v3542_v18 = vmul.f32 %v4767_v54, %v2847_v36  ;;  %v2587_v15 = vsub.f32 %v6776_v53, %v2517_v30  ;;  %vm3547_vm4 = vweird.f32 %v4767_v54 }
 0x599   : > { %v3539_v43 = vsel %vm3536_vm1, %v3538_v59, %v3534_v39  ;;  %vm3548_vm6 = vmor %vm3546_vm5, %vm3547_vm4  ;;  %v3553_v53 = vor.u32 1.1754944e-38, %v3552_v40 }
 0x59a   : > { %v3540_v23 = vmul.f32 %v6730_v47, %v3539_v43  ;;  %v3543_v10 = vsub.f32 1.0, %v3542_v18  ;;  %v7004_v9 = vpop.eup %4768  ;;  %v2711_v32 = vmul.f32 1.442695, %v2587_v15 }
 0x59b   : > { %v2896_v31 = vsel %vm2334_vm3, %v7004_v9, 0.0 }
 0x59c   : > { %v3912_v38 = vsel %vm2269_vm2, %v3540_v23, %v6311_v24  ;;  %v3544_v12 = vmul.f32 %v4767_v54, %v3543_v10  ;;  %4770 = vpow2.f32 %v2711_v32  ;;  %2897 = vadd.xlane.f32.xlu0 %v2896_v31 }
 0x59d   : > { %3976 = vst.msk [vmem:[%s6114_s11 + $0x148] sm:$0xff] %vm2334_vm3, %v3912_v38 }
 0x59e   : > { %v3545_v47 = vadd.f32 %v4767_v54, %v3544_v12 }
 0x59f   : > { %v2520_v50 = vpop.xlane.xlu1 %2519 }
 0x5a0   : > { %v3549_v3 = vsel %vm3548_vm6, %v4767_v54, %v3545_v47  ;;  %v2588_v24 = vsub.f32 %v6795_v46, %v2520_v50 }
 0x5a1   : > { %v3554_v55 = vsel %vm3551_vm7, %v3553_v53, %v3549_v3 }
 0x5a2   : > { %v3555_v49 = vmul.f32 %v7346_v29, %v3554_v55  ;;  %v7015_v13 = vpop.eup %4770  ;;  %v2713_v61 = vmul.f32 1.442695, %v2588_v24 }
 0x5a3   : > { %v2899_v4 = vsel %vm2334_vm3, %v7015_v13, 0.0 }
 0x5a4   : > { %v3913_v42 = vsel %vm2269_vm2, %v3555_v49, %v7347_v11  ;;  %4772 = vpow2.f32 %v2713_v61  ;;  %2900 = vadd.xlane.f32.xlu1 %v2899_v4 }
 0x5a5   : > { %3977 = vst.msk [vmem:[%s6114_s11 + $0x150] sm:$0xff] %vm2334_vm3, %v3913_v42 }
 0x5a7   : > { %v2856_v6 = vpop.xlane.xlu1 %2855 }
 0x5a8   : > { %4774 = vrcp.f32 %v2856_v6  ;;  %v3597_v33 = vand.u32 2147483648, %v2856_v6  ;;  %v3595_v41 = vand.u32 2147483647, %v2856_v6  ;;  %vm3591_vm9 = vweird.f32 %v2856_v6 }
 0x5aa   : > { %v7024_v36 = vpop.eup %4772  ;;  %v3598_v59 = vor.u32 1.1754944e-38, %v3597_v33  ;;  %vm3596_vm11 = vcmp.eq.f32.partialorder %v3595_v41, 8.507059e+37 }
 0x5ab   : > { %v2902_v46 = vsel %vm2334_vm3, %v7024_v36, 0.0 }
 0x5ac   : > { %2903 = vadd.xlane.f32.xlu2 %v2902_v46 }
 0x5ae   : > { %v2523_v19 = vpop.xlane.xlu2 %2522  ;;  %v4775_v62 = vpop.eup %4774 }
 0x5af   : > { %v2589_v52 = vsub.f32 %v6828_v21, %v2523_v19  ;;  %v3587_v7 = vmul.f32 %v4775_v62, %v2856_v6  ;;  %vm3592_vm8 = vweird.f32 %v4775_v62 }
 0x5b0   : > { %vm3593_vm10 = vmor %vm3591_vm9, %vm3592_vm8 }
 0x5b1   : > { %v2715_v60 = vmul.f32 1.442695, %v2589_v52  ;;  %v3588_v20 = vsub.f32 1.0, %v3587_v7 }
 0x5b3   : > { %4776 = vpow2.f32 %v2715_v60  ;;  %v3589_v44 = vmul.f32 %v4775_v62, %v3588_v20 }
 0x5b5   : > { %v3590_v5 = vadd.f32 %v4775_v62, %v3589_v44  ;;  %v2526_v54 = vpop.xlane.xlu0 %2525 }
 0x5b6   : > { %v2850_v22 = vpop.xlane.xlu2 %2849  ;;  %v2590_v21 = vsub.f32 %v6855_v25, %v2526_v54 }
 0x5b7   : > { %4778 = vrcp.f32 %v2850_v22  ;;  %v3594_v39 = vsel %vm3593_vm10, %v4775_v62, %v3590_v5  ;;  %v3565_v53 = vand.u32 2147483647, %v2850_v22  ;;  %v3567_v3 = vand.u32 2147483648, %v2850_v22 }
 0x5b8   : > { %v2865_v18 = vpop.xlane.xlu1 %2864  ;;  %v3599_v43 = vsel %vm3596_vm11, %v3598_v59, %v3594_v39  ;;  %v2717_v23 = vmul.f32 1.442695, %v2590_v21  ;;  %vm3561_vm13 = vweird.f32 %v2850_v22 }
 0x5b9   : > { %v7030_v30 = vpop.eup %4776  ;;  %4780 = vrcp.f32 %v2865_v18  ;;  %v3600_v15 = vmul.f32 %v6806_v28, %v3599_v43  ;;  %v3640_v50 = vand.u32 2147483647, %v2865_v18  ;;  %v3642_v49 = vand.u32 2147483648, %v2865_v18 }
 0x5ba   : > { %v2905_v10 = vsel %vm2334_vm3, %v7030_v30, 0.0  ;;  %4782 = vpow2.f32 %v2717_v23  ;;  %vm3566_vm0 = vcmp.eq.f32.partialorder %v3565_v53, 8.507059e+37  ;;  %v3568_v6 = vor.u32 1.1754944e-38, %v3567_v3 }
 0x5bb   : > { %v3916_v40 = vsel %vm2269_vm2, %v3600_v15, %v7348_v63  ;;  %2906 = vadd.xlane.f32.xlu0 %v2905_v10  ;;  %vm3636_vm1 = vweird.f32 %v2865_v18  ;;  %vm7050_vm4 = vcmp.eq.f32.partialorder %v3640_v50, 8.507059e+37  ;;  %v3643_v7 = vor.u32 1.1754944e-38, %v3642_v49  ;;  %v7351_v15 = vld [vmem:[#allocation31_spill] sm:$0xff] }
 0x5bc   : > { %3980 = vst.msk [vmem:[%s6114_s11 + $0x168] sm:$0xff] %vm2334_vm3, %v3916_v40 }
 0x5bd   : > { %v4779_v32 = vpop.eup %4778  ;;  %v7042_v12 = vpop.xlane.xlu0 %2852 }
 0x5be   : > { %v3557_v25 = vmul.f32 %v4779_v32, %v2850_v22  ;;  %v7040_v38 = vpop.xlane.xlu2 %2858  ;;  %vm3562_vm12 = vweird.f32 %v4779_v32  ;;  %v3582_v43 = vand.u32 2147483648, %v7042_v12  ;;  %v3580_v40 = vand.u32 2147483647, %v7042_v12 }
 0x5bf   : > { %v4781_v31 = vpop.eup %4780  ;;  %4784 = vrcp.f32 %v7040_v38  ;;  %vm3563_vm15 = vmor %vm3561_vm13, %vm3562_vm12  ;;  %v3610_v41 = vand.u32 2147483647, %v7040_v38  ;;  %v3612_v39 = vand.u32 2147483648, %v7040_v38  ;;  %vm3606_vm8 = vweird.f32 %v7040_v38 }
 0x5c0   : > { %v3558_v28 = vsub.f32 1.0, %v3557_v25  ;;  %v3632_v47 = vmul.f32 %v4781_v31, %v2865_v18  ;;  %4786 = vrcp.f32 %v7042_v12  ;;  %v7046_v55 = vpop.eup %4782  ;;  %vm3637_vm14 = vweird.f32 %v4781_v31 }
 0x5c1   : > { %v2908_v61 = vsel %vm2334_vm3, %v7046_v55, 0.0  ;;  %vm3638_vm5 = vmor %vm3636_vm1, %vm3637_vm14  ;;  %vm3576_vm10 = vweird.f32 %v7042_v12  ;;  %vm3611_vm11 = vcmp.eq.f32.partialorder %v3610_v41, 8.507059e+37  ;;  %v3583_v3 = vor.u32 1.1754944e-38, %v3582_v43 }
 0x5c2   : > { %v3559_v24 = vmul.f32 %v4779_v32, %v3558_v28  ;;  %v3633_v29 = vsub.f32 1.0, %v3632_v47  ;;  %2909 = vadd.xlane.f32.xlu1 %v2908_v61  ;;  %vm3581_vm13 = vcmp.eq.f32.partialorder %v3580_v40, 8.507059e+37 }
 0x5c4   : > { %v3560_v11 = vadd.f32 %v4779_v32, %v3559_v24  ;;  %v3634_v42 = vmul.f32 %v4781_v31, %v3633_v29 }
 0x5c5   : > { %v4785_v4 = vpop.eup %4784  ;;  %v7057_v33 = vpop.xlane.xlu0 %2861 }
 0x5c6   : > { %v4787_v19 = vpop.eup %4786  ;;  %v3564_v62 = vsel %vm3563_vm15, %v4779_v32, %v3560_v11  ;;  %v3635_v52 = vadd.f32 %v4781_v31, %v3634_v42  ;;  %v3602_v60 = vmul.f32 %v4785_v4, %v7040_v38  ;;  %v7055_v20 = vpop.xlane.xlu2 %2867  ;;  %vm3607_vm6 = vweird.f32 %v4785_v4  ;;  %v7352_v32 = vld [vmem:[#allocation19_spill] sm:$0xff] }
 0x5c7   : > { %v3569_v44 = vsel %vm3566_vm0, %v3568_v6, %v3564_v62  ;;  %v3572_v5 = vmul.f32 %v4787_v19, %v7042_v12  ;;  %4788 = vrcp.f32 %v7055_v20  ;;  %vm3577_vm7 = vweird.f32 %v4787_v19  ;;  %vm3608_vm9 = vmor %vm3606_vm8, %vm3607_vm6  ;;  %v7353_v62 = vld [vmem:[#allocation34_spill] sm:$0xff] }
 0x5c8   : > { %v3570_v22 = vmul.f32 %v6847_v27, %v3569_v44  ;;  %v3639_v54 = vsel %vm3638_vm5, %v4781_v31, %v3635_v52  ;;  %v3603_v59 = vsub.f32 1.0, %v3602_v60  ;;  %4790 = vrcp.f32 %v7057_v33  ;;  %vm3578_vm12 = vmor %vm3576_vm10, %vm3577_vm7 }
 0x5c9   : > { %v3644_v21 = vsel %vm7050_vm4, %v3643_v7, %v3639_v54  ;;  %v3573_v18 = vsub.f32 1.0, %v3572_v5  ;;  %v3655_v6 = vand.u32 2147483647, %v7055_v20  ;;  %v3657_v46 = vand.u32 2147483648, %v7055_v20 }
 0x5ca   : > { %v3914_v23 = vsel %vm2269_vm2, %v3570_v22, %v7351_v15  ;;  %v3645_v10 = vmul.f32 %v6865_v56, %v3644_v21  ;;  %v3604_v63 = vmul.f32 %v4785_v4, %v3603_v59  ;;  %v3613_v56 = vor.u32 1.1754944e-38, %v3612_v39 }
 0x5cb   : > { %3978 = vst.msk [vmem:[%s6114_s11 + $0x158] sm:$0xff] %vm2334_vm3, %v3914_v23  ;;  %v3574_v27 = vmul.f32 %v4787_v19, %v3573_v18  ;;  %v3625_v44 = vand.u32 2147483647, %v7057_v33  ;;  %vm3651_vm15 = vweird.f32 %v7055_v20  ;;  %v3627_v5 = vand.u32 2147483648, %v7057_v33 }
 0x5cc   : > { %v3919_v25 = vsel %vm2269_vm2, %v3645_v10, %v7352_v32  ;;  %v3605_v31 = vadd.f32 %v4785_v4, %v3604_v63  ;;  %v3658_v54 = vor.u32 1.1754944e-38, %v3657_v46  ;;  %vm3656_vm4 = vcmp.eq.f32.partialorder %v3655_v6, 8.507059e+37 }
 0x5cd   : > { %v4789_v28 = vpop.eup %4788  ;;  %3983 = vst.msk [vmem:[%s6114_s11 + $0x180] sm:$0xff] %vm2334_vm3, %v3919_v25  ;;  %v3575_v47 = vadd.f32 %v4787_v19, %v3574_v27  ;;  %v7085_v24 = vpop.xlane.xlu0 %2870  ;;  %vm3621_vm5 = vweird.f32 %v7057_v33  ;;  %vm3626_vm6 = vcmp.eq.f32.partialorder %v3625_v44, 8.507059e+37  ;;  %v3628_v23 = vor.u32 1.1754944e-38, %v3627_v5  ;;  %v7358_v5 = vld [vmem:[#allocation21_spill] sm:$0xff] }
 0x5ce   : > { %v3609_v53 = vsel %vm3608_vm9, %v4785_v4, %v3605_v31  ;;  %v3647_v50 = vmul.f32 %v4789_v28, %v7055_v20  ;;  %4792 = vrcp.f32 %v7085_v24  ;;  %v4791_v61 = vpop.eup %4790  ;;  %vm3652_vm14 = vweird.f32 %v4789_v28  ;;  %v7355_v31 = vld [vmem:[#allocation26_spill] sm:$0xff] }
 0x5cf   : > { %v3614_v29 = vsel %vm3611_vm11, %v3613_v56, %v3609_v53  ;;  %v3579_v49 = vsel %vm3578_vm12, %v4787_v19, %v3575_v47  ;;  %v7088_v38 = vpop.xlane.xlu1 %2873  ;;  %v3617_v19 = vmul.f32 %v4791_v61, %v7057_v33  ;;  %vm3653_vm0 = vmor %vm3651_vm15, %vm3652_vm14  ;;  %vm3622_vm1 = vweird.f32 %v4791_v61 }
 0x5d0   : > { %v3615_v12 = vmul.f32 %v6878_v51, %v3614_v29  ;;  %v3584_v11 = vsel %vm3581_vm13, %v3583_v3, %v3579_v49  ;;  %v3648_v42 = vsub.f32 1.0, %v3647_v50  ;;  %4794 = vrcp.f32 %v7088_v38  ;;  %v7354_v51 = vld [vmem:[#allocation32_spill] sm:$0xff]  ;;  %vm3623_vm7 = vmor %vm3621_vm5, %vm3622_vm1  ;;  %v7356_v29 = vld [vmem:[#allocation23_spill] sm:$0xff] }
 0x5d1   : > { %v3585_v4 = vmul.f32 %v6871_v1, %v3584_v11  ;;  %v3618_v60 = vsub.f32 1.0, %v3617_v19  ;;  %v3672_v63 = vand.u32 2147483648, %v7085_v24  ;;  %v3670_v32 = vand.u32 2147483647, %v7085_v24 }
 0x5d2   : > { %v3917_v52 = vsel %vm2269_vm2, %v3615_v12, %v7353_v62  ;;  %v3649_v7 = vmul.f32 %v4789_v28, %v3648_v42  ;;  %vm3666_vm9 = vweird.f32 %v7085_v24  ;;  %v3687_v50 = vand.u32 2147483648, %v7088_v38 }
 0x5d3   : > { %3981 = vst.msk [vmem:[%s6114_s11 + $0x170] sm:$0xff] %vm2334_vm3, %v3917_v52  ;;  %v3915_v1 = vsel %vm2269_vm2, %v3585_v4, %v7354_v51  ;;  %v3619_v59 = vmul.f32 %v4791_v61, %v3618_v60  ;;  %v3673_v3 = vor.u32 1.1754944e-38, %v3672_v63  ;;  %v3685_v12 = vand.u32 2147483647, %v7088_v38  ;;  %v7357_v52 = vld [vmem:[#allocation2_spill] sm:$0xff]  ;;  %v7359_v63 = vld [vmem:[#allocation3_spill] sm:$0xff] }
 0x5d4   : > { %3979 = vst.msk [vmem:[%s6114_s11 + $0x160] sm:$0xff] %vm2334_vm3, %v3915_v1  ;;  %v3650_v41 = vadd.f32 %v4789_v28, %v3649_v7  ;;  %v4793_v22 = vpop.eup %4792  ;;  %vm3671_vm12 = vcmp.eq.f32.partialorder %v3670_v32, 8.507059e+37  ;;  %vm3681_vm13 = vweird.f32 %v7088_v38  ;;  %v3688_v46 = vor.u32 1.1754944e-38, %v3687_v50 }
 0x5d5   : > { %v3662_v21 = vmul.f32 %v4793_v22, %v7085_v24  ;;  %v3620_v43 = vadd.f32 %v4791_v61, %v3619_v59  ;;  %vm3667_vm8 = vweird.f32 %v4793_v22  ;;  %vm3686_vm15 = vcmp.eq.f32.partialorder %v3685_v12, 8.507059e+37 }
 0x5d6   : > { %v3654_v39 = vsel %vm3653_vm0, %v4789_v28, %v3650_v41  ;;  %v4795_v15 = vpop.eup %4794  ;;  %vm3668_vm10 = vmor %vm3666_vm9, %vm3667_vm8 }
 0x5d7   : > { %v3659_v18 = vsel %vm3656_vm4, %v3658_v54, %v3654_v39  ;;  %v3663_v10 = vsub.f32 1.0, %v3662_v21  ;;  %v3624_v40 = vsel %vm3623_vm7, %v4791_v61, %v3620_v43  ;;  %v3677_v25 = vmul.f32 %v4795_v15, %v7088_v38 }
 0x5d8   : > { %v3660_v20 = vmul.f32 %v6898_v0, %v3659_v18  ;;  %v2877_v27 = vpop.xlane.xlu2 %2876  ;;  %v3629_v28 = vsel %vm3626_vm6, %v3628_v23, %v3624_v40  ;;  %vm3682_vm11 = vweird.f32 %v4795_v15 }
 0x5d9   : > { %4796 = vrcp.f32 %v2877_v27  ;;  %v3664_v56 = vmul.f32 %v4793_v22, %v3663_v10  ;;  %v3630_v0 = vmul.f32 %v6894_v45, %v3629_v28  ;;  %v3678_v47 = vsub.f32 1.0, %v3677_v25  ;;  %vm3683_vm14 = vmor %vm3681_vm13, %vm3682_vm11 }
 0x5da   : > { %v3920_v33 = vsel %vm2269_vm2, %v3660_v20, %v7355_v31  ;;  %v3702_v38 = vand.u32 2147483648, %v2877_v27  ;;  %vm3696_vm1 = vweird.f32 %v2877_v27 }
 0x5db   : > { %3984 = vst.msk [vmem:[%s6114_s11 + $0x188] sm:$0xff] %vm2334_vm3, %v3920_v33  ;;  %v3665_v53 = vadd.f32 %v4793_v22, %v3664_v56  ;;  %v3918_v49 = vsel %vm2269_vm2, %v3630_v0, %v7356_v29  ;;  %v3679_v61 = vmul.f32 %v4795_v15, %v3678_v47  ;;  %v7360_v0 = vld [vmem:[#allocation29_spill] sm:$0xff] }
 0x5dc   : > { %3982 = vst.msk [vmem:[%s6114_s11 + $0x178] sm:$0xff] %vm2334_vm3, %v3918_v49  ;;  %v3703_v39 = vor.u32 1.1754944e-38, %v3702_v38 }
 0x5dd   : > { %v3669_v11 = vsel %vm3668_vm10, %v4793_v22, %v3665_v53  ;;  %v3680_v4 = vadd.f32 %v4795_v15, %v3679_v61 }
 0x5de   : > { %v3674_v24 = vsel %vm3671_vm12, %v3673_v3, %v3669_v11 }
 0x5df   : > { %v2880_v45 = vpop.xlane.xlu0 %2879  ;;  %v4797_v42 = vpop.eup %4796  ;;  %v3675_v6 = vmul.f32 %v6910_v14, %v3674_v24  ;;  %v3684_v62 = vsel %vm3683_vm14, %v4795_v15, %v3680_v4  ;;  %v3700_v14 = vand.u32 2147483647, %v2877_v27 }
 0x5e0   : > { %4798 = vrcp.f32 %v2880_v45  ;;  %v3692_v19 = vmul.f32 %v4797_v42, %v2877_v27  ;;  %v3689_v51 = vsel %vm3686_vm15, %v3688_v46, %v3684_v62  ;;  %vm3697_vm0 = vweird.f32 %v4797_v42  ;;  %v7361_v62 = vld [vmem:[#allocation24_spill] sm:$0xff] }
 0x5e1   : > { %v3921_v7 = vsel %vm2269_vm2, %v3675_v6, %v7357_v52  ;;  %v3690_v60 = vmul.f32 %v6912_v2, %v3689_v51  ;;  %vm3698_vm4 = vmor %vm3696_vm1, %vm3697_vm0  ;;  %vm3701_vm5 = vcmp.eq.f32.partialorder %v3700_v14, 8.507059e+37  ;;  %v3715_v43 = vand.u32 2147483647, %v2880_v45 }
 0x5e2   : > { %v3693_v1 = vsub.f32 1.0, %v3692_v19  ;;  %3985 = vst.msk [vmem:[%s6114_s11 + $0x190] sm:$0xff] %vm2334_vm3, %v3921_v7  ;;  %v3717_v15 = vand.u32 2147483648, %v2880_v45  ;;  %vm3711_vm7 = vweird.f32 %v2880_v45 }
 0x5e3   : > { %v3922_v22 = vsel %vm2269_vm2, %v3690_v60, %v7358_v5  ;;  %vm3716_vm9 = vcmp.eq.f32.partialorder %v3715_v43, 8.507059e+37  ;;  %v7362_v5 = vld [vmem:[#allocation4_spill] sm:$0xff] }
 0x5e4   : > { %v3694_v44 = vmul.f32 %v4797_v42, %v3693_v1  ;;  %3986 = vst.msk [vmem:[%s6114_s11 + $0x198] sm:$0xff] %vm2334_vm3, %v3922_v22  ;;  %v3718_v32 = vor.u32 1.1754944e-38, %v3717_v15 }
 0x5e6   : > { %v4799_v41 = vpop.eup %4798  ;;  %v3695_v54 = vadd.f32 %v4797_v42, %v3694_v44 }
 0x5e7   : > { %v3707_v59 = vmul.f32 %v4799_v41, %v2880_v45  ;;  %vm3712_vm6 = vweird.f32 %v4799_v41 }
 0x5e8   : > { %v3699_v21 = vsel %vm3698_vm4, %v4797_v42, %v3695_v54  ;;  %v2883_v20 = vpop.xlane.xlu1 %2882  ;;  %vm3713_vm8 = vmor %vm3711_vm7, %vm3712_vm6 }
 0x5e9   : > { %v3708_v2 = vsub.f32 1.0, %v3707_v59  ;;  %v3704_v18 = vsel %vm3701_vm5, %v3703_v39, %v3699_v21  ;;  %4800 = vrcp.f32 %v2883_v20  ;;  %v3732_v3 = vand.u32 2147483648, %v2883_v20 }
 0x5ea   : > { %v3705_v23 = vmul.f32 %v6930_v26, %v3704_v18  ;;  %v3730_v29 = vand.u32 2147483647, %v2883_v20  ;;  %vm3726_vm11 = vweird.f32 %v2883_v20 }
 0x5eb   : > { %v3709_v10 = vmul.f32 %v4799_v41, %v3708_v2 }
 0x5ec   : > { %v3923_v27 = vsel %vm2269_vm2, %v3705_v23, %v7359_v63  ;;  %vm3731_vm13 = vcmp.eq.f32.partialorder %v3730_v29, 8.507059e+37 }
 0x5ed   : > { %v3710_v40 = vadd.f32 %v4799_v41, %v3709_v10  ;;  %3987 = vst.msk [vmem:[%s6114_s11 + $0x1a0] sm:$0xff] %vm2334_vm3, %v3923_v27  ;;  %v7363_v27 = vld [vmem:[#allocation27_spill] sm:$0xff] }
 0x5ef   : > { %v3714_v25 = vsel %vm3713_vm8, %v4799_v41, %v3710_v40  ;;  %v4801_v33 = vpop.eup %4800  ;;  %v2886_v28 = vpop.xlane.xlu2 %2885 }
 0x5f0   : > { %v3719_v31 = vsel %vm3716_vm9, %v3718_v32, %v3714_v25  ;;  %v3722_v56 = vmul.f32 %v4801_v33, %v2883_v20  ;;  %4802 = vrcp.f32 %v2886_v28  ;;  %vm3727_vm10 = vweird.f32 %v4801_v33 }
 0x5f1   : > { %v3720_v26 = vmul.f32 %v6937_v48, %v3719_v31  ;;  %vm3728_vm12 = vmor %vm3726_vm11, %vm3727_vm10  ;;  %v3733_v48 = vor.u32 1.1754944e-38, %v3732_v3  ;;  %v3747_v6 = vand.u32 2147483648, %v2886_v28  ;;  %v3745_v19 = vand.u32 2147483647, %v2886_v28 }
 0x5f2   : > { %v3723_v53 = vsub.f32 1.0, %v3722_v56  ;;  %vm3741_vm15 = vweird.f32 %v2886_v28 }
 0x5f3   : > { %v3924_v47 = vsel %vm2269_vm2, %v3720_v26, %v7360_v0  ;;  %v3748_v51 = vor.u32 1.1754944e-38, %v3747_v6  ;;  %vm3746_vm1 = vcmp.eq.f32.partialorder %v3745_v19, 8.507059e+37 }
 0x5f4   : > { %3988 = vst.msk [vmem:[%s6114_s11 + $0x1a8] sm:$0xff] %vm2334_vm3, %v3924_v47  ;;  %v3724_v50 = vmul.f32 %v4801_v33, %v3723_v53 }
 0x5f6   : > { %v4803_v49 = vpop.eup %4802  ;;  %v3725_v61 = vadd.f32 %v4801_v33, %v3724_v50  ;;  %v7364_v50 = vld [vmem:[#allocation5_spill] sm:$0xff] }
 0x5f7   : > { %v3737_v12 = vmul.f32 %v4803_v49, %v2886_v28  ;;  %v2889_v45 = vpop.xlane.xlu0 %2888  ;;  %vm3742_vm14 = vweird.f32 %v4803_v49 }
 0x5f8   : > { %v3729_v11 = vsel %vm3728_vm12, %v4801_v33, %v3725_v61  ;;  %4804 = vrcp.f32 %v2889_v45  ;;  %vm3743_vm0 = vmor %vm3741_vm15, %vm3742_vm14  ;;  %v3762_v54 = vand.u32 2147483648, %v2889_v45  ;;  %v3760_v39 = vand.u32 2147483647, %v2889_v45 }
 0x5f9   : > { %v3734_v42 = vsel %vm3731_vm13, %v3733_v48, %v3729_v11  ;;  %v3738_v24 = vsub.f32 1.0, %v3737_v12  ;;  %vm3756_vm5 = vweird.f32 %v2889_v45 }
 0x5fa   : > { %v3735_v4 = vmul.f32 %v6949_v8, %v3734_v42  ;;  %v3763_v18 = vor.u32 1.1754944e-38, %v3762_v54  ;;  %vm3761_vm7 = vcmp.eq.f32.partialorder %v3760_v39, 8.507059e+37 }
 0x5fb   : > { %v3739_v46 = vmul.f32 %v4803_v49, %v3738_v24 }
 0x5fc   : > { %v3925_v52 = vsel %vm2269_vm2, %v3735_v4, %v7361_v62 }
 0x5fd   : > { %3989 = vst.msk [vmem:[%s6114_s11 + $0x1b0] sm:$0xff] %vm2334_vm3, %v3925_v52  ;;  %v3740_v7 = vadd.f32 %v4803_v49, %v3739_v46  ;;  %v7365_v52 = vld [vmem:[#allocation6_spill] sm:$0xff] }
 0x5fe   : > { %v4805_v1 = vpop.eup %4804 }
 0x5ff   : > { %v3744_v60 = vsel %vm3743_vm0, %v4803_v49, %v3740_v7  ;;  %v3752_v8 = vmul.f32 %v4805_v1, %v2889_v45  ;;  %vm3757_vm4 = vweird.f32 %v4805_v1 }
 0x600   : > { %v3749_v38 = vsel %vm3746_vm1, %v3748_v51, %v3744_v60  ;;  %v2892_v44 = vpop.xlane.xlu1 %2891  ;;  %vm3758_vm6 = vmor %vm3756_vm5, %vm3757_vm4 }
 0x601   : > { %v3750_v14 = vmul.f32 %v6963_v57, %v3749_v38  ;;  %4806 = vrcp.f32 %v2892_v44  ;;  %v3753_v41 = vsub.f32 1.0, %v3752_v8  ;;  %v3777_v63 = vand.u32 2147483648, %v2892_v44 }
 0x602   : > { %v3775_v25 = vand.u32 2147483647, %v2892_v44  ;;  %vm3771_vm9 = vweird.f32 %v2892_v44 }
 0x603   : > { %v3926_v22 = vsel %vm2269_vm2, %v3750_v14, %v7362_v5  ;;  %v3754_v59 = vmul.f32 %v4805_v1, %v3753_v41  ;;  %v3778_v26 = vor.u32 1.1754944e-38, %v3777_v63 }
 0x604   : > { %3990 = vst.msk [vmem:[%s6114_s11 + $0x1b8] sm:$0xff] %vm2334_vm3, %v3926_v22  ;;  %vm3776_vm11 = vcmp.eq.f32.partialorder %v3775_v25, 8.507059e+37  ;;  %v7366_v22 = vld [vmem:[#allocation7_spill] sm:$0xff] }
 0x605   : > { %v3755_v21 = vadd.f32 %v4805_v1, %v3754_v59 }
 0x607   : > { %v4807_v2 = vpop.eup %4806  ;;  %v3759_v43 = vsel %vm3758_vm6, %v4805_v1, %v3755_v21  ;;  %v2895_v15 = vpop.xlane.xlu2 %2894 }
 0x608   : > { %v3767_v57 = vmul.f32 %v4807_v2, %v2892_v44  ;;  %v3764_v20 = vsel %vm3761_vm7, %v3763_v18, %v3759_v43  ;;  %4808 = vrcp.f32 %v2895_v15  ;;  %vm3772_vm8 = vweird.f32 %v4807_v2 }
 0x609   : > { %v3765_v23 = vmul.f32 %v6971_v58, %v3764_v20  ;;  %vm3773_vm10 = vmor %vm3771_vm9, %vm3772_vm8  ;;  %v3792_v3 = vand.u32 2147483648, %v2895_v15  ;;  %v3790_v61 = vand.u32 2147483647, %v2895_v15  ;;  %vm3786_vm13 = vweird.f32 %v2895_v15 }
 0x60a   : > { %v3768_v10 = vsub.f32 1.0, %v3767_v57 }
 0x60b   : > { %v3927_v40 = vsel %vm2269_vm2, %v3765_v23, %v7363_v27  ;;  %v3793_v11 = vor.u32 1.1754944e-38, %v3792_v3  ;;  %vm3791_vm15 = vcmp.eq.f32.partialorder %v3790_v61, 8.507059e+37 }
 0x60c   : > { %v3769_v32 = vmul.f32 %v4807_v2, %v3768_v10  ;;  %3991 = vst.msk [vmem:[%s6114_s11 + $0x1c0] sm:$0xff] %vm2334_vm3, %v3927_v40  ;;  %v7367_v10 = vld [vmem:[#allocation9_spill] sm:$0xff] }
 0x60e   : > { %v3770_v31 = vadd.f32 %v4807_v2, %v3769_v32  ;;  %v4809_v33 = vpop.eup %4808 }
 0x60f   : > { %v2898_v28 = vpop.xlane.xlu0 %2897  ;;  %v3782_v58 = vmul.f32 %v4809_v33, %v2895_v15  ;;  %vm3787_vm12 = vweird.f32 %v4809_v33 }
 0x610   : > { %v3774_v56 = vsel %vm3773_vm10, %v4807_v2, %v3770_v31  ;;  %4810 = vrcp.f32 %v2898_v28  ;;  %vm3788_vm14 = vmor %vm3786_vm13, %vm3787_vm12  ;;  %v3807_v46 = vand.u32 2147483648, %v2898_v28  ;;  %v3805_v62 = vand.u32 2147483647, %v2898_v28 }
 0x611   : > { %v3779_v0 = vsel %vm3776_vm11, %v3778_v26, %v3774_v56  ;;  %v3783_v53 = vsub.f32 1.0, %v3782_v58  ;;  %vm3801_vm1 = vweird.f32 %v2898_v28 }
 0x612   : > { %v3780_v47 = vmul.f32 %v6982_v37, %v3779_v0  ;;  %v3808_v60 = vor.u32 1.1754944e-38, %v3807_v46  ;;  %vm3806_vm5 = vcmp.eq.f32.partialorder %v3805_v62, 8.507059e+37 }
 0x613   : > { %v3784_v49 = vmul.f32 %v4809_v33, %v3783_v53 }
 0x614   : > { %v3928_v29 = vsel %vm2269_vm2, %v3780_v47, %v7364_v50 }
 0x615   : > { %3992 = vst.msk [vmem:[%s6114_s11 + $0x1c8] sm:$0xff] %vm2334_vm3, %v3928_v29  ;;  %v3785_v12 = vadd.f32 %v4809_v33, %v3784_v49 }
 0x616   : > { %v4811_v48 = vpop.eup %4810 }
 0x617   : > { %v3797_v45 = vmul.f32 %v4811_v48, %v2898_v28  ;;  %v2901_v42 = vpop.xlane.xlu1 %2900  ;;  %v3789_v37 = vsel %vm3788_vm14, %v4809_v33, %v3785_v12  ;;  %vm3802_vm0 = vweird.f32 %v4811_v48  ;;  %v7368_v28 = vld [vmem:[#allocation10_spill] sm:$0xff] }
 0x618   : > { %4812 = vrcp.f32 %v2901_v42  ;;  %v3794_v24 = vsel %vm3791_vm15, %v3793_v11, %v3789_v37  ;;  %vm3803_vm4 = vmor %vm3801_vm1, %vm3802_vm0  ;;  %v3822_v5 = vand.u32 2147483648, %v2901_v42  ;;  %v3820_v39 = vand.u32 2147483647, %v2901_v42 }
 0x619   : > { %v3798_v4 = vsub.f32 1.0, %v3797_v45  ;;  %v3795_v6 = vmul.f32 %v6993_v35, %v3794_v24  ;;  %vm3816_vm7 = vweird.f32 %v2901_v42 }
 0x61a   : > { %v3823_v18 = vor.u32 1.1754944e-38, %v3822_v5  ;;  %vm3821_vm9 = vcmp.eq.f32.partialorder %v3820_v39, 8.507059e+37 }
 0x61b   : > { %v3799_v19 = vmul.f32 %v4811_v48, %v3798_v4  ;;  %v3929_v7 = vsel %vm2269_vm2, %v3795_v6, %v7365_v52 }
 0x61c   : > { %3993 = vst.msk [vmem:[%s6114_s11 + $0x1d0] sm:$0xff] %vm2334_vm3, %v3929_v7 }
 0x61d   : > { %v3800_v51 = vadd.f32 %v4811_v48, %v3799_v19 }
 0x61e   : > { %v4813_v1 = vpop.eup %4812 }
 0x61f   : > { %v3804_v38 = vsel %vm3803_vm4, %v4811_v48, %v3800_v51  ;;  %v3812_v8 = vmul.f32 %v4813_v1, %v2901_v42  ;;  %v2904_v35 = vpop.xlane.xlu2 %2903  ;;  %vm3817_vm6 = vweird.f32 %v4813_v1 }
 0x620   : > { %v3809_v44 = vsel %vm3806_vm5, %v3808_v60, %v3804_v38  ;;  %4814 = vrcp.f32 %v2904_v35  ;;  %vm3818_vm8 = vmor %vm3816_vm7, %vm3817_vm6  ;;  %v3837_v23 = vand.u32 2147483648, %v2904_v35  ;;  %v3835_v40 = vand.u32 2147483647, %v2904_v35 }
 0x621   : > { %v3810_v14 = vmul.f32 %v7004_v9, %v3809_v44  ;;  %v3813_v41 = vsub.f32 1.0, %v3812_v8  ;;  %vm3831_vm11 = vweird.f32 %v2904_v35 }
 0x622   : > { %v3838_v25 = vor.u32 1.1754944e-38, %v3837_v23  ;;  %vm3836_vm13 = vcmp.eq.f32.partialorder %v3835_v40, 8.507059e+37 }
 0x623   : > { %v3930_v54 = vsel %vm2269_vm2, %v3810_v14, %v7366_v22  ;;  %v3814_v59 = vmul.f32 %v4813_v1, %v3813_v41 }
 0x624   : > { %3994 = vst.msk [vmem:[%s6114_s11 + $0x1d8] sm:$0xff] %vm2334_vm3, %v3930_v54 }
 0x625   : > { %v3815_v21 = vadd.f32 %v4813_v1, %v3814_v59 }
 0x626   : > { %v4815_v2 = vpop.eup %4814 }
 0x627   : > { %v3819_v43 = vsel %vm3818_vm8, %v4813_v1, %v3815_v21  ;;  %v3827_v9 = vmul.f32 %v4815_v2, %v2904_v35  ;;  %vm3832_vm10 = vweird.f32 %v4815_v2 }
 0x628   : > { %v3824_v57 = vsel %vm3821_vm9, %v3823_v18, %v3819_v43  ;;  %vm3833_vm12 = vmor %vm3831_vm11, %vm3832_vm10 }
 0x629   : > { %v3825_v15 = vmul.f32 %v7015_v13, %v3824_v57  ;;  %v3828_v20 = vsub.f32 1.0, %v3827_v9 }
 0x62b   : > { %v3931_v63 = vsel %vm2269_vm2, %v3825_v15, %v7367_v10  ;;  %v3829_v27 = vmul.f32 %v4815_v2, %v3828_v20 }
 0x62c   : > { %3995 = vst.msk [vmem:[%s6114_s11 + $0x1e0] sm:$0xff] %vm2334_vm3, %v3931_v63 }
 0x62d   : > { %v3830_v32 = vadd.f32 %v4815_v2, %v3829_v27 }
 0x62e   : > { %v2907_v31 = vpop.xlane.xlu0 %2906 }
 0x62f   : > { %v3834_v33 = vsel %vm3833_vm12, %v4815_v2, %v3830_v32  ;;  %4816 = vrcp.f32 %v2907_v31  ;;  %v3852_v3 = vand.u32 2147483648, %v2907_v31  ;;  %v3850_v29 = vand.u32 2147483647, %v2907_v31 }
 0x630   : > { %v3839_v13 = vsel %vm3836_vm13, %v3838_v25, %v3834_v33  ;;  %vm3846_vm15 = vweird.f32 %v2907_v31 }
 0x631   : > { %v3840_v26 = vmul.f32 %v7024_v36, %v3839_v13  ;;  %v3853_v36 = vor.u32 1.1754944e-38, %v3852_v3  ;;  %vm3851_vm1 = vcmp.eq.f32.partialorder %v3850_v29, 8.507059e+37 }
 0x633   : > { %v3932_v56 = vsel %vm2269_vm2, %v3840_v26, %v7368_v28 }
 0x634   : > { %3996 = vst.msk [vmem:[%s6114_s11 + $0x1e8] sm:$0xff] %vm2334_vm3, %v3932_v56 }
 0x635   : > { %v4817_v58 = vpop.eup %4816  ;;  %v2910_v47 = vpop.xlane.xlu1 %2909 }
 0x636   : > { %v3842_v0 = vmul.f32 %v4817_v58, %v2907_v31  ;;  %4818 = vrcp.f32 %v2910_v47  ;;  %vm3847_vm14 = vweird.f32 %v4817_v58  ;;  %v3867_v37 = vand.u32 2147483648, %v2910_v47 }
 0x637   : > { %vm3848_vm0 = vmor %vm3846_vm15, %vm3847_vm14  ;;  %v3865_v6 = vand.u32 2147483647, %v2910_v47  ;;  %vm3861_vm5 = vweird.f32 %v2910_v47 }
 0x638   : > { %v3843_v53 = vsub.f32 1.0, %v3842_v0  ;;  %v3868_v19 = vor.u32 1.1754944e-38, %v3867_v37 }
 0x639   : > { %vm3866_vm7 = vcmp.eq.f32.partialorder %v3865_v6, 8.507059e+37 }
 0x63a   : > { %v3844_v50 = vmul.f32 %v4817_v58, %v3843_v53 }
 0x63c   : > { %v3845_v49 = vadd.f32 %v4817_v58, %v3844_v50  ;;  %v4819_v61 = vpop.eup %4818 }
 0x63d   : > { %v3857_v12 = vmul.f32 %v4819_v61, %v2910_v47  ;;  %vm3862_vm4 = vweird.f32 %v4819_v61 }
 0x63e   : > { %v3849_v48 = vsel %vm3848_vm0, %v4817_v58, %v3845_v49  ;;  %vm3863_vm6 = vmor %vm3861_vm5, %vm3862_vm4 }
 0x63f   : > { %v3854_v11 = vsel %vm3851_vm1, %v3853_v36, %v3849_v48  ;;  %v3858_v42 = vsub.f32 1.0, %v3857_v12 }
 0x640   : > { %v3855_v45 = vmul.f32 %v7030_v30, %v3854_v11 }
 0x641   : > { %v3859_v4 = vmul.f32 %v4819_v61, %v3858_v42 }
 0x642   : > { %v3933_v24 = vsel %vm2269_vm2, %v3855_v45, %v6819_v34 }
 0x643   : > { %3997 = vst.msk [vmem:[%s6114_s11 + $0x1f0] sm:$0xff] %vm2334_vm3, %v3933_v24  ;;  %v3860_v46 = vadd.f32 %v4819_v61, %v3859_v4 }
 0x645   : > { %v3864_v62 = vsel %vm3863_vm6, %v4819_v61, %v3860_v46 }
 0x646   : > { %v3869_v52 = vsel %vm3866_vm7, %v3868_v19, %v3864_v62 }
 0x647   : > { %v3870_v30 = vmul.f32 %v7046_v55, %v3869_v52 }
 0x649   : > { %v3934_v7 = vsel %vm2269_vm2, %v3870_v30, %v6843_v17 }
 0x64a   : > { %3998 = vst.msk [vmem:[%s6114_s11 + $0x1f8] sm:$0xff] %vm2334_vm3, %v3934_v7 }
 0x64b PF: > { %s12_s9 = sadd.s32 1, %s4826_s9  }
 0x64c   : > { %p9_p4 = scmp.ge.s32.totalorder %s12_s9, 11  }
 0x64e   :  { %11 = sbr.rel (!%p9_p4) target bundleno = 1 (0x1), region = 58 }

</bundles_post_ra>
